<compile_context>
chip_gen: v5e
topology: v5e:2x2
jax: 0.10.0
libtpu: 0.0.40
codegen_flags: <defaults>
</compile_context>

<pallas_src>
import math

import jax
import jax.numpy as jnp
from jax.experimental import pallas as pl
from jax.experimental.pallas import tpu as pltpu


# ----------------------------------------------------------------------------- #
# Deterministic filter construction (standard steerable-pyramid radial/angular
# filters, built in-script, no checkpoint load).  Filters are sampled in NATURAL
# (un-shifted) rfft2 row order, so the indF/indB row permutations disappear.
# ----------------------------------------------------------------------------- #
def _freq_grid(h, w2):
    row = jnp.arange(h, dtype=jnp.float32)
    # un-shifted row r corresponds to shifted index (r + h//2) % h
    fy = (jnp.mod(row + h // 2, h) - h // 2) / (h / 2.0) * jnp.pi
    fx = jnp.arange(w2, dtype=jnp.float32) / max(w2 - 1, 1) * jnp.pi
    FY, FX = jnp.meshgrid(fy, fx, indexing="ij")
    r = jnp.sqrt(FX * FX + FY * FY)
    th = jnp.arctan2(FY, FX)
    return r, th


def _L(r):
    rc = jnp.maximum(r, 1e-12)
    mid = 2.0 * jnp.cos(jnp.pi / 2.0 * jnp.log2(4.0 * rc / jnp.pi))
    out = jnp.where(r <= jnp.pi / 4, 2.0, jnp.where(r >= jnp.pi / 2, 0.0, mid))
    return out.astype(jnp.float32)


def _H(r):
    rc = jnp.maximum(r, 1e-12)
    mid = jnp.cos(jnp.pi / 2.0 * jnp.log2(2.0 * rc / jnp.pi))
    out = jnp.where(r <= jnp.pi / 4, 0.0, jnp.where(r >= jnp.pi / 2, 1.0, mid))
    return out.astype(jnp.float32)


def B_matrix(K, h, w2):
    r, th = _freq_grid(h, w2)
    aK = 2.0 ** (K - 1) * math.factorial(K - 1) / math.sqrt(
        K * math.factorial(2 * (K - 1)))
    hr = _H(r)
    bands = [hr * aK * jnp.abs(jnp.cos(th - jnp.pi * k / K)) ** (K - 1)
             for k in range(K)]
    return jnp.stack(bands, axis=0).astype(jnp.float32)      # [K, h, w2]


def S_matrix(K, h, w2):
    _, th = _freq_grid(h, w2)
    bands = [jnp.where(jnp.cos(th - jnp.pi * k / K) >= 0, 1.0, -1.0)
             for k in range(K)]
    return jnp.stack(bands, axis=0).astype(jnp.float32)      # [K, h, w2]


def L_matrix_cropped(h, w2):
    r, _ = _freq_grid(h // 2, w2 // 2 + 1)
    return _L(r)                                             # [h//2, h//4+1]


def make_params(img_size, K, N, hilb=True, includeHF=True):
    """Build per-level fused filter stacks in natural rfft2 row order.

    Per level:
      F_main [nb, h, h//2]  band filters (l0 and Hilbert sign s folded in)
      F_nyq  [nb, h]        their Nyquist column (applied by XLA in the wrapper)
      L_main [h//2, h//4]   next-level lowpass filter (already /4, l0 folded)
      L_nyq  [h//2]         its Nyquist column
      mode   [nb] bool      True where the band is a Hilbert-pair band
    """
    assert img_size % (2 ** (N + 1)) == 0, "img_size too small for N levels"
    h = img_size
    r0, _ = _freq_grid(h, h // 2 + 1)
    h0 = _H(r0 / 2.0)                 # hl0[0] : level-0 highpass residual
    l0 = 0.5 * _L(r0 / 2.0)           # hl0[1] : level-0 radial lowpass

    levels = []
    for n in range(N):
        w2 = h // 2 + 1
        ns = h // 4
        b = B_matrix(K, h, w2)
        s = S_matrix(K, h, w2)
        lcrop = L_matrix_cropped(h, w2) / 4.0                 # matches l.div_(4)
        if n == 0:
            beff = b * l0[None]
            # central crop of l0 in natural row order: rows [0:h/4)++[3h/4:h)
            l0c = jnp.concatenate([l0[:ns], l0[3 * ns:]], axis=0)[:, :ns + 1]
            leff = lcrop * l0c
        else:
            beff = b
            leff = lcrop

        off = 1 if (includeHF and n == 0) else 0
        stack, modes = [], []
        if off:
            stack.append(h0)
            modes.append(False)
        for k in range(K):
            stack.append(beff[k])
            modes.append(False)
        if hilb:
            for k in range(K):
                stack.append(s[k] * beff[k])
                modes.append(True)
        F = jnp.stack(stack, axis=0).astype(jnp.float32)      # [nb, h, w2]

        levels.append(dict(
            F_main=F[..., : h // 2],
            F_nyq=F[..., h // 2],
            L_main=leff[:, :ns].astype(jnp.float32),
            L_nyq=leff[:, ns].astype(jnp.float32),
            mode=jnp.array(modes),
            off=off,
        ))
        h = h // 2
    return dict(levels=levels, K=K, N=N, hilb=hilb, includeHF=includeHF)


# ----------------------------------------------------------------------------- #
# VMEM budgeting / tiling
# ----------------------------------------------------------------------------- #
def _vmem_capacity_bytes():
    try:
        cap = int(pltpu.get_tpu_info().vmem_capacity_bytes)
    except Exception:
        cap = 64 << 20                                        # conservative (v7x)
    return max(48 << 20, min(cap, 128 << 20))


def _footprint_bytes(tb, bt, h, wh, hc, wc):
    f = 4
    inp = 2 * tb * h * wh * f * 2        # xr, xi (double buffered)
    filt = bt * h * wh * f * 2           # band-filter block (index moves with j)
    lfilt = hc * wc * f * 2              # cropped L filter (tiny)
    bout = 2 * tb * bt * h * wh * f * 2  # band outputs re/im (double buffered)
    lout = 2 * tb * hc * wc * f * 2      # lowpass outputs re/im
    work = 3 * tb * h * wh * f           # p/q/temp working intermediates
    return inp + filt + lfilt + bout + lout + work


def _pick_tiles(bc, nb, h, wh, hc, wc):
    budget = int(_vmem_capacity_bytes() * 0.35)
    div_bc = [d for d in range(1, bc + 1) if bc % d == 0]
    div_nb = [d for d in range(1, nb + 1) if nb % d == 0]
    # Prefer >=4 batch grid steps (>=2 per megacore TensorCore), then >=2.
    tb_cands = [1]
    for min_steps in (4, 2, 1):
        c = [d for d in div_bc if bc // d >= min_steps]
        if c:
            tb_cands = c
            break
    for tb in sorted(tb_cands, reverse=True):
        for bt in sorted(div_nb, reverse=True):
            if _footprint_bytes(tb, bt, h, wh, hc, wc) <= budget:
                return tb, bt
    return 1, 1


# ----------------------------------------------------------------------------- #
# Fused per-level Pallas kernel.
#
# Grid = (batch tiles, band tiles).  Each step multiplies the input spectrum by
# `bt` pre-fused filters; Hilbert-pair bands (global band index >= off+K) swap
# real/imag and negate via a scalar 0/1 mask derived from the band grid index.
# The next-level lowpass (central crop * cropped L filter) is produced once per
# batch tile under pl.when(band_step == 0) and stays resident across the band
# axis ("arbitrary").
# ----------------------------------------------------------------------------- #
def _make_level_kernel(bt, ns, wc, off, K):
    hilb_start = off + K

    def kernel(xr_ref, xi_ref, f_ref, l_ref, bre_ref, bim_ref, lre_ref, lim_ref):
        j = pl.program_id(1)
        xr = xr_ref[...]                         # (tb, h, wh)
        xi = xi_ref[...]

        for t in range(bt):
            f = f_ref[t][None]                   # (1, h, wh)
            p = f * xr
            q = f * xi
            # m = 1.0 for Hilbert-pair bands, 0.0 otherwise (scalar select).
            m = (j * bt + t >= hilb_start).astype(jnp.float32)
            w0 = 1.0 - m
            bre_ref[:, t:t + 1, :, :] = (w0 * p + m * q)[:, None, :, :]
            bim_ref[:, t:t + 1, :, :] = (w0 * q - m * p)[:, None, :, :]

        @pl.when(j == 0)
        def _():
            # Central crop in natural row order: rows [0:h/4) ++ [3h/4:h),
            # columns [0:wc), multiplied by the pre-fused cropped L filter.
            lf = l_ref[...]                      # (2*ns, wc)
            lre_ref[:, :ns, :] = lf[None, :ns] * xr[:, :ns, :wc]
            lre_ref[:, ns:, :] = lf[None, ns:] * xr[:, 3 * ns:, :wc]
            lim_ref[:, :ns, :] = lf[None, :ns] * xi[:, :ns, :wc]
            lim_ref[:, ns:, :] = lf[None, ns:] * xi[:, 3 * ns:, :wc]

    return kernel


def run_level(xre, xim, f_main, l_main, off, K):
    """One fused pyramid level on the padding-free half spectrum.

    xre, xim : [BC, h, h//2]   natural-order half spectrum (no Nyquist column)
    f_main   : [nb, h, h//2]   pre-fused band filters
    l_main   : [h//2, h//4]    pre-fused cropped lowpass filter
    Returns band_re/im [BC, nb, h, h//2] and low_re/im [BC, h//2, h//4].
    """
    bc, h, wh = xre.shape
    nb = f_main.shape[0]
    hc, wc = l_main.shape
    ns = h // 4

    tb, bt = _pick_tiles(bc, nb, h, wh, hc, wc)
    grid = (bc // tb, nb // bt)

    fp = _footprint_bytes(tb, bt, h, wh, hc, wc)
    cap = _vmem_capacity_bytes()
    vmem_limit = int(min(96 << 20, cap - (4 << 20),
                         max(32 << 20, 2 * fp + (8 << 20))))

    kernel = _make_level_kernel(bt=bt, ns=ns, wc=wc, off=off, K=K)

    return pl.pallas_call(
        kernel,
        grid=grid,
        in_specs=[
            pl.BlockSpec((tb, h, wh), lambda i, j: (i, 0, 0)),
            pl.BlockSpec((tb, h, wh), lambda i, j: (i, 0, 0)),
            pl.BlockSpec((bt, h, wh), lambda i, j: (j, 0, 0)),
            pl.BlockSpec((hc, wc), lambda i, j: (0, 0)),
        ],
        out_specs=(
            pl.BlockSpec((tb, bt, h, wh), lambda i, j: (i, j, 0, 0)),
            pl.BlockSpec((tb, bt, h, wh), lambda i, j: (i, j, 0, 0)),
            pl.BlockSpec((tb, hc, wc), lambda i, j: (i, 0, 0)),
            pl.BlockSpec((tb, hc, wc), lambda i, j: (i, 0, 0)),
        ),
        out_shape=(
            jax.ShapeDtypeStruct((bc, nb, h, wh), jnp.float32),
            jax.ShapeDtypeStruct((bc, nb, h, wh), jnp.float32),
            jax.ShapeDtypeStruct((bc, hc, wc), jnp.float32),
            jax.ShapeDtypeStruct((bc, hc, wc), jnp.float32),
        ),
        compiler_params=pltpu.CompilerParams(
            dimension_semantics=("parallel", "arbitrary"),
            vmem_limit_bytes=vmem_limit,
        ),
    )(xre, xim, f_main, l_main)


# ----------------------------------------------------------------------------- #
# Forward pass (semantics of SteerablePyramid.forward)
# ----------------------------------------------------------------------------- #
def steerable_pyramid_forward(x, params):
    hilb = params["hilb"]
    includeHF = params["includeHF"]
    K = params["K"]
    levels = params["levels"]
    N = len(levels)

    B, C, H, W = x.shape
    assert H == W
    bc = B * C

    # rfft2 (XLA), split into the Pallas-resident main block [.., :W/2] and the
    # tiny Nyquist column [.., W/2].  Natural row order throughout.
    fft = jnp.fft.rfft2(x).reshape(bc, H, W // 2 + 1)
    lf_re = jnp.real(fft[..., : W // 2]).astype(jnp.float32)
    lf_im = jnp.imag(fft[..., : W // 2]).astype(jnp.float32)
    ny_re = jnp.real(fft[..., W // 2]).astype(jnp.float32)
    ny_im = jnp.imag(fft[..., W // 2]).astype(jnp.float32)

    per_level = []
    for n in range(N):
        lvl = levels[n]
        h = lf_re.shape[-2]
        ns = h // 4

        bre, bim, lre, lim = run_level(lf_re, lf_im,
                                       lvl["F_main"], lvl["L_main"],
                                       lvl["off"], K)

        # Nyquist column of every band (tiny elementwise XLA op).
        mode = lvl["mode"][None, :, None]
        p = lvl["F_nyq"][None] * ny_re[:, None, :]
        q = lvl["F_nyq"][None] * ny_im[:, None, :]
        bny_re = jnp.where(mode, q, p)
        bny_im = jnp.where(mode, -p, q)
        per_level.append((bre, bim, bny_re, bny_im))

        # Nyquist column of the next-level lowpass (parent column h/4).
        col_re = jnp.concatenate([lf_re[:, :ns, ns], lf_re[:, 3 * ns:, ns]], axis=1)
        col_im = jnp.concatenate([lf_im[:, :ns, ns], lf_im[:, 3 * ns:, ns]], axis=1)
        ny_re = lvl["L_nyq"][None] * col_re
        ny_im = lvl["L_nyq"][None] * col_im
        lf_re, lf_im = lre, lim

    per_level.append((lf_re[:, None], lf_im[:, None], ny_re[:, None], ny_im[:, None]))

    # Re-attach the Nyquist column, build complex spectra, inverse FFT.
    spatial = []
    for ore, oim, nre, nim in per_level:
        re = jnp.concatenate([ore, nre[..., None]], axis=-1)
        im = jnp.concatenate([oim, nim[..., None]], axis=-1)
        h = re.shape[-2]
        w = (re.shape[-1] - 1) * 2
        sp = jnp.fft.irfft2(jax.lax.complex(re, im), s=(h, w))   # [bc, F, h, w]
        spatial.append(sp.reshape(B, C, sp.shape[1], h, w))

    if includeHF:
        spatial.insert(0, spatial[0][:, :, 0:1])
        spatial[1] = spatial[1][:, :, 1:]

    result = []
    n_out = len(spatial)
    for n, o in enumerate(spatial):
        if hilb:
            if (not includeHF or n > 0) and n < n_out - 1:
                nfeat = o.shape[2] // 2
                o1 = o[:, :, :nfeat][:, None]
                o2 = -o[:, :, nfeat:][:, None]
                o = jnp.concatenate([o2, o1], axis=1)            # [B, 2, C, K, h, w]
            else:
                o = o[:, None]                                   # [B, 1, C, F, h, w]
        if n > 0:
            o = o * (2.0 ** (n - 1))
        result.append(o)
    return result


# ----------------------------------------------------------------------------- #
if __name__ == "__main__":
    B, C, H = 2, 4, 16
    K, N = 4, 2  # N=2 keeps the smallest level at 4x4 (valid central crop)

    key = jax.random.PRNGKey(0)
    x = jax.random.normal(key, (B, C, H, H), dtype=jnp.float32)

    params = make_params(H, K, N, hilb=True, includeHF=True)
    fwd = jax.jit(lambda inp: steerable_pyramid_forward(inp, params))
    out = jax.block_until_ready(fwd(x))

    # shape / sanity checks (mirror the PyTorch output structure)
    assert out[0].shape == (B, 1, C, 1, H, H)
    assert out[1].shape == (B, 2, C, K, H, H)
    assert out[2].shape == (B, 2, C, K, H // 2, H // 2)
    assert out[3].shape == (B, 1, C, 1, H // 4, H // 4)
    assert all(o.dtype == jnp.float32 for o in out)
    assert all(bool(jnp.all(jnp.isfinite(o))) for o in out)

    # Light numerical self-check of the level-0 Pallas kernel against plain jnp.
    bc = B * C
    fft = jnp.fft.rfft2(x).reshape(bc, H, H // 2 + 1)
    xre = jnp.real(fft[..., : H // 2]).astype(jnp.float32)
    xim = jnp.imag(fft[..., : H // 2]).astype(jnp.float32)
    lvl = params["levels"][0]
    bre, bim, lre, lim = run_level(xre, xim, lvl["F_main"], lvl["L_main"],
                                   lvl["off"], K)
    m = lvl["mode"][None, :, None, None]
    p = lvl["F_main"][None] * xre[:, None]
    q = lvl["F_main"][None] * xim[:, None]
    assert bool(jnp.allclose(bre, jnp.where(m, q, p), atol=1e-4, rtol=1e-4))
    assert bool(jnp.allclose(bim, jnp.where(m, -p, q), atol=1e-4, rtol=1e-4))
    ns = H // 4
    crop_re = jnp.concatenate([xre[:, :ns, :ns], xre[:, 3 * ns:, :ns]], axis=1)
    assert bool(jnp.allclose(lre, lvl["L_main"][None] * crop_re,
                             atol=1e-4, rtol=1e-4))

    print("KERNEL_OK")
</pallas_src>

<mosaic_0001>
module attributes {stable_mosaic.version = 11 : i64} {
  func.func @kernel(%arg0: i32, %arg1: i32, %arg2: memref<2x16x8xf32, #tpu.memory_space<vmem>>, %arg3: memref<2x16x8xf32, #tpu.memory_space<vmem>>, %arg4: memref<9x16x8xf32, #tpu.memory_space<vmem>>, %arg5: memref<8x4xf32, #tpu.memory_space<vmem>>, %arg6: memref<2x9x16x8xf32, #tpu.memory_space<vmem>>, %arg7: memref<2x9x16x8xf32, #tpu.memory_space<vmem>>, %arg8: memref<2x8x4xf32, #tpu.memory_space<vmem>>, %arg9: memref<2x8x4xf32, #tpu.memory_space<vmem>>) attributes {dimension_semantics = [#tpu.dimension_semantics<parallel>, #tpu.dimension_semantics<arbitrary>], iteration_bounds = array<i64: 4, 1>, scalar_prefetch = 0 : i64, scratch_operands = 0 : i64, tpu.core_type = #tpu.core_type<tc>, window_params = [{transform_indices = @transform_0, window_bounds = array<i64: 2, 16, 8>}, {transform_indices = @transform_1, window_bounds = array<i64: 2, 16, 8>}, {transform_indices = @transform_2, window_bounds = array<i64: 9, 16, 8>}, {pipeline_mode = #tpu.pipeline_mode<synchronous>, transform_indices = @transform_3, window_bounds = array<i64: 8, 4>}, {transform_indices = @transform_4, window_bounds = array<i64: 2, 9, 16, 8>}, {transform_indices = @transform_5, window_bounds = array<i64: 2, 9, 16, 8>}, {transform_indices = @transform_6, window_bounds = array<i64: 2, 8, 4>}, {transform_indices = @transform_7, window_bounds = array<i64: 2, 8, 4>}]} {
    %c0 = arith.constant 0 : index
    %c0_0 = arith.constant 0 : index
    %c0_1 = arith.constant 0 : index
    %0 = vector.load %arg2[%c0, %c0_0, %c0_1] : memref<2x16x8xf32, #tpu.memory_space<vmem>>, vector<2x16x8xf32>
    %c0_2 = arith.constant 0 : index
    %c0_3 = arith.constant 0 : index
    %c0_4 = arith.constant 0 : index
    %1 = vector.load %arg3[%c0_2, %c0_3, %c0_4] : memref<2x16x8xf32, #tpu.memory_space<vmem>>, vector<2x16x8xf32>
    %c0_5 = arith.constant 0 : index
    %c0_6 = arith.constant 0 : index
    %c0_7 = arith.constant 0 : index
    %2 = vector.load %arg4[%c0_5, %c0_6, %c0_7] : memref<9x16x8xf32, #tpu.memory_space<vmem>>, vector<1x16x8xf32>
    %3 = vector.shape_cast %2 : vector<1x16x8xf32> to vector<16x8xf32>
    %4 = vector.shape_cast %3 : vector<16x8xf32> to vector<1x16x8xf32>
    %5 = vector.broadcast %4 : vector<1x16x8xf32> to vector<2x16x8xf32>
    %6 = arith.mulf %5, %0 : vector<2x16x8xf32>
    %7 = vector.broadcast %4 : vector<1x16x8xf32> to vector<2x16x8xf32>
    %8 = arith.mulf %7, %1 : vector<2x16x8xf32>
    %c9_i32 = arith.constant 9 : i32
    %9 = arith.muli %arg1, %c9_i32 : i32
    %c0_i32 = arith.constant 0 : i32
    %10 = arith.addi %9, %c0_i32 : i32
    %c5_i32 = arith.constant 5 : i32
    %11 = arith.cmpi sge, %10, %c5_i32 : i32
    %12 = arith.extui %11 : i1 to i32
    %13 = arith.sitofp %12 : i32 to f32
    %cst = arith.constant 1.000000e+00 : f32
    %14 = arith.subf %cst, %13 : f32
    %15 = vector.broadcast %14 : f32 to vector<2x16x8xf32>
    %16 = arith.mulf %15, %6 : vector<2x16x8xf32>
    %17 = vector.broadcast %13 : f32 to vector<2x16x8xf32>
    %18 = arith.mulf %17, %8 : vector<2x16x8xf32>
    %19 = arith.addf %16, %18 : vector<2x16x8xf32>
    %20 = vector.shape_cast %19 : vector<2x16x8xf32> to vector<2x1x16x8xf32>
    %c0_8 = arith.constant 0 : index
    %c0_9 = arith.constant 0 : index
    %c0_10 = arith.constant 0 : index
    %c0_11 = arith.constant 0 : index
    %21 = vector.load %arg6[%c0_8, %c0_9, %c0_10, %c0_11] : memref<2x9x16x8xf32, #tpu.memory_space<vmem>>, vector<2x1x16x8xf32>
    tpu.vector_store %arg6[%c0_8, %c0_9, %c0_10, %c0_11], %20 {strides = array<i32>} : memref<2x9x16x8xf32, #tpu.memory_space<vmem>>, vector<2x1x16x8xf32>,
    %22 = vector.broadcast %14 : f32 to vector<2x16x8xf32>
    %23 = arith.mulf %22, %8 : vector<2x16x8xf32>
    %24 = vector.broadcast %13 : f32 to vector<2x16x8xf32>
    %25 = arith.mulf %24, %6 : vector<2x16x8xf32>
    %26 = arith.subf %23, %25 : vector<2x16x8xf32>
    %27 = vector.shape_cast %26 : vector<2x16x8xf32> to vector<2x1x16x8xf32>
    %c0_12 = arith.constant 0 : index
    %c0_13 = arith.constant 0 : index
    %c0_14 = arith.constant 0 : index
    %c0_15 = arith.constant 0 : index
    %28 = vector.load %arg7[%c0_12, %c0_13, %c0_14, %c0_15] : memref<2x9x16x8xf32, #tpu.memory_space<vmem>>, vector<2x1x16x8xf32>
    tpu.vector_store %arg7[%c0_12, %c0_13, %c0_14, %c0_15], %27 {strides = array<i32>} : memref<2x9x16x8xf32, #tpu.memory_space<vmem>>, vector<2x1x16x8xf32>,
    %c1 = arith.constant 1 : index
    %c0_16 = arith.constant 0 : index
    %c0_17 = arith.constant 0 : index
    %29 = vector.load %arg4[%c1, %c0_16, %c0_17] : memref<9x16x8xf32, #tpu.memory_space<vmem>>, vector<1x16x8xf32>
    %30 = vector.shape_cast %29 : vector<1x16x8xf32> to vector<16x8xf32>
    %31 = vector.shape_cast %30 : vector<16x8xf32> to vector<1x16x8xf32>
    %32 = vector.broadcast %31 : vector<1x16x8xf32> to vector<2x16x8xf32>
    %33 = arith.mulf %32, %0 : vector<2x16x8xf32>
    %34 = vector.broadcast %31 : vector<1x16x8xf32> to vector<2x16x8xf32>
    %35 = arith.mulf %34, %1 : vector<2x16x8xf32>
    %c9_i32_18 = arith.constant 9 : i32
    %36 = arith.muli %arg1, %c9_i32_18 : i32
    %c1_i32 = arith.constant 1 : i32
    %37 = arith.addi %36, %c1_i32 : i32
    %c5_i32_19 = arith.constant 5 : i32
    %38 = arith.cmpi sge, %37, %c5_i32_19 : i32
    %39 = arith.extui %38 : i1 to i32
    %40 = arith.sitofp %39 : i32 to f32
    %cst_20 = arith.constant 1.000000e+00 : f32
    %41 = arith.subf %cst_20, %40 : f32
    %42 = vector.broadcast %41 : f32 to vector<2x16x8xf32>
    %43 = arith.mulf %42, %33 : vector<2x16x8xf32>
    %44 = vector.broadcast %40 : f32 to vector<2x16x8xf32>
    %45 = arith.mulf %44, %35 : vector<2x16x8xf32>
    %46 = arith.addf %43, %45 : vector<2x16x8xf32>
    %47 = vector.shape_cast %46 : vector<2x16x8xf32> to vector<2x1x16x8xf32>
    %c0_21 = arith.constant 0 : index
    %c1_22 = arith.constant 1 : index
    %c0_23 = arith.constant 0 : index
    %c0_24 = arith.constant 0 : index
    %48 = vector.load %arg6[%c0_21, %c1_22, %c0_23, %c0_24] : memref<2x9x16x8xf32, #tpu.memory_space<vmem>>, vector<2x1x16x8xf32>
    tpu.vector_store %arg6[%c0_21, %c1_22, %c0_23, %c0_24], %47 {strides = array<i32>} : memref<2x9x16x8xf32, #tpu.memory_space<vmem>>, vector<2x1x16x8xf32>,
    %49 = vector.broadcast %41 : f32 to vector<2x16x8xf32>
    %50 = arith.mulf %49, %35 : vector<2x16x8xf32>
    %51 = vector.broadcast %40 : f32 to vector<2x16x8xf32>
    %52 = arith.mulf %51, %33 : vector<2x16x8xf32>
    %53 = arith.subf %50, %52 : vector<2x16x8xf32>
    %54 = vector.shape_cast %53 : vector<2x16x8xf32> to vector<2x1x16x8xf32>
    %c0_25 = arith.constant 0 : index
    %c1_26 = arith.constant 1 : index
    %c0_27 = arith.constant 0 : index
    %c0_28 = arith.constant 0 : index
    %55 = vector.load %arg7[%c0_25, %c1_26, %c0_27, %c0_28] : memref<2x9x16x8xf32, #tpu.memory_space<vmem>>, vector<2x1x16x8xf32>
    tpu.vector_store %arg7[%c0_25, %c1_26, %c0_27, %c0_28], %54 {strides = array<i32>} : memref<2x9x16x8xf32, #tpu.memory_space<vmem>>, vector<2x1x16x8xf32>,
    %c2 = arith.constant 2 : index
    %c0_29 = arith.constant 0 : index
    %c0_30 = arith.constant 0 : index
    %56 = vector.load %arg4[%c2, %c0_29, %c0_30] : memref<9x16x8xf32, #tpu.memory_space<vmem>>, vector<1x16x8xf32>
    %57 = vector.shape_cast %56 : vector<1x16x8xf32> to vector<16x8xf32>
    %58 = vector.shape_cast %57 : vector<16x8xf32> to vector<1x16x8xf32>
    %59 = vector.broadcast %58 : vector<1x16x8xf32> to vector<2x16x8xf32>
    %60 = arith.mulf %59, %0 : vector<2x16x8xf32>
    %61 = vector.broadcast %58 : vector<1x16x8xf32> to vector<2x16x8xf32>
    %62 = arith.mulf %61, %1 : vector<2x16x8xf32>
    %c9_i32_31 = arith.constant 9 : i32
    %63 = arith.muli %arg1, %c9_i32_31 : i32
    %c2_i32 = arith.constant 2 : i32
    %64 = arith.addi %63, %c2_i32 : i32
    %c5_i32_32 = arith.constant 5 : i32
    %65 = arith.cmpi sge, %64, %c5_i32_32 : i32
    %66 = arith.extui %65 : i1 to i32
    %67 = arith.sitofp %66 : i32 to f32
    %cst_33 = arith.constant 1.000000e+00 : f32
    %68 = arith.subf %cst_33, %67 : f32
    %69 = vector.broadcast %68 : f32 to vector<2x16x8xf32>
    %70 = arith.mulf %69, %60 : vector<2x16x8xf32>
    %71 = vector.broadcast %67 : f32 to vector<2x16x8xf32>
    %72 = arith.mulf %71, %62 : vector<2x16x8xf32>
    %73 = arith.addf %70, %72 : vector<2x16x8xf32>
    %74 = vector.shape_cast %73 : vector<2x16x8xf32> to vector<2x1x16x8xf32>
    %c0_34 = arith.constant 0 : index
    %c2_35 = arith.constant 2 : index
    %c0_36 = arith.constant 0 : index
    %c0_37 = arith.constant 0 : index
    %75 = vector.load %arg6[%c0_34, %c2_35, %c0_36, %c0_37] : memref<2x9x16x8xf32, #tpu.memory_space<vmem>>, vector<2x1x16x8xf32>
    tpu.vector_store %arg6[%c0_34, %c2_35, %c0_36, %c0_37], %74 {strides = array<i32>} : memref<2x9x16x8xf32, #tpu.memory_space<vmem>>, vector<2x1x16x8xf32>,
    %76 = vector.broadcast %68 : f32 to vector<2x16x8xf32>
    %77 = arith.mulf %76, %62 : vector<2x16x8xf32>
    %78 = vector.broadcast %67 : f32 to vector<2x16x8xf32>
    %79 = arith.mulf %78, %60 : vector<2x16x8xf32>
    %80 = arith.subf %77, %79 : vector<2x16x8xf32>
    %81 = vector.shape_cast %80 : vector<2x16x8xf32> to vector<2x1x16x8xf32>
    %c0_38 = arith.constant 0 : index
    %c2_39 = arith.constant 2 : index
    %c0_40 = arith.constant 0 : index
    %c0_41 = arith.constant 0 : index
    %82 = vector.load %arg7[%c0_38, %c2_39, %c0_40, %c0_41] : memref<2x9x16x8xf32, #tpu.memory_space<vmem>>, vector<2x1x16x8xf32>
    tpu.vector_store %arg7[%c0_38, %c2_39, %c0_40, %c0_41], %81 {strides = array<i32>} : memref<2x9x16x8xf32, #tpu.memory_space<vmem>>, vector<2x1x16x8xf32>,
    %c3 = arith.constant 3 : index
    %c0_42 = arith.constant 0 : index
    %c0_43 = arith.constant 0 : index
    %83 = vector.load %arg4[%c3, %c0_42, %c0_43] : memref<9x16x8xf32, #tpu.memory_space<vmem>>, vector<1x16x8xf32>
    %84 = vector.shape_cast %83 : vector<1x16x8xf32> to vector<16x8xf32>
    %85 = vector.shape_cast %84 : vector<16x8xf32> to vector<1x16x8xf32>
    %86 = vector.broadcast %85 : vector<1x16x8xf32> to vector<2x16x8xf32>
    %87 = arith.mulf %86, %0 : vector<2x16x8xf32>
    %88 = vector.broadcast %85 : vector<1x16x8xf32> to vector<2x16x8xf32>
    %89 = arith.mulf %88, %1 : vector<2x16x8xf32>
    %c9_i32_44 = arith.constant 9 : i32
    %90 = arith.muli %arg1, %c9_i32_44 : i32
    %c3_i32 = arith.constant 3 : i32
    %91 = arith.addi %90, %c3_i32 : i32
    %c5_i32_45 = arith.constant 5 : i32
    %92 = arith.cmpi sge, %91, %c5_i32_45 : i32
    %93 = arith.extui %92 : i1 to i32
    %94 = arith.sitofp %93 : i32 to f32
    %cst_46 = arith.constant 1.000000e+00 : f32
    %95 = arith.subf %cst_46, %94 : f32
    %96 = vector.broadcast %95 : f32 to vector<2x16x8xf32>
    %97 = arith.mulf %96, %87 : vector<2x16x8xf32>
    %98 = vector.broadcast %94 : f32 to vector<2x16x8xf32>
    %99 = arith.mulf %98, %89 : vector<2x16x8xf32>
    %100 = arith.addf %97, %99 : vector<2x16x8xf32>
    %101 = vector.shape_cast %100 : vector<2x16x8xf32> to vector<2x1x16x8xf32>
    %c0_47 = arith.constant 0 : index
    %c3_48 = arith.constant 3 : index
    %c0_49 = arith.constant 0 : index
    %c0_50 = arith.constant 0 : index
    %102 = vector.load %arg6[%c0_47, %c3_48, %c0_49, %c0_50] : memref<2x9x16x8xf32, #tpu.memory_space<vmem>>, vector<2x1x16x8xf32>
    tpu.vector_store %arg6[%c0_47, %c3_48, %c0_49, %c0_50], %101 {strides = array<i32>} : memref<2x9x16x8xf32, #tpu.memory_space<vmem>>, vector<2x1x16x8xf32>,
    %103 = vector.broadcast %95 : f32 to vector<2x16x8xf32>
    %104 = arith.mulf %103, %89 : vector<2x16x8xf32>
    %105 = vector.broadcast %94 : f32 to vector<2x16x8xf32>
    %106 = arith.mulf %105, %87 : vector<2x16x8xf32>
    %107 = arith.subf %104, %106 : vector<2x16x8xf32>
    %108 = vector.shape_cast %107 : vector<2x16x8xf32> to vector<2x1x16x8xf32>
    %c0_51 = arith.constant 0 : index
    %c3_52 = arith.constant 3 : index
    %c0_53 = arith.constant 0 : index
    %c0_54 = arith.constant 0 : index
    %109 = vector.load %arg7[%c0_51, %c3_52, %c0_53, %c0_54] : memref<2x9x16x8xf32, #tpu.memory_space<vmem>>, vector<2x1x16x8xf32>
    tpu.vector_store %arg7[%c0_51, %c3_52, %c0_53, %c0_54], %108 {strides = array<i32>} : memref<2x9x16x8xf32, #tpu.memory_space<vmem>>, vector<2x1x16x8xf32>,
    %c4 = arith.constant 4 : index
    %c0_55 = arith.constant 0 : index
    %c0_56 = arith.constant 0 : index
    %110 = vector.load %arg4[%c4, %c0_55, %c0_56] : memref<9x16x8xf32, #tpu.memory_space<vmem>>, vector<1x16x8xf32>
    %111 = vector.shape_cast %110 : vector<1x16x8xf32> to vector<16x8xf32>
    %112 = vector.shape_cast %111 : vector<16x8xf32> to vector<1x16x8xf32>
    %113 = vector.broadcast %112 : vector<1x16x8xf32> to vector<2x16x8xf32>
    %114 = arith.mulf %113, %0 : vector<2x16x8xf32>
    %115 = vector.broadcast %112 : vector<1x16x8xf32> to vector<2x16x8xf32>
    %116 = arith.mulf %115, %1 : vector<2x16x8xf32>
    %c9_i32_57 = arith.constant 9 : i32
    %117 = arith.muli %arg1, %c9_i32_57 : i32
    %c4_i32 = arith.constant 4 : i32
    %118 = arith.addi %117, %c4_i32 : i32
    %c5_i32_58 = arith.constant 5 : i32
    %119 = arith.cmpi sge, %118, %c5_i32_58 : i32
    %120 = arith.extui %119 : i1 to i32
    %121 = arith.sitofp %120 : i32 to f32
    %cst_59 = arith.constant 1.000000e+00 : f32
    %122 = arith.subf %cst_59, %121 : f32
    %123 = vector.broadcast %122 : f32 to vector<2x16x8xf32>
    %124 = arith.mulf %123, %114 : vector<2x16x8xf32>
    %125 = vector.broadcast %121 : f32 to vector<2x16x8xf32>
    %126 = arith.mulf %125, %116 : vector<2x16x8xf32>
    %127 = arith.addf %124, %126 : vector<2x16x8xf32>
    %128 = vector.shape_cast %127 : vector<2x16x8xf32> to vector<2x1x16x8xf32>
    %c0_60 = arith.constant 0 : index
    %c4_61 = arith.constant 4 : index
    %c0_62 = arith.constant 0 : index
    %c0_63 = arith.constant 0 : index
    %129 = vector.load %arg6[%c0_60, %c4_61, %c0_62, %c0_63] : memref<2x9x16x8xf32, #tpu.memory_space<vmem>>, vector<2x1x16x8xf32>
    tpu.vector_store %arg6[%c0_60, %c4_61, %c0_62, %c0_63], %128 {strides = array<i32>} : memref<2x9x16x8xf32, #tpu.memory_space<vmem>>, vector<2x1x16x8xf32>,
    %130 = vector.broadcast %122 : f32 to vector<2x16x8xf32>
    %131 = arith.mulf %130, %116 : vector<2x16x8xf32>
    %132 = vector.broadcast %121 : f32 to vector<2x16x8xf32>
    %133 = arith.mulf %132, %114 : vector<2x16x8xf32>
    %134 = arith.subf %131, %133 : vector<2x16x8xf32>
    %135 = vector.shape_cast %134 : vector<2x16x8xf32> to vector<2x1x16x8xf32>
    %c0_64 = arith.constant 0 : index
    %c4_65 = arith.constant 4 : index
    %c0_66 = arith.constant 0 : index
    %c0_67 = arith.constant 0 : index
    %136 = vector.load %arg7[%c0_64, %c4_65, %c0_66, %c0_67] : memref<2x9x16x8xf32, #tpu.memory_space<vmem>>, vector<2x1x16x8xf32>
    tpu.vector_store %arg7[%c0_64, %c4_65, %c0_66, %c0_67], %135 {strides = array<i32>} : memref<2x9x16x8xf32, #tpu.memory_space<vmem>>, vector<2x1x16x8xf32>,
    %c5 = arith.constant 5 : index
    %c0_68 = arith.constant 0 : index
    %c0_69 = arith.constant 0 : index
    %137 = vector.load %arg4[%c5, %c0_68, %c0_69] : memref<9x16x8xf32, #tpu.memory_space<vmem>>, vector<1x16x8xf32>
    %138 = vector.shape_cast %137 : vector<1x16x8xf32> to vector<16x8xf32>
    %139 = vector.shape_cast %138 : vector<16x8xf32> to vector<1x16x8xf32>
    %140 = vector.broadcast %139 : vector<1x16x8xf32> to vector<2x16x8xf32>
    %141 = arith.mulf %140, %0 : vector<2x16x8xf32>
    %142 = vector.broadcast %139 : vector<1x16x8xf32> to vector<2x16x8xf32>
    %143 = arith.mulf %142, %1 : vector<2x16x8xf32>
    %c9_i32_70 = arith.constant 9 : i32
    %144 = arith.muli %arg1, %c9_i32_70 : i32
    %c5_i32_71 = arith.constant 5 : i32
    %145 = arith.addi %144, %c5_i32_71 : i32
    %c5_i32_72 = arith.constant 5 : i32
    %146 = arith.cmpi sge, %145, %c5_i32_72 : i32
    %147 = arith.extui %146 : i1 to i32
    %148 = arith.sitofp %147 : i32 to f32
    %cst_73 = arith.constant 1.000000e+00 : f32
    %149 = arith.subf %cst_73, %148 : f32
    %150 = vector.broadcast %149 : f32 to vector<2x16x8xf32>
    %151 = arith.mulf %150, %141 : vector<2x16x8xf32>
    %152 = vector.broadcast %148 : f32 to vector<2x16x8xf32>
    %153 = arith.mulf %152, %143 : vector<2x16x8xf32>
    %154 = arith.addf %151, %153 : vector<2x16x8xf32>
    %155 = vector.shape_cast %154 : vector<2x16x8xf32> to vector<2x1x16x8xf32>
    %c0_74 = arith.constant 0 : index
    %c5_75 = arith.constant 5 : index
    %c0_76 = arith.constant 0 : index
    %c0_77 = arith.constant 0 : index
    %156 = vector.load %arg6[%c0_74, %c5_75, %c0_76, %c0_77] : memref<2x9x16x8xf32, #tpu.memory_space<vmem>>, vector<2x1x16x8xf32>
    tpu.vector_store %arg6[%c0_74, %c5_75, %c0_76, %c0_77], %155 {strides = array<i32>} : memref<2x9x16x8xf32, #tpu.memory_space<vmem>>, vector<2x1x16x8xf32>,
    %157 = vector.broadcast %149 : f32 to vector<2x16x8xf32>
    %158 = arith.mulf %157, %143 : vector<2x16x8xf32>
    %159 = vector.broadcast %148 : f32 to vector<2x16x8xf32>
    %160 = arith.mulf %159, %141 : vector<2x16x8xf32>
    %161 = arith.subf %158, %160 : vector<2x16x8xf32>
    %162 = vector.shape_cast %161 : vector<2x16x8xf32> to vector<2x1x16x8xf32>
    %c0_78 = arith.constant 0 : index
    %c5_79 = arith.constant 5 : index
    %c0_80 = arith.constant 0 : index
    %c0_81 = arith.constant 0 : index
    %163 = vector.load %arg7[%c0_78, %c5_79, %c0_80, %c0_81] : memref<2x9x16x8xf32, #tpu.memory_space<vmem>>, vector<2x1x16x8xf32>
    tpu.vector_store %arg7[%c0_78, %c5_79, %c0_80, %c0_81], %162 {strides = array<i32>} : memref<2x9x16x8xf32, #tpu.memory_space<vmem>>, vector<2x1x16x8xf32>,
    %c6 = arith.constant 6 : index
    %c0_82 = arith.constant 0 : index
    %c0_83 = arith.constant 0 : index
    %164 = vector.load %arg4[%c6, %c0_82, %c0_83] : memref<9x16x8xf32, #tpu.memory_space<vmem>>, vector<1x16x8xf32>
    %165 = vector.shape_cast %164 : vector<1x16x8xf32> to vector<16x8xf32>
    %166 = vector.shape_cast %165 : vector<16x8xf32> to vector<1x16x8xf32>
    %167 = vector.broadcast %166 : vector<1x16x8xf32> to vector<2x16x8xf32>
    %168 = arith.mulf %167, %0 : vector<2x16x8xf32>
    %169 = vector.broadcast %166 : vector<1x16x8xf32> to vector<2x16x8xf32>
    %170 = arith.mulf %169, %1 : vector<2x16x8xf32>
    %c9_i32_84 = arith.constant 9 : i32
    %171 = arith.muli %arg1, %c9_i32_84 : i32
    %c6_i32 = arith.constant 6 : i32
    %172 = arith.addi %171, %c6_i32 : i32
    %c5_i32_85 = arith.constant 5 : i32
    %173 = arith.cmpi sge, %172, %c5_i32_85 : i32
    %174 = arith.extui %173 : i1 to i32
    %175 = arith.sitofp %174 : i32 to f32
    %cst_86 = arith.constant 1.000000e+00 : f32
    %176 = arith.subf %cst_86, %175 : f32
    %177 = vector.broadcast %176 : f32 to vector<2x16x8xf32>
    %178 = arith.mulf %177, %168 : vector<2x16x8xf32>
    %179 = vector.broadcast %175 : f32 to vector<2x16x8xf32>
    %180 = arith.mulf %179, %170 : vector<2x16x8xf32>
    %181 = arith.addf %178, %180 : vector<2x16x8xf32>
    %182 = vector.shape_cast %181 : vector<2x16x8xf32> to vector<2x1x16x8xf32>
    %c0_87 = arith.constant 0 : index
    %c6_88 = arith.constant 6 : index
    %c0_89 = arith.constant 0 : index
    %c0_90 = arith.constant 0 : index
    %183 = vector.load %arg6[%c0_87, %c6_88, %c0_89, %c0_90] : memref<2x9x16x8xf32, #tpu.memory_space<vmem>>, vector<2x1x16x8xf32>
    tpu.vector_store %arg6[%c0_87, %c6_88, %c0_89, %c0_90], %182 {strides = array<i32>} : memref<2x9x16x8xf32, #tpu.memory_space<vmem>>, vector<2x1x16x8xf32>,
    %184 = vector.broadcast %176 : f32 to vector<2x16x8xf32>
    %185 = arith.mulf %184, %170 : vector<2x16x8xf32>
    %186 = vector.broadcast %175 : f32 to vector<2x16x8xf32>
    %187 = arith.mulf %186, %168 : vector<2x16x8xf32>
    %188 = arith.subf %185, %187 : vector<2x16x8xf32>
    %189 = vector.shape_cast %188 : vector<2x16x8xf32> to vector<2x1x16x8xf32>
    %c0_91 = arith.constant 0 : index
    %c6_92 = arith.constant 6 : index
    %c0_93 = arith.constant 0 : index
    %c0_94 = arith.constant 0 : index
    %190 = vector.load %arg7[%c0_91, %c6_92, %c0_93, %c0_94] : memref<2x9x16x8xf32, #tpu.memory_space<vmem>>, vector<2x1x16x8xf32>
    tpu.vector_store %arg7[%c0_91, %c6_92, %c0_93, %c0_94], %189 {strides = array<i32>} : memref<2x9x16x8xf32, #tpu.memory_space<vmem>>, vector<2x1x16x8xf32>,
    %c7 = arith.constant 7 : index
    %c0_95 = arith.constant 0 : index
    %c0_96 = arith.constant 0 : index
    %191 = vector.load %arg4[%c7, %c0_95, %c0_96] : memref<9x16x8xf32, #tpu.memory_space<vmem>>, vector<1x16x8xf32>
    %192 = vector.shape_cast %191 : vector<1x16x8xf32> to vector<16x8xf32>
    %193 = vector.shape_cast %192 : vector<16x8xf32> to vector<1x16x8xf32>
    %194 = vector.broadcast %193 : vector<1x16x8xf32> to vector<2x16x8xf32>
    %195 = arith.mulf %194, %0 : vector<2x16x8xf32>
    %196 = vector.broadcast %193 : vector<1x16x8xf32> to vector<2x16x8xf32>
    %197 = arith.mulf %196, %1 : vector<2x16x8xf32>
    %c9_i32_97 = arith.constant 9 : i32
    %198 = arith.muli %arg1, %c9_i32_97 : i32
    %c7_i32 = arith.constant 7 : i32
    %199 = arith.addi %198, %c7_i32 : i32
    %c5_i32_98 = arith.constant 5 : i32
    %200 = arith.cmpi sge, %199, %c5_i32_98 : i32
    %201 = arith.extui %200 : i1 to i32
    %202 = arith.sitofp %201 : i32 to f32
    %cst_99 = arith.constant 1.000000e+00 : f32
    %203 = arith.subf %cst_99, %202 : f32
    %204 = vector.broadcast %203 : f32 to vector<2x16x8xf32>
    %205 = arith.mulf %204, %195 : vector<2x16x8xf32>
    %206 = vector.broadcast %202 : f32 to vector<2x16x8xf32>
    %207 = arith.mulf %206, %197 : vector<2x16x8xf32>
    %208 = arith.addf %205, %207 : vector<2x16x8xf32>
    %209 = vector.shape_cast %208 : vector<2x16x8xf32> to vector<2x1x16x8xf32>
    %c0_100 = arith.constant 0 : index
    %c7_101 = arith.constant 7 : index
    %c0_102 = arith.constant 0 : index
    %c0_103 = arith.constant 0 : index
    %210 = vector.load %arg6[%c0_100, %c7_101, %c0_102, %c0_103] : memref<2x9x16x8xf32, #tpu.memory_space<vmem>>, vector<2x1x16x8xf32>
    tpu.vector_store %arg6[%c0_100, %c7_101, %c0_102, %c0_103], %209 {strides = array<i32>} : memref<2x9x16x8xf32, #tpu.memory_space<vmem>>, vector<2x1x16x8xf32>,
    %211 = vector.broadcast %203 : f32 to vector<2x16x8xf32>
    %212 = arith.mulf %211, %197 : vector<2x16x8xf32>
    %213 = vector.broadcast %202 : f32 to vector<2x16x8xf32>
    %214 = arith.mulf %213, %195 : vector<2x16x8xf32>
    %215 = arith.subf %212, %214 : vector<2x16x8xf32>
    %216 = vector.shape_cast %215 : vector<2x16x8xf32> to vector<2x1x16x8xf32>
    %c0_104 = arith.constant 0 : index
    %c7_105 = arith.constant 7 : index
    %c0_106 = arith.constant 0 : index
    %c0_107 = arith.constant 0 : index
    %217 = vector.load %arg7[%c0_104, %c7_105, %c0_106, %c0_107] : memref<2x9x16x8xf32, #tpu.memory_space<vmem>>, vector<2x1x16x8xf32>
    tpu.vector_store %arg7[%c0_104, %c7_105, %c0_106, %c0_107], %216 {strides = array<i32>} : memref<2x9x16x8xf32, #tpu.memory_space<vmem>>, vector<2x1x16x8xf32>,
    %c8 = arith.constant 8 : index
    %c0_108 = arith.constant 0 : index
    %c0_109 = arith.constant 0 : index
    %218 = vector.load %arg4[%c8, %c0_108, %c0_109] : memref<9x16x8xf32, #tpu.memory_space<vmem>>, vector<1x16x8xf32>
    %219 = vector.shape_cast %218 : vector<1x16x8xf32> to vector<16x8xf32>
    %220 = vector.shape_cast %219 : vector<16x8xf32> to vector<1x16x8xf32>
    %221 = vector.broadcast %220 : vector<1x16x8xf32> to vector<2x16x8xf32>
    %222 = arith.mulf %221, %0 : vector<2x16x8xf32>
    %223 = vector.broadcast %220 : vector<1x16x8xf32> to vector<2x16x8xf32>
    %224 = arith.mulf %223, %1 : vector<2x16x8xf32>
    %c9_i32_110 = arith.constant 9 : i32
    %225 = arith.muli %arg1, %c9_i32_110 : i32
    %c8_i32 = arith.constant 8 : i32
    %226 = arith.addi %225, %c8_i32 : i32
    %c5_i32_111 = arith.constant 5 : i32
    %227 = arith.cmpi sge, %226, %c5_i32_111 : i32
    %228 = arith.extui %227 : i1 to i32
    %229 = arith.sitofp %228 : i32 to f32
    %cst_112 = arith.constant 1.000000e+00 : f32
    %230 = arith.subf %cst_112, %229 : f32
    %231 = vector.broadcast %230 : f32 to vector<2x16x8xf32>
    %232 = arith.mulf %231, %222 : vector<2x16x8xf32>
    %233 = vector.broadcast %229 : f32 to vector<2x16x8xf32>
    %234 = arith.mulf %233, %224 : vector<2x16x8xf32>
    %235 = arith.addf %232, %234 : vector<2x16x8xf32>
    %236 = vector.shape_cast %235 : vector<2x16x8xf32> to vector<2x1x16x8xf32>
    %c0_113 = arith.constant 0 : index
    %c8_114 = arith.constant 8 : index
    %c0_115 = arith.constant 0 : index
    %c0_116 = arith.constant 0 : index
    %237 = vector.load %arg6[%c0_113, %c8_114, %c0_115, %c0_116] : memref<2x9x16x8xf32, #tpu.memory_space<vmem>>, vector<2x1x16x8xf32>
    tpu.vector_store %arg6[%c0_113, %c8_114, %c0_115, %c0_116], %236 {strides = array<i32>} : memref<2x9x16x8xf32, #tpu.memory_space<vmem>>, vector<2x1x16x8xf32>,
    %238 = vector.broadcast %230 : f32 to vector<2x16x8xf32>
    %239 = arith.mulf %238, %224 : vector<2x16x8xf32>
    %240 = vector.broadcast %229 : f32 to vector<2x16x8xf32>
    %241 = arith.mulf %240, %222 : vector<2x16x8xf32>
    %242 = arith.subf %239, %241 : vector<2x16x8xf32>
    %243 = vector.shape_cast %242 : vector<2x16x8xf32> to vector<2x1x16x8xf32>
    %c0_117 = arith.constant 0 : index
    %c8_118 = arith.constant 8 : index
    %c0_119 = arith.constant 0 : index
    %c0_120 = arith.constant 0 : index
    %244 = vector.load %arg7[%c0_117, %c8_118, %c0_119, %c0_120] : memref<2x9x16x8xf32, #tpu.memory_space<vmem>>, vector<2x1x16x8xf32>
    tpu.vector_store %arg7[%c0_117, %c8_118, %c0_119, %c0_120], %243 {strides = array<i32>} : memref<2x9x16x8xf32, #tpu.memory_space<vmem>>, vector<2x1x16x8xf32>,
    %c0_i32_121 = arith.constant 0 : i32
    %245 = arith.cmpi eq, %arg1, %c0_i32_121 : i32
    %246 = arith.extui %245 : i1 to i32
    %c0_i32_122 = arith.constant 0 : i32
    %247 = arith.cmpi ne, %246, %c0_i32_122 : i32
    scf.if %247 {
      %c0_123 = arith.constant 0 : index
      %c0_124 = arith.constant 0 : index
      %248 = vector.load %arg5[%c0_123, %c0_124] : memref<8x4xf32, #tpu.memory_space<vmem>>, vector<8x4xf32>
      %249 = vector.extract_strided_slice %248 {offsets = [0, 0], sizes = [4, 4], strides = [1, 1]} : vector<8x4xf32> to vector<4x4xf32>
      %250 = vector.shape_cast %249 : vector<4x4xf32> to vector<1x4x4xf32>
      %251 = vector.extract_strided_slice %0 {offsets = [0, 0, 0], sizes = [2, 4, 4], strides = [1, 1, 1]} : vector<2x16x8xf32> to vector<2x4x4xf32>
      %252 = vector.broadcast %250 : vector<1x4x4xf32> to vector<2x4x4xf32>
      %253 = arith.mulf %252, %251 : vector<2x4x4xf32>
      %c0_125 = arith.constant 0 : index
      %c0_126 = arith.constant 0 : index
      %c0_127 = arith.constant 0 : index
      %254 = vector.load %arg8[%c0_125, %c0_126, %c0_127] : memref<2x8x4xf32, #tpu.memory_space<vmem>>, vector<2x4x4xf32>
      tpu.vector_store %arg8[%c0_125, %c0_126, %c0_127], %253 {strides = array<i32>} : memref<2x8x4xf32, #tpu.memory_space<vmem>>, vector<2x4x4xf32>,
      %255 = vector.extract_strided_slice %248 {offsets = [4, 0], sizes = [4, 4], strides = [1, 1]} : vector<8x4xf32> to vector<4x4xf32>
      %256 = vector.shape_cast %255 : vector<4x4xf32> to vector<1x4x4xf32>
      %257 = vector.extract_strided_slice %0 {offsets = [0, 12, 0], sizes = [2, 4, 4], strides = [1, 1, 1]} : vector<2x16x8xf32> to vector<2x4x4xf32>
      %258 = vector.broadcast %256 : vector<1x4x4xf32> to vector<2x4x4xf32>
      %259 = arith.mulf %258, %257 : vector<2x4x4xf32>
      %c0_128 = arith.constant 0 : index
      %c4_129 = arith.constant 4 : index
      %c0_130 = arith.constant 0 : index
      %260 = vector.load %arg8[%c0_128, %c4_129, %c0_130] : memref<2x8x4xf32, #tpu.memory_space<vmem>>, vector<2x4x4xf32>
      tpu.vector_store %arg8[%c0_128, %c4_129, %c0_130], %259 {strides = array<i32>} : memref<2x8x4xf32, #tpu.memory_space<vmem>>, vector<2x4x4xf32>,
      %261 = vector.extract_strided_slice %248 {offsets = [0, 0], sizes = [4, 4], strides = [1, 1]} : vector<8x4xf32> to vector<4x4xf32>
      %262 = vector.shape_cast %261 : vector<4x4xf32> to vector<1x4x4xf32>
      %263 = vector.extract_strided_slice %1 {offsets = [0, 0, 0], sizes = [2, 4, 4], strides = [1, 1, 1]} : vector<2x16x8xf32> to vector<2x4x4xf32>
      %264 = vector.broadcast %262 : vector<1x4x4xf32> to vector<2x4x4xf32>
      %265 = arith.mulf %264, %263 : vector<2x4x4xf32>
      %c0_131 = arith.constant 0 : index
      %c0_132 = arith.constant 0 : index
      %c0_133 = arith.constant 0 : index
      %266 = vector.load %arg9[%c0_131, %c0_132, %c0_133] : memref<2x8x4xf32, #tpu.memory_space<vmem>>, vector<2x4x4xf32>
      tpu.vector_store %arg9[%c0_131, %c0_132, %c0_133], %265 {strides = array<i32>} : memref<2x8x4xf32, #tpu.memory_space<vmem>>, vector<2x4x4xf32>,
      %267 = vector.extract_strided_slice %248 {offsets = [4, 0], sizes = [4, 4], strides = [1, 1]} : vector<8x4xf32> to vector<4x4xf32>
      %268 = vector.shape_cast %267 : vector<4x4xf32> to vector<1x4x4xf32>
      %269 = vector.extract_strided_slice %1 {offsets = [0, 12, 0], sizes = [2, 4, 4], strides = [1, 1, 1]} : vector<2x16x8xf32> to vector<2x4x4xf32>
      %270 = vector.broadcast %268 : vector<1x4x4xf32> to vector<2x4x4xf32>
      %271 = arith.mulf %270, %269 : vector<2x4x4xf32>
      %c0_134 = arith.constant 0 : index
      %c4_135 = arith.constant 4 : index
      %c0_136 = arith.constant 0 : index
      %272 = vector.load %arg9[%c0_134, %c4_135, %c0_136] : memref<2x8x4xf32, #tpu.memory_space<vmem>>, vector<2x4x4xf32>
      tpu.vector_store %arg9[%c0_134, %c4_135, %c0_136], %271 {strides = array<i32>} : memref<2x8x4xf32, #tpu.memory_space<vmem>>, vector<2x4x4xf32>,
    } else {
    }
    return
  }
  func.func @transform_0(%arg0: i32, %arg1: i32) -> (i32, i32, i32) {
    %c0_i32 = arith.constant 0 : i32
    %c0_i32_0 = arith.constant 0 : i32
    %c0_i32_1 = arith.constant 0 : i32
    return %arg0, %c0_i32, %c0_i32_0 : i32, i32, i32
  }
  func.func @transform_1(%arg0: i32, %arg1: i32) -> (i32, i32, i32) {
    %c0_i32 = arith.constant 0 : i32
    %c0_i32_0 = arith.constant 0 : i32
    %c0_i32_1 = arith.constant 0 : i32
    return %arg0, %c0_i32, %c0_i32_0 : i32, i32, i32
  }
  func.func @transform_2(%arg0: i32, %arg1: i32) -> (i32, i32, i32) {
    %c0_i32 = arith.constant 0 : i32
    %c0_i32_0 = arith.constant 0 : i32
    %c0_i32_1 = arith.constant 0 : i32
    return %arg1, %c0_i32, %c0_i32_0 : i32, i32, i32
  }
  func.func @transform_3(%arg0: i32, %arg1: i32) -> (i32, i32) {
    %c0_i32 = arith.constant 0 : i32
    %c0_i32_0 = arith.constant 0 : i32
    %c0_i32_1 = arith.constant 0 : i32
    return %c0_i32, %c0_i32_0 : i32, i32
  }
  func.func @transform_4(%arg0: i32, %arg1: i32) -> (i32, i32, i32, i32) {
    %c0_i32 = arith.constant 0 : i32
    %c0_i32_0 = arith.constant 0 : i32
    %c0_i32_1 = arith.constant 0 : i32
    return %arg0, %arg1, %c0_i32, %c0_i32_0 : i32, i32, i32, i32
  }
  func.func @transform_5(%arg0: i32, %arg1: i32) -> (i32, i32, i32, i32) {
    %c0_i32 = arith.constant 0 : i32
    %c0_i32_0 = arith.constant 0 : i32
    %c0_i32_1 = arith.constant 0 : i32
    return %arg0, %arg1, %c0_i32, %c0_i32_0 : i32, i32, i32, i32
  }
  func.func @transform_6(%arg0: i32, %arg1: i32) -> (i32, i32, i32) {
    %c0_i32 = arith.constant 0 : i32
    %c0_i32_0 = arith.constant 0 : i32
    %c0_i32_1 = arith.constant 0 : i32
    return %arg0, %c0_i32, %c0_i32_0 : i32, i32, i32
  }
  func.func @transform_7(%arg0: i32, %arg1: i32) -> (i32, i32, i32) {
    %c0_i32 = arith.constant 0 : i32
    %c0_i32_0 = arith.constant 0 : i32
    %c0_i32_1 = arith.constant 0 : i32
    return %arg0, %c0_i32, %c0_i32_0 : i32, i32, i32
  }
}

module attributes {stable_mosaic.version = 11 : i64} {
  func.func @kernel(%arg0: i32, %arg1: i32, %arg2: memref<2x8x4xf32, #tpu.memory_space<vmem>>, %arg3: memref<2x8x4xf32, #tpu.memory_space<vmem>>, %arg4: memref<8x8x4xf32, #tpu.memory_space<vmem>>, %arg5: memref<4x2xf32, #tpu.memory_space<vmem>>, %arg6: memref<2x8x8x4xf32, #tpu.memory_space<vmem>>, %arg7: memref<2x8x8x4xf32, #tpu.memory_space<vmem>>, %arg8: memref<2x4x2xf32, #tpu.memory_space<vmem>>, %arg9: memref<2x4x2xf32, #tpu.memory_space<vmem>>) attributes {dimension_semantics = [#tpu.dimension_semantics<parallel>, #tpu.dimension_semantics<arbitrary>], iteration_bounds = array<i64: 4, 1>, scalar_prefetch = 0 : i64, scratch_operands = 0 : i64, tpu.core_type = #tpu.core_type<tc>, window_params = [{transform_indices = @transform_0, window_bounds = array<i64: 2, 8, 4>}, {transform_indices = @transform_1, window_bounds = array<i64: 2, 8, 4>}, {transform_indices = @transform_2, window_bounds = array<i64: 8, 8, 4>}, {pipeline_mode = #tpu.pipeline_mode<synchronous>, transform_indices = @transform_3, window_bounds = array<i64: 4, 2>}, {transform_indices = @transform_4, window_bounds = array<i64: 2, 8, 8, 4>}, {transform_indices = @transform_5, window_bounds = array<i64: 2, 8, 8, 4>}, {transform_indices = @transform_6, window_bounds = array<i64: 2, 4, 2>}, {transform_indices = @transform_7, window_bounds = array<i64: 2, 4, 2>}]} {
    %c0 = arith.constant 0 : index
    %c0_0 = arith.constant 0 : index
    %c0_1 = arith.constant 0 : index
    %0 = vector.load %arg2[%c0, %c0_0, %c0_1] : memref<2x8x4xf32, #tpu.memory_space<vmem>>, vector<2x8x4xf32>
    %c0_2 = arith.constant 0 : index
    %c0_3 = arith.constant 0 : index
    %c0_4 = arith.constant 0 : index
    %1 = vector.load %arg3[%c0_2, %c0_3, %c0_4] : memref<2x8x4xf32, #tpu.memory_space<vmem>>, vector<2x8x4xf32>
    %c0_5 = arith.constant 0 : index
    %c0_6 = arith.constant 0 : index
    %c0_7 = arith.constant 0 : index
    %2 = vector.load %arg4[%c0_5, %c0_6, %c0_7] : memref<8x8x4xf32, #tpu.memory_space<vmem>>, vector<1x8x4xf32>
    %3 = vector.shape_cast %2 : vector<1x8x4xf32> to vector<8x4xf32>
    %4 = vector.shape_cast %3 : vector<8x4xf32> to vector<1x8x4xf32>
    %5 = vector.broadcast %4 : vector<1x8x4xf32> to vector<2x8x4xf32>
    %6 = arith.mulf %5, %0 : vector<2x8x4xf32>
    %7 = vector.broadcast %4 : vector<1x8x4xf32> to vector<2x8x4xf32>
    %8 = arith.mulf %7, %1 : vector<2x8x4xf32>
    %c8_i32 = arith.constant 8 : i32
    %9 = arith.muli %arg1, %c8_i32 : i32
    %c0_i32 = arith.constant 0 : i32
    %10 = arith.addi %9, %c0_i32 : i32
    %c4_i32 = arith.constant 4 : i32
    %11 = arith.cmpi sge, %10, %c4_i32 : i32
    %12 = arith.extui %11 : i1 to i32
    %13 = arith.sitofp %12 : i32 to f32
    %cst = arith.constant 1.000000e+00 : f32
    %14 = arith.subf %cst, %13 : f32
    %15 = vector.broadcast %14 : f32 to vector<2x8x4xf32>
    %16 = arith.mulf %15, %6 : vector<2x8x4xf32>
    %17 = vector.broadcast %13 : f32 to vector<2x8x4xf32>
    %18 = arith.mulf %17, %8 : vector<2x8x4xf32>
    %19 = arith.addf %16, %18 : vector<2x8x4xf32>
    %20 = vector.shape_cast %19 : vector<2x8x4xf32> to vector<2x1x8x4xf32>
    %c0_8 = arith.constant 0 : index
    %c0_9 = arith.constant 0 : index
    %c0_10 = arith.constant 0 : index
    %c0_11 = arith.constant 0 : index
    %21 = vector.load %arg6[%c0_8, %c0_9, %c0_10, %c0_11] : memref<2x8x8x4xf32, #tpu.memory_space<vmem>>, vector<2x1x8x4xf32>
    tpu.vector_store %arg6[%c0_8, %c0_9, %c0_10, %c0_11], %20 {strides = array<i32>} : memref<2x8x8x4xf32, #tpu.memory_space<vmem>>, vector<2x1x8x4xf32>,
    %22 = vector.broadcast %14 : f32 to vector<2x8x4xf32>
    %23 = arith.mulf %22, %8 : vector<2x8x4xf32>
    %24 = vector.broadcast %13 : f32 to vector<2x8x4xf32>
    %25 = arith.mulf %24, %6 : vector<2x8x4xf32>
    %26 = arith.subf %23, %25 : vector<2x8x4xf32>
    %27 = vector.shape_cast %26 : vector<2x8x4xf32> to vector<2x1x8x4xf32>
    %c0_12 = arith.constant 0 : index
    %c0_13 = arith.constant 0 : index
    %c0_14 = arith.constant 0 : index
    %c0_15 = arith.constant 0 : index
    %28 = vector.load %arg7[%c0_12, %c0_13, %c0_14, %c0_15] : memref<2x8x8x4xf32, #tpu.memory_space<vmem>>, vector<2x1x8x4xf32>
    tpu.vector_store %arg7[%c0_12, %c0_13, %c0_14, %c0_15], %27 {strides = array<i32>} : memref<2x8x8x4xf32, #tpu.memory_space<vmem>>, vector<2x1x8x4xf32>,
    %c1 = arith.constant 1 : index
    %c0_16 = arith.constant 0 : index
    %c0_17 = arith.constant 0 : index
    %29 = vector.load %arg4[%c1, %c0_16, %c0_17] : memref<8x8x4xf32, #tpu.memory_space<vmem>>, vector<1x8x4xf32>
    %30 = vector.shape_cast %29 : vector<1x8x4xf32> to vector<8x4xf32>
    %31 = vector.shape_cast %30 : vector<8x4xf32> to vector<1x8x4xf32>
    %32 = vector.broadcast %31 : vector<1x8x4xf32> to vector<2x8x4xf32>
    %33 = arith.mulf %32, %0 : vector<2x8x4xf32>
    %34 = vector.broadcast %31 : vector<1x8x4xf32> to vector<2x8x4xf32>
    %35 = arith.mulf %34, %1 : vector<2x8x4xf32>
    %c8_i32_18 = arith.constant 8 : i32
    %36 = arith.muli %arg1, %c8_i32_18 : i32
    %c1_i32 = arith.constant 1 : i32
    %37 = arith.addi %36, %c1_i32 : i32
    %c4_i32_19 = arith.constant 4 : i32
    %38 = arith.cmpi sge, %37, %c4_i32_19 : i32
    %39 = arith.extui %38 : i1 to i32
    %40 = arith.sitofp %39 : i32 to f32
    %cst_20 = arith.constant 1.000000e+00 : f32
    %41 = arith.subf %cst_20, %40 : f32
    %42 = vector.broadcast %41 : f32 to vector<2x8x4xf32>
    %43 = arith.mulf %42, %33 : vector<2x8x4xf32>
    %44 = vector.broadcast %40 : f32 to vector<2x8x4xf32>
    %45 = arith.mulf %44, %35 : vector<2x8x4xf32>
    %46 = arith.addf %43, %45 : vector<2x8x4xf32>
    %47 = vector.shape_cast %46 : vector<2x8x4xf32> to vector<2x1x8x4xf32>
    %c0_21 = arith.constant 0 : index
    %c1_22 = arith.constant 1 : index
    %c0_23 = arith.constant 0 : index
    %c0_24 = arith.constant 0 : index
    %48 = vector.load %arg6[%c0_21, %c1_22, %c0_23, %c0_24] : memref<2x8x8x4xf32, #tpu.memory_space<vmem>>, vector<2x1x8x4xf32>
    tpu.vector_store %arg6[%c0_21, %c1_22, %c0_23, %c0_24], %47 {strides = array<i32>} : memref<2x8x8x4xf32, #tpu.memory_space<vmem>>, vector<2x1x8x4xf32>,
    %49 = vector.broadcast %41 : f32 to vector<2x8x4xf32>
    %50 = arith.mulf %49, %35 : vector<2x8x4xf32>
    %51 = vector.broadcast %40 : f32 to vector<2x8x4xf32>
    %52 = arith.mulf %51, %33 : vector<2x8x4xf32>
    %53 = arith.subf %50, %52 : vector<2x8x4xf32>
    %54 = vector.shape_cast %53 : vector<2x8x4xf32> to vector<2x1x8x4xf32>
    %c0_25 = arith.constant 0 : index
    %c1_26 = arith.constant 1 : index
    %c0_27 = arith.constant 0 : index
    %c0_28 = arith.constant 0 : index
    %55 = vector.load %arg7[%c0_25, %c1_26, %c0_27, %c0_28] : memref<2x8x8x4xf32, #tpu.memory_space<vmem>>, vector<2x1x8x4xf32>
    tpu.vector_store %arg7[%c0_25, %c1_26, %c0_27, %c0_28], %54 {strides = array<i32>} : memref<2x8x8x4xf32, #tpu.memory_space<vmem>>, vector<2x1x8x4xf32>,
    %c2 = arith.constant 2 : index
    %c0_29 = arith.constant 0 : index
    %c0_30 = arith.constant 0 : index
    %56 = vector.load %arg4[%c2, %c0_29, %c0_30] : memref<8x8x4xf32, #tpu.memory_space<vmem>>, vector<1x8x4xf32>
    %57 = vector.shape_cast %56 : vector<1x8x4xf32> to vector<8x4xf32>
    %58 = vector.shape_cast %57 : vector<8x4xf32> to vector<1x8x4xf32>
    %59 = vector.broadcast %58 : vector<1x8x4xf32> to vector<2x8x4xf32>
    %60 = arith.mulf %59, %0 : vector<2x8x4xf32>
    %61 = vector.broadcast %58 : vector<1x8x4xf32> to vector<2x8x4xf32>
    %62 = arith.mulf %61, %1 : vector<2x8x4xf32>
    %c8_i32_31 = arith.constant 8 : i32
    %63 = arith.muli %arg1, %c8_i32_31 : i32
    %c2_i32 = arith.constant 2 : i32
    %64 = arith.addi %63, %c2_i32 : i32
    %c4_i32_32 = arith.constant 4 : i32
    %65 = arith.cmpi sge, %64, %c4_i32_32 : i32
    %66 = arith.extui %65 : i1 to i32
    %67 = arith.sitofp %66 : i32 to f32
    %cst_33 = arith.constant 1.000000e+00 : f32
    %68 = arith.subf %cst_33, %67 : f32
    %69 = vector.broadcast %68 : f32 to vector<2x8x4xf32>
    %70 = arith.mulf %69, %60 : vector<2x8x4xf32>
    %71 = vector.broadcast %67 : f32 to vector<2x8x4xf32>
    %72 = arith.mulf %71, %62 : vector<2x8x4xf32>
    %73 = arith.addf %70, %72 : vector<2x8x4xf32>
    %74 = vector.shape_cast %73 : vector<2x8x4xf32> to vector<2x1x8x4xf32>
    %c0_34 = arith.constant 0 : index
    %c2_35 = arith.constant 2 : index
    %c0_36 = arith.constant 0 : index
    %c0_37 = arith.constant 0 : index
    %75 = vector.load %arg6[%c0_34, %c2_35, %c0_36, %c0_37] : memref<2x8x8x4xf32, #tpu.memory_space<vmem>>, vector<2x1x8x4xf32>
    tpu.vector_store %arg6[%c0_34, %c2_35, %c0_36, %c0_37], %74 {strides = array<i32>} : memref<2x8x8x4xf32, #tpu.memory_space<vmem>>, vector<2x1x8x4xf32>,
    %76 = vector.broadcast %68 : f32 to vector<2x8x4xf32>
    %77 = arith.mulf %76, %62 : vector<2x8x4xf32>
    %78 = vector.broadcast %67 : f32 to vector<2x8x4xf32>
    %79 = arith.mulf %78, %60 : vector<2x8x4xf32>
    %80 = arith.subf %77, %79 : vector<2x8x4xf32>
    %81 = vector.shape_cast %80 : vector<2x8x4xf32> to vector<2x1x8x4xf32>
    %c0_38 = arith.constant 0 : index
    %c2_39 = arith.constant 2 : index
    %c0_40 = arith.constant 0 : index
    %c0_41 = arith.constant 0 : index
    %82 = vector.load %arg7[%c0_38, %c2_39, %c0_40, %c0_41] : memref<2x8x8x4xf32, #tpu.memory_space<vmem>>, vector<2x1x8x4xf32>
    tpu.vector_store %arg7[%c0_38, %c2_39, %c0_40, %c0_41], %81 {strides = array<i32>} : memref<2x8x8x4xf32, #tpu.memory_space<vmem>>, vector<2x1x8x4xf32>,
    %c3 = arith.constant 3 : index
    %c0_42 = arith.constant 0 : index
    %c0_43 = arith.constant 0 : index
    %83 = vector.load %arg4[%c3, %c0_42, %c0_43] : memref<8x8x4xf32, #tpu.memory_space<vmem>>, vector<1x8x4xf32>
    %84 = vector.shape_cast %83 : vector<1x8x4xf32> to vector<8x4xf32>
    %85 = vector.shape_cast %84 : vector<8x4xf32> to vector<1x8x4xf32>
    %86 = vector.broadcast %85 : vector<1x8x4xf32> to vector<2x8x4xf32>
    %87 = arith.mulf %86, %0 : vector<2x8x4xf32>
    %88 = vector.broadcast %85 : vector<1x8x4xf32> to vector<2x8x4xf32>
    %89 = arith.mulf %88, %1 : vector<2x8x4xf32>
    %c8_i32_44 = arith.constant 8 : i32
    %90 = arith.muli %arg1, %c8_i32_44 : i32
    %c3_i32 = arith.constant 3 : i32
    %91 = arith.addi %90, %c3_i32 : i32
    %c4_i32_45 = arith.constant 4 : i32
    %92 = arith.cmpi sge, %91, %c4_i32_45 : i32
    %93 = arith.extui %92 : i1 to i32
    %94 = arith.sitofp %93 : i32 to f32
    %cst_46 = arith.constant 1.000000e+00 : f32
    %95 = arith.subf %cst_46, %94 : f32
    %96 = vector.broadcast %95 : f32 to vector<2x8x4xf32>
    %97 = arith.mulf %96, %87 : vector<2x8x4xf32>
    %98 = vector.broadcast %94 : f32 to vector<2x8x4xf32>
    %99 = arith.mulf %98, %89 : vector<2x8x4xf32>
    %100 = arith.addf %97, %99 : vector<2x8x4xf32>
    %101 = vector.shape_cast %100 : vector<2x8x4xf32> to vector<2x1x8x4xf32>
    %c0_47 = arith.constant 0 : index
    %c3_48 = arith.constant 3 : index
    %c0_49 = arith.constant 0 : index
    %c0_50 = arith.constant 0 : index
    %102 = vector.load %arg6[%c0_47, %c3_48, %c0_49, %c0_50] : memref<2x8x8x4xf32, #tpu.memory_space<vmem>>, vector<2x1x8x4xf32>
    tpu.vector_store %arg6[%c0_47, %c3_48, %c0_49, %c0_50], %101 {strides = array<i32>} : memref<2x8x8x4xf32, #tpu.memory_space<vmem>>, vector<2x1x8x4xf32>,
    %103 = vector.broadcast %95 : f32 to vector<2x8x4xf32>
    %104 = arith.mulf %103, %89 : vector<2x8x4xf32>
    %105 = vector.broadcast %94 : f32 to vector<2x8x4xf32>
    %106 = arith.mulf %105, %87 : vector<2x8x4xf32>
    %107 = arith.subf %104, %106 : vector<2x8x4xf32>
    %108 = vector.shape_cast %107 : vector<2x8x4xf32> to vector<2x1x8x4xf32>
    %c0_51 = arith.constant 0 : index
    %c3_52 = arith.constant 3 : index
    %c0_53 = arith.constant 0 : index
    %c0_54 = arith.constant 0 : index
    %109 = vector.load %arg7[%c0_51, %c3_52, %c0_53, %c0_54] : memref<2x8x8x4xf32, #tpu.memory_space<vmem>>, vector<2x1x8x4xf32>
    tpu.vector_store %arg7[%c0_51, %c3_52, %c0_53, %c0_54], %108 {strides = array<i32>} : memref<2x8x8x4xf32, #tpu.memory_space<vmem>>, vector<2x1x8x4xf32>,
    %c4 = arith.constant 4 : index
    %c0_55 = arith.constant 0 : index
    %c0_56 = arith.constant 0 : index
    %110 = vector.load %arg4[%c4, %c0_55, %c0_56] : memref<8x8x4xf32, #tpu.memory_space<vmem>>, vector<1x8x4xf32>
    %111 = vector.shape_cast %110 : vector<1x8x4xf32> to vector<8x4xf32>
    %112 = vector.shape_cast %111 : vector<8x4xf32> to vector<1x8x4xf32>
    %113 = vector.broadcast %112 : vector<1x8x4xf32> to vector<2x8x4xf32>
    %114 = arith.mulf %113, %0 : vector<2x8x4xf32>
    %115 = vector.broadcast %112 : vector<1x8x4xf32> to vector<2x8x4xf32>
    %116 = arith.mulf %115, %1 : vector<2x8x4xf32>
    %c8_i32_57 = arith.constant 8 : i32
    %117 = arith.muli %arg1, %c8_i32_57 : i32
    %c4_i32_58 = arith.constant 4 : i32
    %118 = arith.addi %117, %c4_i32_58 : i32
    %c4_i32_59 = arith.constant 4 : i32
    %119 = arith.cmpi sge, %118, %c4_i32_59 : i32
    %120 = arith.extui %119 : i1 to i32
    %121 = arith.sitofp %120 : i32 to f32
    %cst_60 = arith.constant 1.000000e+00 : f32
    %122 = arith.subf %cst_60, %121 : f32
    %123 = vector.broadcast %122 : f32 to vector<2x8x4xf32>
    %124 = arith.mulf %123, %114 : vector<2x8x4xf32>
    %125 = vector.broadcast %121 : f32 to vector<2x8x4xf32>
    %126 = arith.mulf %125, %116 : vector<2x8x4xf32>
    %127 = arith.addf %124, %126 : vector<2x8x4xf32>
    %128 = vector.shape_cast %127 : vector<2x8x4xf32> to vector<2x1x8x4xf32>
    %c0_61 = arith.constant 0 : index
    %c4_62 = arith.constant 4 : index
    %c0_63 = arith.constant 0 : index
    %c0_64 = arith.constant 0 : index
    %129 = vector.load %arg6[%c0_61, %c4_62, %c0_63, %c0_64] : memref<2x8x8x4xf32, #tpu.memory_space<vmem>>, vector<2x1x8x4xf32>
    tpu.vector_store %arg6[%c0_61, %c4_62, %c0_63, %c0_64], %128 {strides = array<i32>} : memref<2x8x8x4xf32, #tpu.memory_space<vmem>>, vector<2x1x8x4xf32>,
    %130 = vector.broadcast %122 : f32 to vector<2x8x4xf32>
    %131 = arith.mulf %130, %116 : vector<2x8x4xf32>
    %132 = vector.broadcast %121 : f32 to vector<2x8x4xf32>
    %133 = arith.mulf %132, %114 : vector<2x8x4xf32>
    %134 = arith.subf %131, %133 : vector<2x8x4xf32>
    %135 = vector.shape_cast %134 : vector<2x8x4xf32> to vector<2x1x8x4xf32>
    %c0_65 = arith.constant 0 : index
    %c4_66 = arith.constant 4 : index
    %c0_67 = arith.constant 0 : index
    %c0_68 = arith.constant 0 : index
    %136 = vector.load %arg7[%c0_65, %c4_66, %c0_67, %c0_68] : memref<2x8x8x4xf32, #tpu.memory_space<vmem>>, vector<2x1x8x4xf32>
    tpu.vector_store %arg7[%c0_65, %c4_66, %c0_67, %c0_68], %135 {strides = array<i32>} : memref<2x8x8x4xf32, #tpu.memory_space<vmem>>, vector<2x1x8x4xf32>,
    %c5 = arith.constant 5 : index
    %c0_69 = arith.constant 0 : index
    %c0_70 = arith.constant 0 : index
    %137 = vector.load %arg4[%c5, %c0_69, %c0_70] : memref<8x8x4xf32, #tpu.memory_space<vmem>>, vector<1x8x4xf32>
    %138 = vector.shape_cast %137 : vector<1x8x4xf32> to vector<8x4xf32>
    %139 = vector.shape_cast %138 : vector<8x4xf32> to vector<1x8x4xf32>
    %140 = vector.broadcast %139 : vector<1x8x4xf32> to vector<2x8x4xf32>
    %141 = arith.mulf %140, %0 : vector<2x8x4xf32>
    %142 = vector.broadcast %139 : vector<1x8x4xf32> to vector<2x8x4xf32>
    %143 = arith.mulf %142, %1 : vector<2x8x4xf32>
    %c8_i32_71 = arith.constant 8 : i32
    %144 = arith.muli %arg1, %c8_i32_71 : i32
    %c5_i32 = arith.constant 5 : i32
    %145 = arith.addi %144, %c5_i32 : i32
    %c4_i32_72 = arith.constant 4 : i32
    %146 = arith.cmpi sge, %145, %c4_i32_72 : i32
    %147 = arith.extui %146 : i1 to i32
    %148 = arith.sitofp %147 : i32 to f32
    %cst_73 = arith.constant 1.000000e+00 : f32
    %149 = arith.subf %cst_73, %148 : f32
    %150 = vector.broadcast %149 : f32 to vector<2x8x4xf32>
    %151 = arith.mulf %150, %141 : vector<2x8x4xf32>
    %152 = vector.broadcast %148 : f32 to vector<2x8x4xf32>
    %153 = arith.mulf %152, %143 : vector<2x8x4xf32>
    %154 = arith.addf %151, %153 : vector<2x8x4xf32>
    %155 = vector.shape_cast %154 : vector<2x8x4xf32> to vector<2x1x8x4xf32>
    %c0_74 = arith.constant 0 : index
    %c5_75 = arith.constant 5 : index
    %c0_76 = arith.constant 0 : index
    %c0_77 = arith.constant 0 : index
    %156 = vector.load %arg6[%c0_74, %c5_75, %c0_76, %c0_77] : memref<2x8x8x4xf32, #tpu.memory_space<vmem>>, vector<2x1x8x4xf32>
    tpu.vector_store %arg6[%c0_74, %c5_75, %c0_76, %c0_77], %155 {strides = array<i32>} : memref<2x8x8x4xf32, #tpu.memory_space<vmem>>, vector<2x1x8x4xf32>,
    %157 = vector.broadcast %149 : f32 to vector<2x8x4xf32>
    %158 = arith.mulf %157, %143 : vector<2x8x4xf32>
    %159 = vector.broadcast %148 : f32 to vector<2x8x4xf32>
    %160 = arith.mulf %159, %141 : vector<2x8x4xf32>
    %161 = arith.subf %158, %160 : vector<2x8x4xf32>
    %162 = vector.shape_cast %161 : vector<2x8x4xf32> to vector<2x1x8x4xf32>
    %c0_78 = arith.constant 0 : index
    %c5_79 = arith.constant 5 : index
    %c0_80 = arith.constant 0 : index
    %c0_81 = arith.constant 0 : index
    %163 = vector.load %arg7[%c0_78, %c5_79, %c0_80, %c0_81] : memref<2x8x8x4xf32, #tpu.memory_space<vmem>>, vector<2x1x8x4xf32>
    tpu.vector_store %arg7[%c0_78, %c5_79, %c0_80, %c0_81], %162 {strides = array<i32>} : memref<2x8x8x4xf32, #tpu.memory_space<vmem>>, vector<2x1x8x4xf32>,
    %c6 = arith.constant 6 : index
    %c0_82 = arith.constant 0 : index
    %c0_83 = arith.constant 0 : index
    %164 = vector.load %arg4[%c6, %c0_82, %c0_83] : memref<8x8x4xf32, #tpu.memory_space<vmem>>, vector<1x8x4xf32>
    %165 = vector.shape_cast %164 : vector<1x8x4xf32> to vector<8x4xf32>
    %166 = vector.shape_cast %165 : vector<8x4xf32> to vector<1x8x4xf32>
    %167 = vector.broadcast %166 : vector<1x8x4xf32> to vector<2x8x4xf32>
    %168 = arith.mulf %167, %0 : vector<2x8x4xf32>
    %169 = vector.broadcast %166 : vector<1x8x4xf32> to vector<2x8x4xf32>
    %170 = arith.mulf %169, %1 : vector<2x8x4xf32>
    %c8_i32_84 = arith.constant 8 : i32
    %171 = arith.muli %arg1, %c8_i32_84 : i32
    %c6_i32 = arith.constant 6 : i32
    %172 = arith.addi %171, %c6_i32 : i32
    %c4_i32_85 = arith.constant 4 : i32
    %173 = arith.cmpi sge, %172, %c4_i32_85 : i32
    %174 = arith.extui %173 : i1 to i32
    %175 = arith.sitofp %174 : i32 to f32
    %cst_86 = arith.constant 1.000000e+00 : f32
    %176 = arith.subf %cst_86, %175 : f32
    %177 = vector.broadcast %176 : f32 to vector<2x8x4xf32>
    %178 = arith.mulf %177, %168 : vector<2x8x4xf32>
    %179 = vector.broadcast %175 : f32 to vector<2x8x4xf32>
    %180 = arith.mulf %179, %170 : vector<2x8x4xf32>
    %181 = arith.addf %178, %180 : vector<2x8x4xf32>
    %182 = vector.shape_cast %181 : vector<2x8x4xf32> to vector<2x1x8x4xf32>
    %c0_87 = arith.constant 0 : index
    %c6_88 = arith.constant 6 : index
    %c0_89 = arith.constant 0 : index
    %c0_90 = arith.constant 0 : index
    %183 = vector.load %arg6[%c0_87, %c6_88, %c0_89, %c0_90] : memref<2x8x8x4xf32, #tpu.memory_space<vmem>>, vector<2x1x8x4xf32>
    tpu.vector_store %arg6[%c0_87, %c6_88, %c0_89, %c0_90], %182 {strides = array<i32>} : memref<2x8x8x4xf32, #tpu.memory_space<vmem>>, vector<2x1x8x4xf32>,
    %184 = vector.broadcast %176 : f32 to vector<2x8x4xf32>
    %185 = arith.mulf %184, %170 : vector<2x8x4xf32>
    %186 = vector.broadcast %175 : f32 to vector<2x8x4xf32>
    %187 = arith.mulf %186, %168 : vector<2x8x4xf32>
    %188 = arith.subf %185, %187 : vector<2x8x4xf32>
    %189 = vector.shape_cast %188 : vector<2x8x4xf32> to vector<2x1x8x4xf32>
    %c0_91 = arith.constant 0 : index
    %c6_92 = arith.constant 6 : index
    %c0_93 = arith.constant 0 : index
    %c0_94 = arith.constant 0 : index
    %190 = vector.load %arg7[%c0_91, %c6_92, %c0_93, %c0_94] : memref<2x8x8x4xf32, #tpu.memory_space<vmem>>, vector<2x1x8x4xf32>
    tpu.vector_store %arg7[%c0_91, %c6_92, %c0_93, %c0_94], %189 {strides = array<i32>} : memref<2x8x8x4xf32, #tpu.memory_space<vmem>>, vector<2x1x8x4xf32>,
    %c7 = arith.constant 7 : index
    %c0_95 = arith.constant 0 : index
    %c0_96 = arith.constant 0 : index
    %191 = vector.load %arg4[%c7, %c0_95, %c0_96] : memref<8x8x4xf32, #tpu.memory_space<vmem>>, vector<1x8x4xf32>
    %192 = vector.shape_cast %191 : vector<1x8x4xf32> to vector<8x4xf32>
    %193 = vector.shape_cast %192 : vector<8x4xf32> to vector<1x8x4xf32>
    %194 = vector.broadcast %193 : vector<1x8x4xf32> to vector<2x8x4xf32>
    %195 = arith.mulf %194, %0 : vector<2x8x4xf32>
    %196 = vector.broadcast %193 : vector<1x8x4xf32> to vector<2x8x4xf32>
    %197 = arith.mulf %196, %1 : vector<2x8x4xf32>
    %c8_i32_97 = arith.constant 8 : i32
    %198 = arith.muli %arg1, %c8_i32_97 : i32
    %c7_i32 = arith.constant 7 : i32
    %199 = arith.addi %198, %c7_i32 : i32
    %c4_i32_98 = arith.constant 4 : i32
    %200 = arith.cmpi sge, %199, %c4_i32_98 : i32
    %201 = arith.extui %200 : i1 to i32
    %202 = arith.sitofp %201 : i32 to f32
    %cst_99 = arith.constant 1.000000e+00 : f32
    %203 = arith.subf %cst_99, %202 : f32
    %204 = vector.broadcast %203 : f32 to vector<2x8x4xf32>
    %205 = arith.mulf %204, %195 : vector<2x8x4xf32>
    %206 = vector.broadcast %202 : f32 to vector<2x8x4xf32>
    %207 = arith.mulf %206, %197 : vector<2x8x4xf32>
    %208 = arith.addf %205, %207 : vector<2x8x4xf32>
    %209 = vector.shape_cast %208 : vector<2x8x4xf32> to vector<2x1x8x4xf32>
    %c0_100 = arith.constant 0 : index
    %c7_101 = arith.constant 7 : index
    %c0_102 = arith.constant 0 : index
    %c0_103 = arith.constant 0 : index
    %210 = vector.load %arg6[%c0_100, %c7_101, %c0_102, %c0_103] : memref<2x8x8x4xf32, #tpu.memory_space<vmem>>, vector<2x1x8x4xf32>
    tpu.vector_store %arg6[%c0_100, %c7_101, %c0_102, %c0_103], %209 {strides = array<i32>} : memref<2x8x8x4xf32, #tpu.memory_space<vmem>>, vector<2x1x8x4xf32>,
    %211 = vector.broadcast %203 : f32 to vector<2x8x4xf32>
    %212 = arith.mulf %211, %197 : vector<2x8x4xf32>
    %213 = vector.broadcast %202 : f32 to vector<2x8x4xf32>
    %214 = arith.mulf %213, %195 : vector<2x8x4xf32>
    %215 = arith.subf %212, %214 : vector<2x8x4xf32>
    %216 = vector.shape_cast %215 : vector<2x8x4xf32> to vector<2x1x8x4xf32>
    %c0_104 = arith.constant 0 : index
    %c7_105 = arith.constant 7 : index
    %c0_106 = arith.constant 0 : index
    %c0_107 = arith.constant 0 : index
    %217 = vector.load %arg7[%c0_104, %c7_105, %c0_106, %c0_107] : memref<2x8x8x4xf32, #tpu.memory_space<vmem>>, vector<2x1x8x4xf32>
    tpu.vector_store %arg7[%c0_104, %c7_105, %c0_106, %c0_107], %216 {strides = array<i32>} : memref<2x8x8x4xf32, #tpu.memory_space<vmem>>, vector<2x1x8x4xf32>,
    %c0_i32_108 = arith.constant 0 : i32
    %218 = arith.cmpi eq, %arg1, %c0_i32_108 : i32
    %219 = arith.extui %218 : i1 to i32
    %c0_i32_109 = arith.constant 0 : i32
    %220 = arith.cmpi ne, %219, %c0_i32_109 : i32
    scf.if %220 {
      %c0_110 = arith.constant 0 : index
      %c0_111 = arith.constant 0 : index
      %221 = vector.load %arg5[%c0_110, %c0_111] : memref<4x2xf32, #tpu.memory_space<vmem>>, vector<4x2xf32>
      %222 = vector.extract_strided_slice %221 {offsets = [0, 0], sizes = [2, 2], strides = [1, 1]} : vector<4x2xf32> to vector<2x2xf32>
      %223 = vector.shape_cast %222 : vector<2x2xf32> to vector<1x2x2xf32>
      %224 = vector.extract_strided_slice %0 {offsets = [0, 0, 0], sizes = [2, 2, 2], strides = [1, 1, 1]} : vector<2x8x4xf32> to vector<2x2x2xf32>
      %225 = vector.broadcast %223 : vector<1x2x2xf32> to vector<2x2x2xf32>
      %226 = arith.mulf %225, %224 : vector<2x2x2xf32>
      %c0_112 = arith.constant 0 : index
      %c0_113 = arith.constant 0 : index
      %c0_114 = arith.constant 0 : index
      %227 = vector.load %arg8[%c0_112, %c0_113, %c0_114] : memref<2x4x2xf32, #tpu.memory_space<vmem>>, vector<2x2x2xf32>
      tpu.vector_store %arg8[%c0_112, %c0_113, %c0_114], %226 {strides = array<i32>} : memref<2x4x2xf32, #tpu.memory_space<vmem>>, vector<2x2x2xf32>,
      %228 = vector.extract_strided_slice %221 {offsets = [2, 0], sizes = [2, 2], strides = [1, 1]} : vector<4x2xf32> to vector<2x2xf32>
      %229 = vector.shape_cast %228 : vector<2x2xf32> to vector<1x2x2xf32>
      %230 = vector.extract_strided_slice %0 {offsets = [0, 6, 0], sizes = [2, 2, 2], strides = [1, 1, 1]} : vector<2x8x4xf32> to vector<2x2x2xf32>
      %231 = vector.broadcast %229 : vector<1x2x2xf32> to vector<2x2x2xf32>
      %232 = arith.mulf %231, %230 : vector<2x2x2xf32>
      %c0_115 = arith.constant 0 : index
      %c2_116 = arith.constant 2 : index
      %c0_117 = arith.constant 0 : index
      %233 = vector.load %arg8[%c0_115, %c2_116, %c0_117] : memref<2x4x2xf32, #tpu.memory_space<vmem>>, vector<2x2x2xf32>
      tpu.vector_store %arg8[%c0_115, %c2_116, %c0_117], %232 {strides = array<i32>} : memref<2x4x2xf32, #tpu.memory_space<vmem>>, vector<2x2x2xf32>,
      %234 = vector.extract_strided_slice %221 {offsets = [0, 0], sizes = [2, 2], strides = [1, 1]} : vector<4x2xf32> to vector<2x2xf32>
      %235 = vector.shape_cast %234 : vector<2x2xf32> to vector<1x2x2xf32>
      %236 = vector.extract_strided_slice %1 {offsets = [0, 0, 0], sizes = [2, 2, 2], strides = [1, 1, 1]} : vector<2x8x4xf32> to vector<2x2x2xf32>
      %237 = vector.broadcast %235 : vector<1x2x2xf32> to vector<2x2x2xf32>
      %238 = arith.mulf %237, %236 : vector<2x2x2xf32>
      %c0_118 = arith.constant 0 : index
      %c0_119 = arith.constant 0 : index
      %c0_120 = arith.constant 0 : index
      %239 = vector.load %arg9[%c0_118, %c0_119, %c0_120] : memref<2x4x2xf32, #tpu.memory_space<vmem>>, vector<2x2x2xf32>
      tpu.vector_store %arg9[%c0_118, %c0_119, %c0_120], %238 {strides = array<i32>} : memref<2x4x2xf32, #tpu.memory_space<vmem>>, vector<2x2x2xf32>,
      %240 = vector.extract_strided_slice %221 {offsets = [2, 0], sizes = [2, 2], strides = [1, 1]} : vector<4x2xf32> to vector<2x2xf32>
      %241 = vector.shape_cast %240 : vector<2x2xf32> to vector<1x2x2xf32>
      %242 = vector.extract_strided_slice %1 {offsets = [0, 6, 0], sizes = [2, 2, 2], strides = [1, 1, 1]} : vector<2x8x4xf32> to vector<2x2x2xf32>
      %243 = vector.broadcast %241 : vector<1x2x2xf32> to vector<2x2x2xf32>
      %244 = arith.mulf %243, %242 : vector<2x2x2xf32>
      %c0_121 = arith.constant 0 : index
      %c2_122 = arith.constant 2 : index
      %c0_123 = arith.constant 0 : index
      %245 = vector.load %arg9[%c0_121, %c2_122, %c0_123] : memref<2x4x2xf32, #tpu.memory_space<vmem>>, vector<2x2x2xf32>
      tpu.vector_store %arg9[%c0_121, %c2_122, %c0_123], %244 {strides = array<i32>} : memref<2x4x2xf32, #tpu.memory_space<vmem>>, vector<2x2x2xf32>,
    } else {
    }
    return
  }
  func.func @transform_0(%arg0: i32, %arg1: i32) -> (i32, i32, i32) {
    %c0_i32 = arith.constant 0 : i32
    %c0_i32_0 = arith.constant 0 : i32
    %c0_i32_1 = arith.constant 0 : i32
    return %arg0, %c0_i32, %c0_i32_0 : i32, i32, i32
  }
  func.func @transform_1(%arg0: i32, %arg1: i32) -> (i32, i32, i32) {
    %c0_i32 = arith.constant 0 : i32
    %c0_i32_0 = arith.constant 0 : i32
    %c0_i32_1 = arith.constant 0 : i32
    return %arg0, %c0_i32, %c0_i32_0 : i32, i32, i32
  }
  func.func @transform_2(%arg0: i32, %arg1: i32) -> (i32, i32, i32) {
    %c0_i32 = arith.constant 0 : i32
    %c0_i32_0 = arith.constant 0 : i32
    %c0_i32_1 = arith.constant 0 : i32
    return %arg1, %c0_i32, %c0_i32_0 : i32, i32, i32
  }
  func.func @transform_3(%arg0: i32, %arg1: i32) -> (i32, i32) {
    %c0_i32 = arith.constant 0 : i32
    %c0_i32_0 = arith.constant 0 : i32
    %c0_i32_1 = arith.constant 0 : i32
    return %c0_i32, %c0_i32_0 : i32, i32
  }
  func.func @transform_4(%arg0: i32, %arg1: i32) -> (i32, i32, i32, i32) {
    %c0_i32 = arith.constant 0 : i32
    %c0_i32_0 = arith.constant 0 : i32
    %c0_i32_1 = arith.constant 0 : i32
    return %arg0, %arg1, %c0_i32, %c0_i32_0 : i32, i32, i32, i32
  }
  func.func @transform_5(%arg0: i32, %arg1: i32) -> (i32, i32, i32, i32) {
    %c0_i32 = arith.constant 0 : i32
    %c0_i32_0 = arith.constant 0 : i32
    %c0_i32_1 = arith.constant 0 : i32
    return %arg0, %arg1, %c0_i32, %c0_i32_0 : i32, i32, i32, i32
  }
  func.func @transform_6(%arg0: i32, %arg1: i32) -> (i32, i32, i32) {
    %c0_i32 = arith.constant 0 : i32
    %c0_i32_0 = arith.constant 0 : i32
    %c0_i32_1 = arith.constant 0 : i32
    return %arg0, %c0_i32, %c0_i32_0 : i32, i32, i32
  }
  func.func @transform_7(%arg0: i32, %arg1: i32) -> (i32, i32, i32) {
    %c0_i32 = arith.constant 0 : i32
    %c0_i32_0 = arith.constant 0 : i32
    %c0_i32_1 = arith.constant 0 : i32
    return %arg0, %c0_i32, %c0_i32_0 : i32, i32, i32
  }
}

</mosaic_0001>

<bundles_post_ra>
// kernel: _lambda_.2
= control target key start
LH: loop header
LB: loop body
LE: loop exit
PB: predicated region body
PF: predicated region fallthrough
CT: control target
= control target key end

     0   :  { %s1351_s24 = smov 0   ;;  %s1353_s25 = smov 0   ;;  %s1856_s0 = inlined_call_operand.vmem [shape: f32[8,16,8], index: 0, kind: input, shape index: {}]   ;;  %s1857_s1 = inlined_call_operand.vmem [shape: f32[8,16,8], index: 1, kind: input, shape index: {}]   ;;  %s1858_s2 = inlined_call_operand.vmem [shape: f32[9,16,8], index: 2, kind: input, shape index: {}]   ;;  %s1859_s3 = inlined_call_operand.vmem [shape: f32[8,4], index: 3, kind: input, shape index: {}]   ;;  %s1860_s4 = inlined_call_operand.vmem [shape: f32[8,9,16,8], index: 4, kind: output, shape index: {0}]   ;;  %s1861_s5 = inlined_call_operand.vmem [shape: f32[8,9,16,8], index: 5, kind: output, shape index: {1}]   ;;  %s1862_s6 = inlined_call_operand.vmem [shape: f32[8,8,4], index: 6, kind: output, shape index: {2}]   ;;  %s1863_s7 = inlined_call_operand.vmem [shape: f32[8,8,4], index: 7, kind: output, shape index: {3}]  }
   0x1   :  { %s1355_s26 = smov 0  }
   0x2 LB: > { %s30_s27 = sadd.s32 1, %s1305_s25  ;;  %p1163_p0 = scmp.ge.s32.totalorder %s1309_s26, 1  ;;  %s1309_s26 = sphi %s1355_s26, %s18_s26   ;;  %s1305_s25 = sphi %s1353_s25, %s1865_s25   ;;  %s1301_s24 = sphi %s1351_s24, %s1864_s24  }
   0x3   : > { %p32_p1 = scmp.ge.s32.totalorder %s30_s27, 4  ;;  %p286_p2 = scmp.lt.s32.totalorder %s1309_s26, 5 }
   0x5   : > { %s1867_s27 = smov (%p32_p1, %s30_s27), 0  ;;  %p287_p3 = pnand %p1163_p0, %p286_p2 }
   0x6   : > { %s1164_s28 = sshll.u32 (!%p287_p3), %s1301_s24, 1 }
   0x7   : > { %290 = sbr.rel (%p287_p3) target bundleno = 102 (0x66), region = 36  ;;  %p359_p4 = scmp.lt.s32.totalorder (!%p287_p3), %s1164_s28, 7 }
   0xc   : > { %s1869_s28 = smov (!%p359_p4, %s1164_s28), 7  ;;  %v1375_v0 = vld [vmem:[%s1858_s2] sm:$0xff]  ;;  %v1380_v1 = vld [vmem:[%s1858_s2 + $0x8] sm:$0xff]  ;;  %v1385_v2 = vld [vmem:[%s1858_s2 + $0x10] sm:$0xff]  ;;  %vm454_vm0 = vcmask 64512   ;;  %vm898_vm1 = vcmask 27648  }
   0xd   : > { %s1260_s29 = sshll.u32 %s1869_s28, 4  ;;  %v1400_v3 = vld [vmem:[%s1858_s2 + $0x18] sm:$0xff]  ;;  %s1262_s21 = smul.u32 144, %s1869_s28  ;;  %v1439_v22 = vld [vmem:[%s1858_s2 + $0x20] sm:$0xff]  ;;  %v1444_v23 = vld [vmem:[%s1858_s2 + $0x28] sm:$0xff]  ;;  %vm903_vm2 = vcmask 31748  }
   0xe   : > { %s1390_s15 = scalar_lea.vmem %s1856_s0, %s1260_s29  ;;  %s1395_s18 = scalar_lea.vmem %s1857_s1, %s1260_s29  ;;  %v1449_v27 = vld [vmem:[%s1858_s2 + $0x30] sm:$0xff]  ;;  %v1454_v28 = vld [vmem:[%s1858_s2 + $0x38] sm:$0xff]  ;;  %v1490_v48 = vld [vmem:[%s1858_s2 + $0x40] sm:$0xff] }
   0xf   : > { %v1404_v4 = vld [vmem:[%s1390_s15] sm:$0xff]  ;;  %v1410_v6 = vld [vmem:[%s1390_s15 + $0x8] sm:$0xff]  ;;  %s1434_s24 = scalar_lea.vmem %s1860_s4, %s1262_s21  ;;  %s1459_s17 = scalar_lea.vmem %s1861_s5, %s1262_s21  ;;  %v1505_v55 = vld [vmem:[%s1858_s2 + $0x50] sm:$0xff] }
  0x10   : > { %v1407_v5 = vld [vmem:[%s1395_s18] sm:$0xff]  ;;  %v427_v7 = vmul.f32 %v1375_v0, %v1404_v4  ;;  %v1417_v9 = vld [vmem:[%s1395_s18 + $0x8] sm:$0xff]  ;;  %v428_v10 = vmul.f32 %v1380_v1, %v1410_v6  ;;  %v478_v11 = vmul.f32 %v1385_v2, %v1404_v4  ;;  %v479_v14 = vmul.f32 %v1400_v3, %v1410_v6  ;;  %v1518_v60 = vld [vmem:[%s1858_s2 + $0x58] sm:$0xff]  ;;  %s1175_s30 = sshll.u32 %s1869_s28, 3 }
  0x11   : > { %v431_v8 = vmul.f32 %v1375_v0, %v1407_v5  ;;  %v432_v12 = vmul.f32 %v1380_v1, %v1417_v9  ;;  %v482_v13 = vmul.f32 %v1385_v2, %v1407_v5  ;;  %v483_v15 = vmul.f32 %v1400_v3, %v1417_v9  ;;  %v1495_v49 = vld [vmem:[%s1858_s2 + $0x48] sm:$0xff]  ;;  %s1672_s8 = scalar_lea.vmem %s1862_s6, %s1175_s30  ;;  %s1689_s11 = scalar_lea.vmem %s1863_s7, %s1175_s30 }
  0x12   : > { %v463_v17 = vmul.f32 0.0, %v427_v7  ;;  %v464_v18 = vmul.f32 0.0, %v428_v10  ;;  %v514_v26 = vmul.f32 0.0, %v478_v11  ;;  %v515_v32 = vmul.f32 0.0, %v479_v14 }
  0x13   : > { %v446_v16 = vmul.f32 0.0, %v431_v8  ;;  %v447_v19 = vmul.f32 0.0, %v432_v12  ;;  %v497_v20 = vmul.f32 0.0, %v482_v13  ;;  %v498_v21 = vmul.f32 0.0, %v483_v15 }
  0x14   : > { %v467_v25 = vsub.f32 %v431_v8, %v463_v17  ;;  %v468_v30 = vsub.f32 %v432_v12, %v464_v18  ;;  %v530_v33 = vmul.f32 %v1439_v22, %v1404_v4  ;;  %v534_v34 = vmul.f32 %v1439_v22, %v1407_v5  ;;  %v1544_v18 = vld [vmem:[%s1858_s2 + $0x68] sm:$0xff] }
  0x15   : > { %v450_v24 = vadd.f32 %v446_v16, %v427_v7  ;;  %v451_v29 = vadd.f32 %v447_v19, %v428_v10  ;;  %v501_v31 = vadd.f32 %v497_v20, %v478_v11  ;;  %v531_v35 = vmul.f32 %v1444_v23, %v1410_v6 }
  0x16   : > { %v535_v36 = vmul.f32 %v1444_v23, %v1417_v9  ;;  %v502_v37 = vadd.f32 %v498_v21, %v479_v14  ;;  %v582_v38 = vmul.f32 %v1449_v27, %v1404_v4  ;;  %v586_v39 = vmul.f32 %v1449_v27, %v1407_v5  ;;  %471 = vst.msk [vmem:[%s1459_s17] sm:$0xff] %vm454_vm0, %v467_v25  ;;  %v1535_v14 = vld [vmem:[%s1858_s2 + $0x60] sm:$0xff] }
  0x17   : > { %455 = vst.msk [vmem:[%s1434_s24] sm:$0xff] %vm454_vm0, %v450_v24  ;;  %v1479_v40 = vmul.f32 %v1454_v28, %v1417_v9  ;;  %v518_v41 = vsub.f32 %v482_v13, %v514_v26  ;;  %v549_v42 = vmul.f32 0.0, %v534_v34  ;;  %v566_v44 = vmul.f32 0.0, %v530_v33 }
  0x18   : > { %456 = vst.msk [vmem:[%s1434_s24 + $0x8] sm:$0xff] %vm454_vm0, %v451_v29  ;;  %v550_v43 = vmul.f32 0.0, %v535_v36  ;;  %v519_v45 = vsub.f32 %v483_v15, %v515_v32  ;;  %v567_v46 = vmul.f32 0.0, %v531_v35  ;;  %v583_v47 = vmul.f32 %v1454_v28, %v1410_v6  ;;  %v1562_v32 = vld [vmem:[%s1858_s2 + $0x70] sm:$0xff] }
  0x19   : > { %472 = vst.msk [vmem:[%s1459_s17 + $0x8] sm:$0xff] %vm454_vm0, %v468_v30  ;;  %v553_v50 = vadd.f32 %v549_v42, %v530_v33  ;;  %v601_v51 = vmul.f32 0.0, %v586_v39  ;;  %v602_v53 = vmul.f32 0.0, %v1479_v40  ;;  %v618_v54 = vmul.f32 0.0, %v582_v38 }
  0x1a   : > { %1180 = vst.msk [vmem:[%s1434_s24 + $0x10] sm:$0xff] %vm454_vm0, %v501_v31  ;;  %v554_v52 = vadd.f32 %v550_v43, %v531_v35  ;;  %v570_v56 = vsub.f32 %v534_v34, %v566_v44  ;;  %v634_v57 = vmul.f32 %v1490_v48, %v1404_v4  ;;  %v638_v58 = vmul.f32 %v1490_v48, %v1407_v5 }
  0x1b   : > { %1181 = vst.msk [vmem:[%s1434_s24 + $0x18] sm:$0xff] %vm454_vm0, %v502_v37  ;;  %v639_v59 = vmul.f32 %v1495_v49, %v1417_v9  ;;  %v571_v61 = vsub.f32 %v535_v36, %v567_v46  ;;  %v619_v62 = vmul.f32 0.0, %v583_v47  ;;  %v635_v63 = vmul.f32 %v1495_v49, %v1410_v6  ;;  %v1571_v36 = vld [vmem:[%s1858_s2 + $0x78] sm:$0xff]  ;;  %v1588_v46 = vld [vmem:[%s1858_s2 + $0x80] sm:$0xff] }
  0x1c   : > { %1184 = vst.msk [vmem:[%s1459_s17 + $0x10] sm:$0xff] %vm454_vm0, %v518_v41  ;;  %v605_v7 = vadd.f32 %v601_v51, %v582_v38  ;;  %v653_v8 = vmul.f32 0.0, %v638_v58  ;;  %v686_v10 = vmul.f32 %v1505_v55, %v1404_v4  ;;  %v606_v11 = vadd.f32 %v602_v53, %v583_v47 }
  0x1d   : > { %1185 = vst.msk [vmem:[%s1459_s17 + $0x18] sm:$0xff] %vm454_vm0, %v519_v45  ;;  %v654_v12 = vmul.f32 0.0, %v639_v59  ;;  %v687_v13 = vmul.f32 %v1518_v60, %v1410_v6  ;;  %v622_v15 = vsub.f32 %v586_v39, %v618_v54  ;;  %v670_v16 = vmul.f32 0.0, %v634_v57 }
  0x1e   : > { %1190 = vst.msk [vmem:[%s1434_s24 + $0x20] sm:$0xff] %vm454_vm0, %v553_v50  ;;  %v690_v17 = vmul.f32 %v1505_v55, %v1407_v5  ;;  %v623_v19 = vsub.f32 %v1479_v40, %v619_v62  ;;  %v671_v20 = vmul.f32 0.0, %v635_v63  ;;  %v691_v21 = vmul.f32 %v1518_v60, %v1417_v9 }
  0x1f   : > { %1191 = vst.msk [vmem:[%s1434_s24 + $0x28] sm:$0xff] %vm454_vm0, %v554_v52  ;;  %v657_v24 = vadd.f32 %v653_v8, %v634_v57  ;;  %v700_v25 = vmul.f32 0.0, %v686_v10  ;;  %v738_v26 = vmul.f32 %v1535_v14, %v1404_v4  ;;  %v658_v29 = vadd.f32 %v654_v12, %v635_v63  ;;  %v1597_v52 = vld [vmem:[%s1858_s2 + $0x88] sm:$0xff] }
  0x20   : > { %1194 = vst.msk [vmem:[%s1459_s17 + $0x20] sm:$0xff] %vm454_vm0, %v570_v56  ;;  %v701_v30 = vmul.f32 0.0, %v687_v13  ;;  %v739_v31 = vmul.f32 %v1544_v18, %v1410_v6  ;;  %v674_v33 = vsub.f32 %v638_v58, %v670_v16  ;;  %v718_v34 = vmul.f32 0.0, %v690_v17 }
  0x21   : > { %1195 = vst.msk [vmem:[%s1459_s17 + $0x28] sm:$0xff] %vm454_vm0, %v571_v61  ;;  %v742_v35 = vmul.f32 %v1535_v14, %v1407_v5  ;;  %v675_v37 = vsub.f32 %v639_v59, %v671_v20  ;;  %v719_v38 = vmul.f32 0.0, %v691_v21  ;;  %v743_v39 = vmul.f32 %v1544_v18, %v1417_v9  ;;  %v1624_v20 = vld [vmem:[%s1395_s18 + $0x10] sm:$0xff] }
  0x22   : > { %1200 = vst.msk [vmem:[%s1434_s24 + $0x30] sm:$0xff] %vm454_vm0, %v605_v7  ;;  %v709_v40 = vadd.f32 %v700_v25, %v690_v17  ;;  %v752_v41 = vmul.f32 0.0, %v738_v26  ;;  %v790_v42 = vmul.f32 %v1562_v32, %v1404_v4  ;;  %v710_v43 = vadd.f32 %v701_v30, %v691_v21  ;;  %v1629_v25 = vld [vmem:[%s1395_s18 + $0x18] sm:$0xff]  ;;  %v1634_v30 = vld [vmem:[%s1390_s15 + $0x10] sm:$0xff] }
  0x23   : > { %1201 = vst.msk [vmem:[%s1434_s24 + $0x38] sm:$0xff] %vm454_vm0, %v606_v11  ;;  %v753_v44 = vmul.f32 0.0, %v739_v31  ;;  %v791_v45 = vmul.f32 %v1571_v36, %v1410_v6  ;;  %v726_v47 = vsub.f32 %v718_v34, %v686_v10  ;;  %v770_v50 = vmul.f32 0.0, %v742_v35  ;;  %v1641_v34 = vld [vmem:[%s1390_s15 + $0x18] sm:$0xff] }
  0x24   : > { %1204 = vst.msk [vmem:[%s1459_s17 + $0x30] sm:$0xff] %vm454_vm0, %v622_v15  ;;  %v794_v51 = vmul.f32 %v1562_v32, %v1407_v5  ;;  %v727_v53 = vsub.f32 %v719_v38, %v687_v13  ;;  %v771_v54 = vmul.f32 0.0, %v743_v39  ;;  %v795_v56 = vmul.f32 %v1571_v36, %v1417_v9 }
  0x25   : > { %1205 = vst.msk [vmem:[%s1459_s17 + $0x38] sm:$0xff] %vm454_vm0, %v623_v19  ;;  %v761_v57 = vadd.f32 %v752_v41, %v742_v35  ;;  %v804_v58 = vmul.f32 0.0, %v790_v42  ;;  %v842_v59 = vmul.f32 %v1588_v46, %v1404_v4  ;;  %v762_v61 = vadd.f32 %v753_v44, %v743_v39 }
  0x26   : > { %1210 = vst.msk [vmem:[%s1434_s24 + $0x40] sm:$0xff] %vm454_vm0, %v657_v24  ;;  %v805_v62 = vmul.f32 0.0, %v791_v45  ;;  %v843_v63 = vmul.f32 %v1597_v52, %v1410_v6  ;;  %v778_v7 = vsub.f32 %v770_v50, %v738_v26  ;;  %v822_v8 = vmul.f32 0.0, %v794_v51 }
  0x27   : > { %1211 = vst.msk [vmem:[%s1434_s24 + $0x48] sm:$0xff] %vm454_vm0, %v658_v29  ;;  %v846_v10 = vmul.f32 %v1588_v46, %v1407_v5  ;;  %v779_v11 = vsub.f32 %v771_v54, %v739_v31  ;;  %v823_v12 = vmul.f32 0.0, %v795_v56  ;;  %v847_v13 = vmul.f32 %v1597_v52, %v1417_v9 }
  0x28   : > { %1214 = vst.msk [vmem:[%s1459_s17 + $0x40] sm:$0xff] %vm454_vm0, %v674_v33  ;;  %v813_v15 = vadd.f32 %v804_v58, %v794_v51  ;;  %v856_v16 = vmul.f32 0.0, %v842_v59  ;;  %v814_v17 = vadd.f32 %v805_v62, %v795_v56  ;;  %v857_v19 = vmul.f32 0.0, %v843_v63 }
  0x29   : > { %1215 = vst.msk [vmem:[%s1459_s17 + $0x48] sm:$0xff] %vm454_vm0, %v675_v37  ;;  %v830_v21 = vsub.f32 %v822_v8, %v790_v42  ;;  %v874_v24 = vmul.f32 0.0, %v846_v10  ;;  %v831_v26 = vsub.f32 %v823_v12, %v791_v45  ;;  %v875_v29 = vmul.f32 0.0, %v847_v13  ;;  %v1648_v37 = vld [vmem:[%s1859_s3] sm:$0xff] }
  0x2a   : > { %1220 = vst.msk [vmem:[%s1434_s24 + $0x50] sm:$0xff] %vm454_vm0, %v709_v40  ;;  %v865_v31 = vadd.f32 %v856_v16, %v846_v10  ;;  %v433_v33 = vmul.f32 %v1375_v0, %v1624_v20  ;;  %v866_v35 = vadd.f32 %v857_v19, %v847_v13  ;;  %v434_v38 = vmul.f32 %v1380_v1, %v1629_v25 }
  0x2b   : > { %1221 = vst.msk [vmem:[%s1434_s24 + $0x58] sm:$0xff] %vm454_vm0, %v710_v43  ;;  %v882_v39 = vsub.f32 %v874_v24, %v842_v59  ;;  %v429_v40 = vmul.f32 %v1375_v0, %v1634_v30  ;;  %v883_v41 = vsub.f32 %v875_v29, %v843_v63  ;;  %v430_v42 = vmul.f32 %v1380_v1, %v1641_v34 }
  0x2c   : > { %1224 = vst.msk [vmem:[%s1459_s17 + $0x50] sm:$0xff] %vm454_vm0, %v726_v47  ;;  %v896_v43 = vmul.f32 %v1648_v37, %v1404_v4  ;;  %v448_v44 = vmul.f32 0.0, %v433_v33  ;;  %v484_v45 = vmul.f32 %v1385_v2, %v1624_v20  ;;  %v901_v0 = vmul.f32 %v1648_v37, %v1410_v6 }
  0x2d   : > { %1225 = vst.msk [vmem:[%s1459_s17 + $0x58] sm:$0xff] %vm454_vm0, %v727_v53  ;;  %v449_v1 = vmul.f32 0.0, %v434_v38  ;;  %v485_v4 = vmul.f32 %v1400_v3, %v1629_v25  ;;  %v906_v47 = vmul.f32 %v1648_v37, %v1407_v5  ;;  %v465_v50 = vmul.f32 0.0, %v429_v40 }
  0x2e   : > { %1230 = vst.msk [vmem:[%s1434_s24 + $0x60] sm:$0xff] %vm454_vm0, %v761_v57  ;;  %v480_v51 = vmul.f32 %v1385_v2, %v1634_v30  ;;  %v910_v6 = vmul.f32 %v1648_v37, %v1417_v9  ;;  %v466_v53 = vmul.f32 0.0, %v430_v42  ;;  %v481_v5 = vmul.f32 %v1400_v3, %v1641_v34 }
  0x2f   : > { %1231 = vst.msk [vmem:[%s1434_s24 + $0x68] sm:$0xff] %vm454_vm0, %v762_v61  ;;  %v452_v2 = vadd.f32 %v448_v44, %v429_v40  ;;  %v499_v54 = vmul.f32 0.0, %v484_v45  ;;  %v536_v56 = vmul.f32 %v1439_v22, %v1624_v20  ;;  %v453_v57 = vadd.f32 %v449_v1, %v430_v42 }
  0x30   : > { %1234 = vst.msk [vmem:[%s1459_s17 + $0x60] sm:$0xff] %vm454_vm0, %v778_v7  ;;  %v500_v58 = vmul.f32 0.0, %v485_v4  ;;  %v537_v9 = vmul.f32 %v1444_v23, %v1629_v25  ;;  %v469_v3 = vsub.f32 %v433_v33, %v465_v50  ;;  %v516_v59 = vmul.f32 0.0, %v480_v51 }
  0x31   : > { %1235 = vst.msk [vmem:[%s1459_s17 + $0x68] sm:$0xff] %vm454_vm0, %v779_v11  ;;  %v532_v61 = vmul.f32 %v1439_v22, %v1634_v30  ;;  %v470_v62 = vsub.f32 %v434_v38, %v466_v53  ;;  %v517_v63 = vmul.f32 0.0, %v481_v5  ;;  %v533_v7 = vmul.f32 %v1444_v23, %v1641_v34 }
  0x32   : > { %1240 = vst.msk [vmem:[%s1434_s24 + $0x70] sm:$0xff] %vm454_vm0, %v813_v15  ;;  %v503_v8 = vadd.f32 %v499_v54, %v480_v51  ;;  %v551_v10 = vmul.f32 0.0, %v536_v56  ;;  %v588_v11 = vmul.f32 %v1449_v27, %v1624_v20  ;;  %v504_v22 = vadd.f32 %v500_v58, %v481_v5 }
  0x33   : > { %1241 = vst.msk [vmem:[%s1434_s24 + $0x78] sm:$0xff] %vm454_vm0, %v814_v17  ;;  %v552_v12 = vmul.f32 0.0, %v537_v9  ;;  %v589_v13 = vmul.f32 %v1454_v28, %v1629_v25  ;;  %v520_v23 = vsub.f32 %v484_v45, %v516_v59  ;;  %v568_v15 = vmul.f32 0.0, %v532_v61 }
  0x34   : > { %1244 = vst.msk [vmem:[%s1459_s17 + $0x70] sm:$0xff] %vm454_vm0, %v830_v21  ;;  %v584_v16 = vmul.f32 %v1449_v27, %v1634_v30  ;;  %v521_v17 = vsub.f32 %v485_v4, %v517_v63  ;;  %v569_v19 = vmul.f32 0.0, %v533_v7  ;;  %v585_v21 = vmul.f32 %v1454_v28, %v1641_v34 }
  0x35   : > { %1245 = vst.msk [vmem:[%s1459_s17 + $0x78] sm:$0xff] %vm454_vm0, %v831_v26  ;;  %v555_v24 = vadd.f32 %v551_v10, %v532_v61  ;;  %v603_v26 = vmul.f32 0.0, %v588_v11  ;;  %v640_v29 = vmul.f32 %v1490_v48, %v1624_v20  ;;  %v556_v27 = vadd.f32 %v552_v12, %v533_v7 }
  0x36   : > { %1250 = vst.msk [vmem:[%s1434_s24 + $0x80] sm:$0xff] %vm454_vm0, %v865_v31  ;;  %v604_v31 = vmul.f32 0.0, %v589_v13  ;;  %v641_v33 = vmul.f32 %v1495_v49, %v1629_v25  ;;  %v572_v28 = vsub.f32 %v536_v56, %v568_v15  ;;  %v636_v38 = vmul.f32 %v1490_v48, %v1634_v30 }
  0x37   : > { %1251 = vst.msk [vmem:[%s1434_s24 + $0x88] sm:$0xff] %vm454_vm0, %v866_v35  ;;  %v620_v35 = vmul.f32 0.0, %v584_v16  ;;  %v621_v40 = vmul.f32 0.0, %v585_v21  ;;  %v607_v42 = vadd.f32 %v603_v26, %v584_v16  ;;  %v688_v44 = vmul.f32 %v1505_v55, %v1634_v30 }
  0x38   : > { %1254 = vst.msk [vmem:[%s1459_s17 + $0x80] sm:$0xff] %vm454_vm0, %v882_v39  ;;  %v573_v39 = vsub.f32 %v537_v9, %v569_v19  ;;  %v608_v48 = vadd.f32 %v604_v31, %v585_v21  ;;  %v656_v45 = vmul.f32 0.0, %v641_v33  ;;  %v672_v1 = vmul.f32 0.0, %v636_v38 }
  0x39   : > { %1255 = vst.msk [vmem:[%s1459_s17 + $0x88] sm:$0xff] %vm454_vm0, %v883_v41  ;;  %v637_v41 = vmul.f32 %v1495_v49, %v1641_v34  ;;  %v624_v49 = vsub.f32 %v588_v11, %v620_v35  ;;  %v692_v4 = vmul.f32 %v1505_v55, %v1624_v20  ;;  %v693_v51 = vmul.f32 %v1518_v60, %v1629_v25 }
  0x3a   : > { %899 = vst.msk [vmem:[%s1672_s8] sm:$0xf] %vm898_vm1, %v896_v43  ;;  %v655_v43 = vmul.f32 0.0, %v640_v29  ;;  %v702_v53 = vmul.f32 0.0, %v688_v44  ;;  %v740_v5 = vmul.f32 %v1535_v14, %v1634_v30  ;;  %v741_v54 = vmul.f32 %v1544_v18, %v1641_v34 }
  0x3b   : > { %904 = vst.msk [vmem:[%s1672_s8] sm:$0xf0] %vm903_vm2, %v901_v0  ;;  %v689_v0 = vmul.f32 %v1518_v60, %v1641_v34  ;;  %v673_v50 = vmul.f32 0.0, %v637_v41  ;;  %v660_v55 = vadd.f32 %v656_v45, %v637_v41  ;;  %v676_v60 = vsub.f32 %v640_v29, %v672_v1 }
  0x3c   : > { %908 = vst.msk [vmem:[%s1689_s11] sm:$0xf] %vm898_vm1, %v906_v47  ;;  %v625_v47 = vsub.f32 %v589_v13, %v621_v40  ;;  %v720_v56 = vmul.f32 0.0, %v692_v4  ;;  %v721_v9 = vmul.f32 0.0, %v693_v51  ;;  %v711_v59 = vadd.f32 %v702_v53, %v692_v4 }
  0x3d   : > { %912 = vst.msk [vmem:[%s1689_s11] sm:$0xf0] %vm903_vm2, %v910_v6  ;;  %v659_v6 = vadd.f32 %v655_v43, %v636_v38  ;;  %v677_v58 = vsub.f32 %v641_v33, %v673_v50  ;;  %v754_v61 = vmul.f32 0.0, %v740_v5  ;;  %v755_v63 = vmul.f32 0.0, %v741_v54 }
  0x3e   : > { %457 = vst.msk [vmem:[%s1434_s24 + $0x90] sm:$0xff] %vm454_vm0, %v452_v2  ;;  %v703_v2 = vmul.f32 0.0, %v689_v0  ;;  %v793_v7 = vmul.f32 %v1571_v36, %v1641_v34  ;;  %v796_v10 = vmul.f32 %v1562_v32, %v1624_v20  ;;  %v729_v11 = vsub.f32 %v721_v9, %v689_v0 }
  0x3f   : > { %458 = vst.msk [vmem:[%s1434_s24 + $0x98] sm:$0xff] %vm454_vm0, %v453_v57  ;;  %v744_v57 = vmul.f32 %v1535_v14, %v1624_v20  ;;  %v797_v12 = vmul.f32 %v1571_v36, %v1629_v25  ;;  %v844_v15 = vmul.f32 %v1588_v46, %v1634_v30  ;;  %v848_v21 = vmul.f32 %v1588_v46, %v1624_v20 }
  0x40   : > { %473 = vst.msk [vmem:[%s1459_s17 + $0x90] sm:$0xff] %vm454_vm0, %v469_v3  ;;  %v745_v3 = vmul.f32 %v1544_v18, %v1629_v25  ;;  %v712_v14 = vadd.f32 %v703_v2, %v693_v51  ;;  %v728_v18 = vsub.f32 %v720_v56, %v688_v44  ;;  %v807_v16 = vmul.f32 0.0, %v793_v7 }
  0x41   : > { %474 = vst.msk [vmem:[%s1459_s17 + $0x98] sm:$0xff] %vm454_vm0, %v470_v62  ;;  %v792_v62 = vmul.f32 %v1562_v32, %v1634_v30  ;;  %v763_v13 = vadd.f32 %v754_v61, %v744_v57  ;;  %v824_v19 = vmul.f32 0.0, %v796_v10  ;;  %v825_v26 = vmul.f32 0.0, %v797_v12 }
  0x42   : > { %1182 = vst.msk [vmem:[%s1434_s24 + $0xa0] sm:$0xff] %vm454_vm0, %v503_v8  ;;  %v772_v8 = vmul.f32 0.0, %v744_v57  ;;  %v764_v32 = vadd.f32 %v755_v63, %v745_v3  ;;  %v849_v29 = vmul.f32 %v1597_v52, %v1629_v25  ;;  %v858_v31 = vmul.f32 0.0, %v844_v15 }
  0x43   : > { %1183 = vst.msk [vmem:[%s1434_s24 + $0xa8] sm:$0xff] %vm454_vm0, %v504_v22  ;;  %v773_v22 = vmul.f32 0.0, %v745_v3  ;;  %v816_v33 = vadd.f32 %v807_v16, %v797_v12  ;;  %v876_v35 = vmul.f32 0.0, %v848_v21  ;;  %v897_v43 = vmul.f32 %v1648_v37, %v1634_v30 }
  0x44   : > { %1186 = vst.msk [vmem:[%s1459_s17 + $0xa0] sm:$0xff] %vm454_vm0, %v520_v23  ;;  %v806_v23 = vmul.f32 0.0, %v792_v62  ;;  %v780_v36 = vsub.f32 %v772_v8, %v740_v5  ;;  %v877_v38 = vmul.f32 0.0, %v849_v29  ;;  %v902_v44 = vmul.f32 %v1648_v37, %v1641_v34 }
  0x45   : > { %1187 = vst.msk [vmem:[%s1459_s17 + $0xa8] sm:$0xff] %vm454_vm0, %v521_v17  ;;  %v845_v17 = vmul.f32 %v1597_v52, %v1641_v34  ;;  %v833_v52 = vsub.f32 %v825_v26, %v793_v7  ;;  %v884_v41 = vsub.f32 %v876_v35, %v844_v15  ;;  %v911_v45 = vmul.f32 %v1648_v37, %v1629_v25 }
  0x46   : > { %1192 = vst.msk [vmem:[%s1434_s24 + $0xb0] sm:$0xff] %vm454_vm0, %v555_v24  ;;  %v781_v24 = vsub.f32 %v773_v22, %v741_v54 }
  0x47   : > { %1193 = vst.msk [vmem:[%s1434_s24 + $0xb8] sm:$0xff] %vm454_vm0, %v556_v27  ;;  %v815_v27 = vadd.f32 %v806_v23, %v796_v10  ;;  %v859_v46 = vmul.f32 0.0, %v845_v17 }
  0x48   : > { %1196 = vst.msk [vmem:[%s1459_s17 + $0xb0] sm:$0xff] %vm454_vm0, %v572_v28  ;;  %v832_v28 = vsub.f32 %v824_v19, %v792_v62 }
  0x49   : > { %1197 = vst.msk [vmem:[%s1459_s17 + $0xb8] sm:$0xff] %vm454_vm0, %v573_v39  ;;  %v867_v39 = vadd.f32 %v858_v31, %v848_v21  ;;  %v868_v40 = vadd.f32 %v859_v46, %v849_v29 }
  0x4a   : > { %1202 = vst.msk [vmem:[%s1434_s24 + $0xc0] sm:$0xff] %vm454_vm0, %v607_v42  ;;  %v885_v42 = vsub.f32 %v877_v38, %v845_v17 }
  0x4b   : > { %1203 = vst.msk [vmem:[%s1434_s24 + $0xc8] sm:$0xff] %vm454_vm0, %v608_v48  ;;  %v907_v48 = vmul.f32 %v1648_v37, %v1624_v20 }
  0x4c   : > { %1206 = vst.msk [vmem:[%s1459_s17 + $0xc0] sm:$0xff] %vm454_vm0, %v624_v49 }
  0x4d   : > { %1207 = vst.msk [vmem:[%s1459_s17 + $0xc8] sm:$0xff] %vm454_vm0, %v625_v47 }
  0x4e   : > { %1212 = vst.msk [vmem:[%s1434_s24 + $0xd0] sm:$0xff] %vm454_vm0, %v659_v6 }
  0x4f   : > { %1213 = vst.msk [vmem:[%s1434_s24 + $0xd8] sm:$0xff] %vm454_vm0, %v660_v55 }
  0x50   : > { %1216 = vst.msk [vmem:[%s1459_s17 + $0xd0] sm:$0xff] %vm454_vm0, %v676_v60 }
  0x51   : > { %1217 = vst.msk [vmem:[%s1459_s17 + $0xd8] sm:$0xff] %vm454_vm0, %v677_v58 }
  0x52   : > { %1222 = vst.msk [vmem:[%s1434_s24 + $0xe0] sm:$0xff] %vm454_vm0, %v711_v59 }
  0x53   : > { %1223 = vst.msk [vmem:[%s1434_s24 + $0xe8] sm:$0xff] %vm454_vm0, %v712_v14 }
  0x54   : > { %1226 = vst.msk [vmem:[%s1459_s17 + $0xe0] sm:$0xff] %vm454_vm0, %v728_v18 }
  0x55   : > { %1227 = vst.msk [vmem:[%s1459_s17 + $0xe8] sm:$0xff] %vm454_vm0, %v729_v11 }
  0x56   : > { %1232 = vst.msk [vmem:[%s1434_s24 + $0xf0] sm:$0xff] %vm454_vm0, %v763_v13 }
  0x57   : > { %1233 = vst.msk [vmem:[%s1434_s24 + $0xf8] sm:$0xff] %vm454_vm0, %v764_v32 }
  0x58   : > { %1236 = vst.msk [vmem:[%s1459_s17 + $0xf0] sm:$0xff] %vm454_vm0, %v780_v36 }
  0x59   : > { %1237 = vst.msk [vmem:[%s1459_s17 + $0xf8] sm:$0xff] %vm454_vm0, %v781_v24 }
  0x5a   : > { %1242 = vst.msk [vmem:[%s1434_s24 + $0x100] sm:$0xff] %vm454_vm0, %v815_v27 }
  0x5b   : > { %1243 = vst.msk [vmem:[%s1434_s24 + $0x108] sm:$0xff] %vm454_vm0, %v816_v33 }
  0x5c   : > { %1246 = vst.msk [vmem:[%s1459_s17 + $0x100] sm:$0xff] %vm454_vm0, %v832_v28 }
  0x5d   : > { %1247 = vst.msk [vmem:[%s1459_s17 + $0x108] sm:$0xff] %vm454_vm0, %v833_v52 }
  0x5e   : > { %1252 = vst.msk [vmem:[%s1434_s24 + $0x110] sm:$0xff] %vm454_vm0, %v867_v39 }
  0x5f   : > { %1253 = vst.msk [vmem:[%s1434_s24 + $0x118] sm:$0xff] %vm454_vm0, %v868_v40 }
  0x60   : > { %1256 = vst.msk [vmem:[%s1459_s17 + $0x110] sm:$0xff] %vm454_vm0, %v884_v41 }
  0x61   : > { %1257 = vst.msk [vmem:[%s1459_s17 + $0x118] sm:$0xff] %vm454_vm0, %v885_v42 }
  0x62   : > { %900 = vst.msk [vmem:[%s1672_s8 + $0x8] sm:$0xf] %vm898_vm1, %v897_v43 }
  0x63   : > { %905 = vst.msk [vmem:[%s1672_s8 + $0x8] sm:$0xf0] %vm903_vm2, %v902_v44 }
  0x64   : > { %909 = vst.msk [vmem:[%s1689_s11 + $0x8] sm:$0xf] %vm898_vm1, %v907_v48 }
  0x65   : > { %913 = vst.msk [vmem:[%s1689_s11 + $0x8] sm:$0xf0] %vm903_vm2, %v911_v45 }
  0x66 PF: > { %s18_s26 = sadd.s32 1, %s1309_s26   ;;  %s1864_s24 = smov %s1305_s25 }
  0x67   : > { %p15_p5 = scmp.ge.s32.totalorder %s18_s26, 6   ;;  %s1865_s25 = smov %s1867_s27 }
  0x69   :  { %17 = sbr.rel (!%p15_p5) target bundleno = 2 (0x2), region = 136 }

// kernel: reverse.0
= control target key start
LH: loop header
LB: loop body
LE: loop exit
PB: predicated region body
PF: predicated region fallthrough
CT: control target
= control target key end

     0   :  { %s2454_s0 = inlined_call_operand.vmem [shape: f32[8,9,16,7], index: 0, kind: input, shape index: {}]   ;;  %s2455_s1 = inlined_call_operand.vmem [shape: f32[8,9,16,7], index: 1, kind: output, shape index: {}]  }
   0x1   :  { %v173_v0 = vld [vmem:[%s2454_s0] sm:$0xff]  ;;  %v175_v1 = vld [vmem:[%s2454_s0 + $0x8] sm:$0xff]  ;;  %v177_v2 = vld [vmem:[%s2454_s0 + $0x10] sm:$0xff] }
   0x2   :  { %174 = vst [vmem:[#allocation0 + $0x8] sm:$0xff] %v173_v0  ;;  %v179_v3 = vld [vmem:[%s2454_s0 + $0x18] sm:$0xff]  ;;  %v181_v4 = vld [vmem:[%s2454_s0 + $0x20] sm:$0xff]  ;;  %v183_v5 = vld [vmem:[%s2454_s0 + $0x28] sm:$0xff] }
   0x3   :  { %176 = vst [vmem:[#allocation0 + $0x18] sm:$0xff] %v175_v1  ;;  %v185_v6 = vld [vmem:[%s2454_s0 + $0x30] sm:$0xff]  ;;  %v187_v7 = vld [vmem:[%s2454_s0 + $0x38] sm:$0xff]  ;;  %v189_v8 = vld [vmem:[%s2454_s0 + $0x40] sm:$0xff] }
   0x4   :  { %178 = vst [vmem:[#allocation0 + $0x28] sm:$0xff] %v177_v2  ;;  %v191_v9 = vld [vmem:[%s2454_s0 + $0x48] sm:$0xff]  ;;  %v193_v10 = vld [vmem:[%s2454_s0 + $0x50] sm:$0xff]  ;;  %v195_v11 = vld [vmem:[%s2454_s0 + $0x58] sm:$0xff]  ;;  %v328_v2 = vlaneseq }
   0x5   :  { %180 = vst [vmem:[#allocation0 + $0x38] sm:$0xff] %v179_v3  ;;  %v197_v12 = vld [vmem:[%s2454_s0 + $0x60] sm:$0xff]  ;;  %v199_v13 = vld [vmem:[%s2454_s0 + $0x68] sm:$0xff]  ;;  %v201_v14 = vld [vmem:[%s2454_s0 + $0x70] sm:$0xff] }
   0x6   :  { %182 = vst [vmem:[#allocation0 + $0x48] sm:$0xff] %v181_v4  ;;  %v203_v15 = vld [vmem:[%s2454_s0 + $0x78] sm:$0xff]  ;;  %v205_v16 = vld [vmem:[%s2454_s0 + $0x80] sm:$0xff]  ;;  %v207_v17 = vld [vmem:[%s2454_s0 + $0x88] sm:$0xff] }
   0x7   :  { %184 = vst [vmem:[#allocation0 + $0x58] sm:$0xff] %v183_v5  ;;  %v209_v18 = vld [vmem:[%s2454_s0 + $0x90] sm:$0xff]  ;;  %v211_v19 = vld [vmem:[%s2454_s0 + $0x98] sm:$0xff]  ;;  %v213_v20 = vld [vmem:[%s2454_s0 + $0xa0] sm:$0xff] }
   0x8   :  { %186 = vst [vmem:[#allocation0 + $0x68] sm:$0xff] %v185_v6  ;;  %v215_v21 = vld [vmem:[%s2454_s0 + $0xa8] sm:$0xff]  ;;  %v217_v22 = vld [vmem:[%s2454_s0 + $0xb0] sm:$0xff]  ;;  %v219_v23 = vld [vmem:[%s2454_s0 + $0xb8] sm:$0xff] }
   0x9   :  { %188 = vst [vmem:[#allocation0 + $0x78] sm:$0xff] %v187_v7  ;;  %v221_v24 = vld [vmem:[%s2454_s0 + $0xc0] sm:$0xff]  ;;  %v223_v25 = vld [vmem:[%s2454_s0 + $0xc8] sm:$0xff]  ;;  %v225_v26 = vld [vmem:[%s2454_s0 + $0xd0] sm:$0xff] }
   0xa   :  { %190 = vst [vmem:[#allocation0 + $0x88] sm:$0xff] %v189_v8  ;;  %v227_v27 = vld [vmem:[%s2454_s0 + $0xd8] sm:$0xff]  ;;  %v229_v28 = vld [vmem:[%s2454_s0 + $0xe0] sm:$0xff]  ;;  %v231_v29 = vld [vmem:[%s2454_s0 + $0xe8] sm:$0xff] }
   0xb   :  { %192 = vst [vmem:[#allocation0 + $0x98] sm:$0xff] %v191_v9  ;;  %v233_v30 = vld [vmem:[%s2454_s0 + $0xf0] sm:$0xff]  ;;  %v235_v31 = vld [vmem:[%s2454_s0 + $0xf8] sm:$0xff]  ;;  %v237_v32 = vld [vmem:[%s2454_s0 + $0x100] sm:$0xff]  ;;  %v2085_v9 = vshrl.u32 %v328_v2, 7 }
   0xc   :  { %194 = vst [vmem:[#allocation0 + $0xa8] sm:$0xff] %v193_v10  ;;  %v239_v33 = vld [vmem:[%s2454_s0 + $0x108] sm:$0xff]  ;;  %v241_v34 = vld [vmem:[%s2454_s0 + $0x110] sm:$0xff]  ;;  %v243_v35 = vld [vmem:[%s2454_s0 + $0x118] sm:$0xff] }
   0xd   :  { %196 = vst [vmem:[#allocation0 + $0xb8] sm:$0xff] %v195_v11  ;;  %v245_v36 = vld [vmem:[%s2454_s0 + $0x120] sm:$0xff]  ;;  %v247_v37 = vld [vmem:[%s2454_s0 + $0x128] sm:$0xff]  ;;  %v249_v38 = vld [vmem:[%s2454_s0 + $0x130] sm:$0xff]  ;;  %vm330_vm0 = vcmp.lt.s32.totalorder %v2085_v9, 7 }
   0xe   :  { %198 = vst [vmem:[#allocation0 + $0xc8] sm:$0xff] %v197_v12  ;;  %v251_v39 = vld [vmem:[%s2454_s0 + $0x138] sm:$0xff]  ;;  %v253_v40 = vld [vmem:[%s2454_s0 + $0x140] sm:$0xff]  ;;  %v255_v41 = vld [vmem:[%s2454_s0 + $0x148] sm:$0xff] }
   0xf   :  { %200 = vst [vmem:[#allocation0 + $0xd8] sm:$0xff] %v199_v13  ;;  %v257_v42 = vld [vmem:[%s2454_s0 + $0x150] sm:$0xff]  ;;  %v259_v43 = vld [vmem:[%s2454_s0 + $0x158] sm:$0xff]  ;;  %v261_v44 = vld [vmem:[%s2454_s0 + $0x160] sm:$0xff] }
  0x10   :  { %202 = vst [vmem:[#allocation0 + $0xe8] sm:$0xff] %v201_v14  ;;  %v263_v45 = vld [vmem:[%s2454_s0 + $0x168] sm:$0xff]  ;;  %v265_v46 = vld [vmem:[%s2454_s0 + $0x170] sm:$0xff]  ;;  %v267_v47 = vld [vmem:[%s2454_s0 + $0x178] sm:$0xff] }
  0x11   :  { %204 = vst [vmem:[#allocation0 + $0xf8] sm:$0xff] %v203_v15  ;;  %v269_v48 = vld [vmem:[%s2454_s0 + $0x180] sm:$0xff]  ;;  %v271_v49 = vld [vmem:[%s2454_s0 + $0x188] sm:$0xff]  ;;  %v273_v50 = vld [vmem:[%s2454_s0 + $0x190] sm:$0xff] }
  0x12   :  { %206 = vst [vmem:[#allocation0 + $0x108] sm:$0xff] %v205_v16  ;;  %v275_v51 = vld [vmem:[%s2454_s0 + $0x198] sm:$0xff]  ;;  %v277_v52 = vld [vmem:[%s2454_s0 + $0x1a0] sm:$0xff]  ;;  %v279_v53 = vld [vmem:[%s2454_s0 + $0x1a8] sm:$0xff] }
  0x13   :  { %208 = vst [vmem:[#allocation0 + $0x118] sm:$0xff] %v207_v17  ;;  %v281_v54 = vld [vmem:[%s2454_s0 + $0x1b0] sm:$0xff]  ;;  %v283_v55 = vld [vmem:[%s2454_s0 + $0x1b8] sm:$0xff]  ;;  %v285_v56 = vld [vmem:[%s2454_s0 + $0x1c0] sm:$0xff] }
  0x14   :  { %210 = vst [vmem:[#allocation0 + $0x128] sm:$0xff] %v209_v18  ;;  %v287_v57 = vld [vmem:[%s2454_s0 + $0x1c8] sm:$0xff]  ;;  %v289_v58 = vld [vmem:[%s2454_s0 + $0x1d0] sm:$0xff]  ;;  %v291_v59 = vld [vmem:[%s2454_s0 + $0x1d8] sm:$0xff] }
  0x15   :  { %212 = vst [vmem:[#allocation0 + $0x138] sm:$0xff] %v211_v19  ;;  %v293_v60 = vld [vmem:[%s2454_s0 + $0x1e0] sm:$0xff]  ;;  %v295_v61 = vld [vmem:[%s2454_s0 + $0x1e8] sm:$0xff]  ;;  %v297_v62 = vld [vmem:[%s2454_s0 + $0x1f0] sm:$0xff] }
  0x16   :  { %214 = vst [vmem:[#allocation0 + $0x148] sm:$0xff] %v213_v20  ;;  %v299_v63 = vld [vmem:[%s2454_s0 + $0x1f8] sm:$0xff]  ;;  %v301_v0 = vld [vmem:[%s2454_s0 + $0x200] sm:$0xff]  ;;  %v303_v1 = vld [vmem:[%s2454_s0 + $0x208] sm:$0xff] }
  0x17   :  { %216 = vst [vmem:[#allocation0 + $0x158] sm:$0xff] %v215_v21  ;;  %v305_v3 = vld [vmem:[%s2454_s0 + $0x210] sm:$0xff]  ;;  %v307_v4 = vld [vmem:[%s2454_s0 + $0x218] sm:$0xff]  ;;  %v309_v5 = vld [vmem:[%s2454_s0 + $0x220] sm:$0xff] }
  0x18   :  { %218 = vst [vmem:[#allocation0 + $0x168] sm:$0xff] %v217_v22  ;;  %v321_v6 = vld [vmem:[#allocation0 + $0x7] ss:$-1 sm:$0xff]  ;;  %v311_v7 = vld [vmem:[%s2454_s0 + $0x228] sm:$0xff]  ;;  %v313_v10 = vld [vmem:[%s2454_s0 + $0x230] sm:$0xff] }
  0x19   :  { %220 = vst [vmem:[#allocation0 + $0x178] sm:$0xff] %v219_v23  ;;  %v326_v8 = vld [vmem:[#allocation0 + $0xf] ss:$-1 sm:$0xff]  ;;  %v335_v11 = vld [vmem:[#allocation0 + $0x17] ss:$-1 sm:$0xff]  ;;  %v315_v12 = vld [vmem:[%s2454_s0 + $0x238] sm:$0xff] }
  0x1a   :  { %222 = vst [vmem:[#allocation0 + $0x188] sm:$0xff] %v221_v24  ;;  %v322_v13 = vrot.slane %v321_v6, 1  ;;  %v340_v14 = vld [vmem:[#allocation0 + $0x1f] ss:$-1 sm:$0xff]  ;;  %v327_v15 = vrot.slane %v326_v8, 1  ;;  %v336_v17 = vrot.slane %v335_v11, 1 }
  0x1b   :  { %224 = vst [vmem:[#allocation0 + $0x198] sm:$0xff] %v223_v25  ;;  %v349_v16 = vld [vmem:[#allocation0 + $0x27] ss:$-1 sm:$0xff]  ;;  %v354_v18 = vld [vmem:[#allocation0 + $0x2f] ss:$-1 sm:$0xff]  ;;  %v341_v19 = vrot.slane %v340_v14, 1 }
  0x1c   :  { %226 = vst [vmem:[#allocation0 + $0x1a8] sm:$0xff] %v225_v26  ;;  %v363_v20 = vld [vmem:[#allocation0 + $0x37] ss:$-1 sm:$0xff]  ;;  %v350_v21 = vrot.slane %v349_v16, 1  ;;  %v368_v22 = vld [vmem:[#allocation0 + $0x3f] ss:$-1 sm:$0xff] }
  0x1d   :  { %228 = vst [vmem:[#allocation0 + $0x1b8] sm:$0xff] %v227_v27  ;;  %v355_v23 = vrot.slane %v354_v18, 1  ;;  %v377_v24 = vld [vmem:[#allocation0 + $0x47] ss:$-1 sm:$0xff]  ;;  %v364_v25 = vrot.slane %v363_v20, 1  ;;  %v369_v27 = vrot.slane %v368_v22, 1 }
  0x1e   :  { %230 = vst [vmem:[#allocation0 + $0x1c8] sm:$0xff] %v229_v28  ;;  %v382_v26 = vld [vmem:[#allocation0 + $0x4f] ss:$-1 sm:$0xff]  ;;  %v391_v28 = vld [vmem:[#allocation0 + $0x57] ss:$-1 sm:$0xff] }
  0x1f   :  { %232 = vst [vmem:[#allocation0 + $0x1d8] sm:$0xff] %v231_v29  ;;  %v378_v29 = vrot.slane %v377_v24, 1  ;;  %v522_v2 = vld [vmem:[#allocation0 + $0xef] ss:$-1 sm:$0xff]  ;;  %v536_v6 = vld [vmem:[#allocation0 + $0xff] ss:$-1 sm:$0xff] }
  0x20   :  { %234 = vst [vmem:[#allocation0 + $0x1e8] sm:$0xff] %v233_v30  ;;  %v396_v30 = vld [vmem:[#allocation0 + $0x5f] ss:$-1 sm:$0xff]  ;;  %v545_v8 = vld [vmem:[#allocation0 + $0x107] ss:$-1 sm:$0xff] }
  0x21   :  { %236 = vst [vmem:[#allocation0 + $0x1f8] sm:$0xff] %v235_v31  ;;  %v383_v31 = vrot.slane %v382_v26, 1  ;;  %v550_v11 = vld [vmem:[#allocation0 + $0x10f] ss:$-1 sm:$0xff]  ;;  %v546_v14 = vrot.slane %v545_v8, 1 }
  0x22   :  { %238 = vst [vmem:[#allocation0 + $0x208] sm:$0xff] %v237_v32  ;;  %v405_v32 = vld [vmem:[#allocation0 + $0x67] ss:$-1 sm:$0xff]  ;;  %v551_v16 = vrot.slane %v550_v11, 1 }
  0x23   :  { %240 = vst [vmem:[#allocation0 + $0x218] sm:$0xff] %v239_v33  ;;  %v392_v33 = vrot.slane %v391_v28, 1 }
  0x24   :  { %242 = vst [vmem:[#allocation0 + $0x228] sm:$0xff] %v241_v34  ;;  %v410_v34 = vld [vmem:[#allocation0 + $0x6f] ss:$-1 sm:$0xff] }
  0x25   :  { %244 = vst [vmem:[#allocation0 + $0x238] sm:$0xff] %v243_v35  ;;  %v397_v35 = vrot.slane %v396_v30, 1 }
  0x26   :  { %246 = vst [vmem:[#allocation0 + $0x248] sm:$0xff] %v245_v36  ;;  %v419_v36 = vld [vmem:[#allocation0 + $0x77] ss:$-1 sm:$0xff] }
  0x27   :  { %248 = vst [vmem:[#allocation0 + $0x258] sm:$0xff] %v247_v37  ;;  %v406_v37 = vrot.slane %v405_v32, 1 }
  0x28   :  { %250 = vst [vmem:[#allocation0 + $0x268] sm:$0xff] %v249_v38  ;;  %v424_v38 = vld [vmem:[#allocation0 + $0x7f] ss:$-1 sm:$0xff] }
  0x29   :  { %252 = vst [vmem:[#allocation0 + $0x278] sm:$0xff] %v251_v39  ;;  %v411_v39 = vrot.slane %v410_v34, 1 }
  0x2a   :  { %254 = vst [vmem:[#allocation0 + $0x288] sm:$0xff] %v253_v40  ;;  %v433_v40 = vld [vmem:[#allocation0 + $0x87] ss:$-1 sm:$0xff] }
  0x2b   :  { %256 = vst [vmem:[#allocation0 + $0x298] sm:$0xff] %v255_v41  ;;  %v420_v41 = vrot.slane %v419_v36, 1 }
  0x2c   :  { %258 = vst [vmem:[#allocation0 + $0x2a8] sm:$0xff] %v257_v42  ;;  %v438_v42 = vld [vmem:[#allocation0 + $0x8f] ss:$-1 sm:$0xff] }
  0x2d   :  { %260 = vst [vmem:[#allocation0 + $0x2b8] sm:$0xff] %v259_v43  ;;  %v425_v43 = vrot.slane %v424_v38, 1 }
  0x2e   :  { %262 = vst [vmem:[#allocation0 + $0x2c8] sm:$0xff] %v261_v44  ;;  %v447_v44 = vld [vmem:[#allocation0 + $0x97] ss:$-1 sm:$0xff] }
  0x2f   :  { %264 = vst [vmem:[#allocation0 + $0x2d8] sm:$0xff] %v263_v45  ;;  %v434_v45 = vrot.slane %v433_v40, 1 }
  0x30   :  { %266 = vst [vmem:[#allocation0 + $0x2e8] sm:$0xff] %v265_v46  ;;  %v452_v46 = vld [vmem:[#allocation0 + $0x9f] ss:$-1 sm:$0xff] }
  0x31   :  { %268 = vst [vmem:[#allocation0 + $0x2f8] sm:$0xff] %v267_v47  ;;  %v439_v47 = vrot.slane %v438_v42, 1 }
  0x32   :  { %270 = vst [vmem:[#allocation0 + $0x308] sm:$0xff] %v269_v48  ;;  %v461_v48 = vld [vmem:[#allocation0 + $0xa7] ss:$-1 sm:$0xff] }
  0x33   :  { %272 = vst [vmem:[#allocation0 + $0x318] sm:$0xff] %v271_v49  ;;  %v448_v49 = vrot.slane %v447_v44, 1 }
  0x34   :  { %274 = vst [vmem:[#allocation0 + $0x328] sm:$0xff] %v273_v50  ;;  %v466_v50 = vld [vmem:[#allocation0 + $0xaf] ss:$-1 sm:$0xff] }
  0x35   :  { %276 = vst [vmem:[#allocation0 + $0x338] sm:$0xff] %v275_v51  ;;  %v453_v51 = vrot.slane %v452_v46, 1 }
  0x36   :  { %278 = vst [vmem:[#allocation0 + $0x348] sm:$0xff] %v277_v52  ;;  %v475_v52 = vld [vmem:[#allocation0 + $0xb7] ss:$-1 sm:$0xff] }
  0x37   :  { %280 = vst [vmem:[#allocation0 + $0x358] sm:$0xff] %v279_v53  ;;  %v462_v53 = vrot.slane %v461_v48, 1 }
  0x38   :  { %282 = vst [vmem:[#allocation0 + $0x368] sm:$0xff] %v281_v54  ;;  %v480_v54 = vld [vmem:[#allocation0 + $0xbf] ss:$-1 sm:$0xff] }
  0x39   :  { %284 = vst [vmem:[#allocation0 + $0x378] sm:$0xff] %v283_v55  ;;  %v467_v55 = vrot.slane %v466_v50, 1 }
  0x3a   :  { %286 = vst [vmem:[#allocation0 + $0x388] sm:$0xff] %v285_v56  ;;  %v489_v56 = vld [vmem:[#allocation0 + $0xc7] ss:$-1 sm:$0xff] }
  0x3b   :  { %288 = vst [vmem:[#allocation0 + $0x398] sm:$0xff] %v287_v57  ;;  %v476_v57 = vrot.slane %v475_v52, 1 }
  0x3c   :  { %290 = vst [vmem:[#allocation0 + $0x3a8] sm:$0xff] %v289_v58  ;;  %v494_v58 = vld [vmem:[#allocation0 + $0xcf] ss:$-1 sm:$0xff] }
  0x3d   :  { %292 = vst [vmem:[#allocation0 + $0x3b8] sm:$0xff] %v291_v59  ;;  %v481_v59 = vrot.slane %v480_v54, 1 }
  0x3e   :  { %294 = vst [vmem:[#allocation0 + $0x3c8] sm:$0xff] %v293_v60  ;;  %v503_v60 = vld [vmem:[#allocation0 + $0xd7] ss:$-1 sm:$0xff] }
  0x3f   :  { %296 = vst [vmem:[#allocation0 + $0x3d8] sm:$0xff] %v295_v61  ;;  %v490_v61 = vrot.slane %v489_v56, 1 }
  0x40   :  { %298 = vst [vmem:[#allocation0 + $0x3e8] sm:$0xff] %v297_v62  ;;  %v508_v62 = vld [vmem:[#allocation0 + $0xdf] ss:$-1 sm:$0xff] }
  0x41   :  { %300 = vst [vmem:[#allocation0 + $0x3f8] sm:$0xff] %v299_v63  ;;  %v495_v63 = vrot.slane %v494_v58, 1 }
  0x42   :  { %302 = vst [vmem:[#allocation0 + $0x408] sm:$0xff] %v301_v0  ;;  %v517_v0 = vld [vmem:[#allocation0 + $0xe7] ss:$-1 sm:$0xff] }
  0x43   :  { %304 = vst [vmem:[#allocation0 + $0x418] sm:$0xff] %v303_v1  ;;  %v504_v1 = vrot.slane %v503_v60, 1 }
  0x44   :  { %306 = vst [vmem:[#allocation0 + $0x428] sm:$0xff] %v305_v3  ;;  %v509_v3 = vrot.slane %v508_v62, 1 }
  0x45   :  { %308 = vst [vmem:[#allocation0 + $0x438] sm:$0xff] %v307_v4  ;;  %v531_v4 = vld [vmem:[#allocation0 + $0xf7] ss:$-1 sm:$0xff] }
  0x46   :  { %310 = vst [vmem:[#allocation0 + $0x448] sm:$0xff] %v309_v5  ;;  %v518_v5 = vrot.slane %v517_v0, 1 }
  0x47   :  { %312 = vst [vmem:[#allocation0 + $0x458] sm:$0xff] %v311_v7  ;;  %v523_v7 = vrot.slane %v522_v2, 1 }
  0x48   :  { %314 = vst [vmem:[#allocation0 + $0x468] sm:$0xff] %v313_v10  ;;  %v532_v10 = vrot.slane %v531_v4, 1 }
  0x49   :  { %316 = vst [vmem:[#allocation0 + $0x478] sm:$0xff] %v315_v12  ;;  %v537_v12 = vrot.slane %v536_v6, 1 }
  0x4a   :  { %323 = vst [vmem:[#allocation1] sm:$0xff] %v322_v13  ;;  %v559_v13 = vld [vmem:[#allocation0 + $0x117] ss:$-1 sm:$0xff] }
  0x4b   :  { %331 = vst.msk [vmem:[#allocation1] sm:$0xff] %vm330_vm0, %v327_v15  ;;  %v564_v15 = vld [vmem:[#allocation0 + $0x11f] ss:$-1 sm:$0xff]  ;;  %v560_v18 = vrot.slane %v559_v13, 1 }
  0x4c   :  { %337 = vst [vmem:[#allocation1 + $0x8] sm:$0xff] %v336_v17  ;;  %v573_v17 = vld [vmem:[#allocation0 + $0x127] ss:$-1 sm:$0xff]  ;;  %v565_v20 = vrot.slane %v564_v15, 1 }
  0x4d   :  { %345 = vst.msk [vmem:[#allocation1 + $0x8] sm:$0xff] %vm330_vm0, %v341_v19  ;;  %v578_v19 = vld [vmem:[#allocation0 + $0x12f] ss:$-1 sm:$0xff]  ;;  %v574_v22 = vrot.slane %v573_v17, 1 }
  0x4e   :  { %351 = vst [vmem:[#allocation1 + $0x10] sm:$0xff] %v350_v21  ;;  %v587_v21 = vld [vmem:[#allocation0 + $0x137] ss:$-1 sm:$0xff]  ;;  %v579_v24 = vrot.slane %v578_v19, 1 }
  0x4f   :  { %359 = vst.msk [vmem:[#allocation1 + $0x10] sm:$0xff] %vm330_vm0, %v355_v23  ;;  %v592_v23 = vld [vmem:[#allocation0 + $0x13f] ss:$-1 sm:$0xff]  ;;  %v588_v26 = vrot.slane %v587_v21, 1 }
  0x50   :  { %365 = vst [vmem:[#allocation1 + $0x18] sm:$0xff] %v364_v25  ;;  %v601_v25 = vld [vmem:[#allocation0 + $0x147] ss:$-1 sm:$0xff]  ;;  %v593_v28 = vrot.slane %v592_v23, 1 }
  0x51   :  { %373 = vst.msk [vmem:[#allocation1 + $0x18] sm:$0xff] %vm330_vm0, %v369_v27  ;;  %v606_v27 = vld [vmem:[#allocation0 + $0x14f] ss:$-1 sm:$0xff]  ;;  %v602_v30 = vrot.slane %v601_v25, 1 }
  0x52   :  { %379 = vst [vmem:[#allocation1 + $0x20] sm:$0xff] %v378_v29  ;;  %v615_v29 = vld [vmem:[#allocation0 + $0x157] ss:$-1 sm:$0xff]  ;;  %v607_v32 = vrot.slane %v606_v27, 1 }
  0x53   :  { %387 = vst.msk [vmem:[#allocation1 + $0x20] sm:$0xff] %vm330_vm0, %v383_v31  ;;  %v620_v31 = vld [vmem:[#allocation0 + $0x15f] ss:$-1 sm:$0xff]  ;;  %v616_v34 = vrot.slane %v615_v29, 1 }
  0x54   :  { %393 = vst [vmem:[#allocation1 + $0x28] sm:$0xff] %v392_v33  ;;  %v629_v33 = vld [vmem:[#allocation0 + $0x167] ss:$-1 sm:$0xff]  ;;  %v621_v36 = vrot.slane %v620_v31, 1 }
  0x55   :  { %401 = vst.msk [vmem:[#allocation1 + $0x28] sm:$0xff] %vm330_vm0, %v397_v35  ;;  %v634_v35 = vld [vmem:[#allocation0 + $0x16f] ss:$-1 sm:$0xff]  ;;  %v630_v38 = vrot.slane %v629_v33, 1 }
  0x56   :  { %407 = vst [vmem:[#allocation1 + $0x30] sm:$0xff] %v406_v37  ;;  %v643_v37 = vld [vmem:[#allocation0 + $0x177] ss:$-1 sm:$0xff]  ;;  %v635_v40 = vrot.slane %v634_v35, 1 }
  0x57   :  { %415 = vst.msk [vmem:[#allocation1 + $0x30] sm:$0xff] %vm330_vm0, %v411_v39  ;;  %v648_v39 = vld [vmem:[#allocation0 + $0x17f] ss:$-1 sm:$0xff]  ;;  %v644_v42 = vrot.slane %v643_v37, 1  ;;  %v1500_v9 = vld [vmem:[#allocation1 + $0x10] sm:$0xff] }
  0x58   :  { %421 = vst [vmem:[#allocation1 + $0x38] sm:$0xff] %v420_v41  ;;  %v657_v41 = vld [vmem:[#allocation0 + $0x187] ss:$-1 sm:$0xff]  ;;  %v649_v44 = vrot.slane %v648_v39, 1 }
  0x59   :  { %429 = vst.msk [vmem:[#allocation1 + $0x38] sm:$0xff] %vm330_vm0, %v425_v43  ;;  %v662_v43 = vld [vmem:[#allocation0 + $0x18f] ss:$-1 sm:$0xff]  ;;  %v658_v46 = vrot.slane %v657_v41, 1 }
  0x5a   :  { %435 = vst [vmem:[#allocation1 + $0x40] sm:$0xff] %v434_v45  ;;  %v671_v45 = vld [vmem:[#allocation0 + $0x197] ss:$-1 sm:$0xff]  ;;  %v663_v48 = vrot.slane %v662_v43, 1 }
  0x5b   :  { %443 = vst.msk [vmem:[#allocation1 + $0x40] sm:$0xff] %vm330_vm0, %v439_v47  ;;  %v676_v47 = vld [vmem:[#allocation0 + $0x19f] ss:$-1 sm:$0xff]  ;;  %v672_v50 = vrot.slane %v671_v45, 1 }
  0x5c   :  { %449 = vst [vmem:[#allocation1 + $0x48] sm:$0xff] %v448_v49  ;;  %v685_v49 = vld [vmem:[#allocation0 + $0x1a7] ss:$-1 sm:$0xff]  ;;  %v677_v52 = vrot.slane %v676_v47, 1 }
  0x5d   :  { %457 = vst.msk [vmem:[#allocation1 + $0x48] sm:$0xff] %vm330_vm0, %v453_v51  ;;  %v690_v51 = vld [vmem:[#allocation0 + $0x1af] ss:$-1 sm:$0xff]  ;;  %v686_v54 = vrot.slane %v685_v49, 1 }
  0x5e   :  { %463 = vst [vmem:[#allocation1 + $0x50] sm:$0xff] %v462_v53  ;;  %v699_v53 = vld [vmem:[#allocation0 + $0x1b7] ss:$-1 sm:$0xff]  ;;  %v691_v56 = vrot.slane %v690_v51, 1 }
  0x5f   :  { %471 = vst.msk [vmem:[#allocation1 + $0x50] sm:$0xff] %vm330_vm0, %v467_v55  ;;  %v704_v55 = vld [vmem:[#allocation0 + $0x1bf] ss:$-1 sm:$0xff]  ;;  %v700_v58 = vrot.slane %v699_v53, 1 }
  0x60   :  { %477 = vst [vmem:[#allocation1 + $0x58] sm:$0xff] %v476_v57  ;;  %v713_v57 = vld [vmem:[#allocation0 + $0x1c7] ss:$-1 sm:$0xff]  ;;  %v705_v60 = vrot.slane %v704_v55, 1 }
  0x61   :  { %485 = vst.msk [vmem:[#allocation1 + $0x58] sm:$0xff] %vm330_vm0, %v481_v59  ;;  %v718_v59 = vld [vmem:[#allocation0 + $0x1cf] ss:$-1 sm:$0xff]  ;;  %v714_v62 = vrot.slane %v713_v57, 1 }
  0x62   :  { %491 = vst [vmem:[#allocation1 + $0x60] sm:$0xff] %v490_v61  ;;  %v727_v61 = vld [vmem:[#allocation0 + $0x1d7] ss:$-1 sm:$0xff]  ;;  %v719_v0 = vrot.slane %v718_v59, 1 }
  0x63   :  { %499 = vst.msk [vmem:[#allocation1 + $0x60] sm:$0xff] %vm330_vm0, %v495_v63  ;;  %v732_v63 = vld [vmem:[#allocation0 + $0x1df] ss:$-1 sm:$0xff]  ;;  %v728_v2 = vrot.slane %v727_v61, 1 }
  0x64   :  { %505 = vst [vmem:[#allocation1 + $0x68] sm:$0xff] %v504_v1  ;;  %v741_v1 = vld [vmem:[#allocation0 + $0x1e7] ss:$-1 sm:$0xff]  ;;  %v733_v4 = vrot.slane %v732_v63, 1 }
  0x65   :  { %513 = vst.msk [vmem:[#allocation1 + $0x68] sm:$0xff] %vm330_vm0, %v509_v3  ;;  %v746_v3 = vld [vmem:[#allocation0 + $0x1ef] ss:$-1 sm:$0xff]  ;;  %v742_v6 = vrot.slane %v741_v1, 1 }
  0x66   :  { %519 = vst [vmem:[#allocation1 + $0x70] sm:$0xff] %v518_v5  ;;  %v755_v5 = vld [vmem:[#allocation0 + $0x1f7] ss:$-1 sm:$0xff]  ;;  %v747_v8 = vrot.slane %v746_v3, 1 }
  0x67   :  { %527 = vst.msk [vmem:[#allocation1 + $0x70] sm:$0xff] %vm330_vm0, %v523_v7  ;;  %v760_v7 = vld [vmem:[#allocation0 + $0x1ff] ss:$-1 sm:$0xff]  ;;  %v756_v11 = vrot.slane %v755_v5, 1 }
  0x68   :  { %533 = vst [vmem:[#allocation1 + $0x78] sm:$0xff] %v532_v10  ;;  %v769_v10 = vld [vmem:[#allocation0 + $0x207] ss:$-1 sm:$0xff]  ;;  %v761_v13 = vrot.slane %v760_v7, 1 }
  0x69   :  { %541 = vst.msk [vmem:[#allocation1 + $0x78] sm:$0xff] %vm330_vm0, %v537_v12  ;;  %v774_v12 = vld [vmem:[#allocation0 + $0x20f] ss:$-1 sm:$0xff]  ;;  %v770_v15 = vrot.slane %v769_v10, 1 }
  0x6a   :  { %547 = vst [vmem:[#allocation1 + $0x80] sm:$0xff] %v546_v14  ;;  %v783_v14 = vld [vmem:[#allocation0 + $0x217] ss:$-1 sm:$0xff]  ;;  %v775_v17 = vrot.slane %v774_v12, 1 }
  0x6b   :  { %555 = vst.msk [vmem:[#allocation1 + $0x80] sm:$0xff] %vm330_vm0, %v551_v16  ;;  %v788_v16 = vld [vmem:[#allocation0 + $0x21f] ss:$-1 sm:$0xff]  ;;  %v784_v19 = vrot.slane %v783_v14, 1 }
  0x6c   :  { %561 = vst [vmem:[#allocation1 + $0x88] sm:$0xff] %v560_v18  ;;  %v797_v18 = vld [vmem:[#allocation0 + $0x227] ss:$-1 sm:$0xff]  ;;  %v789_v21 = vrot.slane %v788_v16, 1 }
  0x6d   :  { %569 = vst.msk [vmem:[#allocation1 + $0x88] sm:$0xff] %vm330_vm0, %v565_v20  ;;  %v802_v20 = vld [vmem:[#allocation0 + $0x22f] ss:$-1 sm:$0xff]  ;;  %v798_v23 = vrot.slane %v797_v18, 1 }
  0x6e   :  { %575 = vst [vmem:[#allocation1 + $0x90] sm:$0xff] %v574_v22  ;;  %v811_v22 = vld [vmem:[#allocation0 + $0x237] ss:$-1 sm:$0xff]  ;;  %v803_v25 = vrot.slane %v802_v20, 1 }
  0x6f   :  { %583 = vst.msk [vmem:[#allocation1 + $0x90] sm:$0xff] %vm330_vm0, %v579_v24  ;;  %v816_v24 = vld [vmem:[#allocation0 + $0x23f] ss:$-1 sm:$0xff]  ;;  %v812_v27 = vrot.slane %v811_v22, 1 }
  0x70   :  { %589 = vst [vmem:[#allocation1 + $0x98] sm:$0xff] %v588_v26  ;;  %v825_v26 = vld [vmem:[#allocation0 + $0x247] ss:$-1 sm:$0xff]  ;;  %v817_v29 = vrot.slane %v816_v24, 1 }
  0x71   :  { %597 = vst.msk [vmem:[#allocation1 + $0x98] sm:$0xff] %vm330_vm0, %v593_v28  ;;  %v830_v28 = vld [vmem:[#allocation0 + $0x24f] ss:$-1 sm:$0xff]  ;;  %v826_v31 = vrot.slane %v825_v26, 1 }
  0x72   :  { %603 = vst [vmem:[#allocation1 + $0xa0] sm:$0xff] %v602_v30  ;;  %v839_v30 = vld [vmem:[#allocation0 + $0x257] ss:$-1 sm:$0xff]  ;;  %v831_v33 = vrot.slane %v830_v28, 1 }
  0x73   :  { %611 = vst.msk [vmem:[#allocation1 + $0xa0] sm:$0xff] %vm330_vm0, %v607_v32  ;;  %v844_v32 = vld [vmem:[#allocation0 + $0x25f] ss:$-1 sm:$0xff]  ;;  %v840_v35 = vrot.slane %v839_v30, 1 }
  0x74   :  { %617 = vst [vmem:[#allocation1 + $0xa8] sm:$0xff] %v616_v34  ;;  %v853_v34 = vld [vmem:[#allocation0 + $0x267] ss:$-1 sm:$0xff]  ;;  %v845_v37 = vrot.slane %v844_v32, 1 }
  0x75   :  { %625 = vst.msk [vmem:[#allocation1 + $0xa8] sm:$0xff] %vm330_vm0, %v621_v36  ;;  %v858_v36 = vld [vmem:[#allocation0 + $0x26f] ss:$-1 sm:$0xff]  ;;  %v854_v39 = vrot.slane %v853_v34, 1 }
  0x76   :  { %631 = vst [vmem:[#allocation1 + $0xb0] sm:$0xff] %v630_v38  ;;  %v867_v38 = vld [vmem:[#allocation0 + $0x277] ss:$-1 sm:$0xff]  ;;  %v859_v41 = vrot.slane %v858_v36, 1 }
  0x77   :  { %639 = vst.msk [vmem:[#allocation1 + $0xb0] sm:$0xff] %vm330_vm0, %v635_v40  ;;  %v872_v40 = vld [vmem:[#allocation0 + $0x27f] ss:$-1 sm:$0xff]  ;;  %v868_v43 = vrot.slane %v867_v38, 1 }
  0x78   :  { %645 = vst [vmem:[#allocation1 + $0xb8] sm:$0xff] %v644_v42  ;;  %v881_v42 = vld [vmem:[#allocation0 + $0x287] ss:$-1 sm:$0xff]  ;;  %v873_v45 = vrot.slane %v872_v40, 1 }
  0x79   :  { %653 = vst.msk [vmem:[#allocation1 + $0xb8] sm:$0xff] %vm330_vm0, %v649_v44  ;;  %v886_v44 = vld [vmem:[#allocation0 + $0x28f] ss:$-1 sm:$0xff]  ;;  %v882_v47 = vrot.slane %v881_v42, 1 }
  0x7a   :  { %659 = vst [vmem:[#allocation1 + $0xc0] sm:$0xff] %v658_v46  ;;  %v895_v46 = vld [vmem:[#allocation0 + $0x297] ss:$-1 sm:$0xff]  ;;  %v887_v49 = vrot.slane %v886_v44, 1 }
  0x7b   :  { %667 = vst.msk [vmem:[#allocation1 + $0xc0] sm:$0xff] %vm330_vm0, %v663_v48  ;;  %v900_v48 = vld [vmem:[#allocation0 + $0x29f] ss:$-1 sm:$0xff]  ;;  %v896_v51 = vrot.slane %v895_v46, 1 }
  0x7c   :  { %673 = vst [vmem:[#allocation1 + $0xc8] sm:$0xff] %v672_v50  ;;  %v909_v50 = vld [vmem:[#allocation0 + $0x2a7] ss:$-1 sm:$0xff]  ;;  %v901_v53 = vrot.slane %v900_v48, 1 }
  0x7d   :  { %681 = vst.msk [vmem:[#allocation1 + $0xc8] sm:$0xff] %vm330_vm0, %v677_v52  ;;  %v914_v52 = vld [vmem:[#allocation0 + $0x2af] ss:$-1 sm:$0xff]  ;;  %v910_v55 = vrot.slane %v909_v50, 1 }
  0x7e   :  { %687 = vst [vmem:[#allocation1 + $0xd0] sm:$0xff] %v686_v54  ;;  %v923_v54 = vld [vmem:[#allocation0 + $0x2b7] ss:$-1 sm:$0xff]  ;;  %v915_v57 = vrot.slane %v914_v52, 1 }
  0x7f   :  { %695 = vst.msk [vmem:[#allocation1 + $0xd0] sm:$0xff] %vm330_vm0, %v691_v56  ;;  %v928_v56 = vld [vmem:[#allocation0 + $0x2bf] ss:$-1 sm:$0xff]  ;;  %v924_v59 = vrot.slane %v923_v54, 1 }
  0x80   :  { %701 = vst [vmem:[#allocation1 + $0xd8] sm:$0xff] %v700_v58  ;;  %v937_v58 = vld [vmem:[#allocation0 + $0x2c7] ss:$-1 sm:$0xff]  ;;  %v929_v61 = vrot.slane %v928_v56, 1 }
  0x81   :  { %709 = vst.msk [vmem:[#allocation1 + $0xd8] sm:$0xff] %vm330_vm0, %v705_v60  ;;  %v942_v60 = vld [vmem:[#allocation0 + $0x2cf] ss:$-1 sm:$0xff]  ;;  %v938_v63 = vrot.slane %v937_v58, 1 }
  0x82   :  { %715 = vst [vmem:[#allocation1 + $0xe0] sm:$0xff] %v714_v62  ;;  %v951_v62 = vld [vmem:[#allocation0 + $0x2d7] ss:$-1 sm:$0xff]  ;;  %v943_v1 = vrot.slane %v942_v60, 1 }
  0x83   :  { %723 = vst.msk [vmem:[#allocation1 + $0xe0] sm:$0xff] %vm330_vm0, %v719_v0  ;;  %v956_v0 = vld [vmem:[#allocation0 + $0x2df] ss:$-1 sm:$0xff]  ;;  %v952_v3 = vrot.slane %v951_v62, 1 }
  0x84   :  { %729 = vst [vmem:[#allocation1 + $0xe8] sm:$0xff] %v728_v2  ;;  %v965_v2 = vld [vmem:[#allocation0 + $0x2e7] ss:$-1 sm:$0xff]  ;;  %v957_v5 = vrot.slane %v956_v0, 1 }
  0x85   :  { %737 = vst.msk [vmem:[#allocation1 + $0xe8] sm:$0xff] %vm330_vm0, %v733_v4  ;;  %v970_v4 = vld [vmem:[#allocation0 + $0x2ef] ss:$-1 sm:$0xff]  ;;  %v966_v7 = vrot.slane %v965_v2, 1 }
  0x86   :  { %743 = vst [vmem:[#allocation1 + $0xf0] sm:$0xff] %v742_v6  ;;  %v979_v6 = vld [vmem:[#allocation0 + $0x2f7] ss:$-1 sm:$0xff]  ;;  %v971_v10 = vrot.slane %v970_v4, 1 }
  0x87   :  { %751 = vst.msk [vmem:[#allocation1 + $0xf0] sm:$0xff] %vm330_vm0, %v747_v8  ;;  %v984_v8 = vld [vmem:[#allocation0 + $0x2ff] ss:$-1 sm:$0xff]  ;;  %v980_v12 = vrot.slane %v979_v6, 1 }
  0x88   :  { %757 = vst [vmem:[#allocation1 + $0xf8] sm:$0xff] %v756_v11  ;;  %v993_v11 = vld [vmem:[#allocation0 + $0x307] ss:$-1 sm:$0xff]  ;;  %v985_v14 = vrot.slane %v984_v8, 1 }
  0x89   :  { %765 = vst.msk [vmem:[#allocation1 + $0xf8] sm:$0xff] %vm330_vm0, %v761_v13  ;;  %v998_v13 = vld [vmem:[#allocation0 + $0x30f] ss:$-1 sm:$0xff]  ;;  %v994_v16 = vrot.slane %v993_v11, 1 }
  0x8a   :  { %771 = vst [vmem:[#allocation1 + $0x100] sm:$0xff] %v770_v15  ;;  %v1007_v15 = vld [vmem:[#allocation0 + $0x317] ss:$-1 sm:$0xff]  ;;  %v999_v18 = vrot.slane %v998_v13, 1 }
  0x8b   :  { %779 = vst.msk [vmem:[#allocation1 + $0x100] sm:$0xff] %vm330_vm0, %v775_v17  ;;  %v1012_v17 = vld [vmem:[#allocation0 + $0x31f] ss:$-1 sm:$0xff]  ;;  %v1008_v20 = vrot.slane %v1007_v15, 1 }
  0x8c   :  { %785 = vst [vmem:[#allocation1 + $0x108] sm:$0xff] %v784_v19  ;;  %v1021_v19 = vld [vmem:[#allocation0 + $0x327] ss:$-1 sm:$0xff]  ;;  %v1013_v22 = vrot.slane %v1012_v17, 1 }
  0x8d   :  { %793 = vst.msk [vmem:[#allocation1 + $0x108] sm:$0xff] %vm330_vm0, %v789_v21  ;;  %v1026_v21 = vld [vmem:[#allocation0 + $0x32f] ss:$-1 sm:$0xff]  ;;  %v1022_v24 = vrot.slane %v1021_v19, 1 }
  0x8e   :  { %799 = vst [vmem:[#allocation1 + $0x110] sm:$0xff] %v798_v23  ;;  %v1035_v23 = vld [vmem:[#allocation0 + $0x337] ss:$-1 sm:$0xff]  ;;  %v1027_v26 = vrot.slane %v1026_v21, 1 }
  0x8f   :  { %807 = vst.msk [vmem:[#allocation1 + $0x110] sm:$0xff] %vm330_vm0, %v803_v25  ;;  %v1040_v25 = vld [vmem:[#allocation0 + $0x33f] ss:$-1 sm:$0xff]  ;;  %v1036_v28 = vrot.slane %v1035_v23, 1 }
  0x90   :  { %813 = vst [vmem:[#allocation1 + $0x118] sm:$0xff] %v812_v27  ;;  %v1049_v27 = vld [vmem:[#allocation0 + $0x347] ss:$-1 sm:$0xff]  ;;  %v1041_v30 = vrot.slane %v1040_v25, 1 }
  0x91   :  { %821 = vst.msk [vmem:[#allocation1 + $0x118] sm:$0xff] %vm330_vm0, %v817_v29  ;;  %v1054_v29 = vld [vmem:[#allocation0 + $0x34f] ss:$-1 sm:$0xff]  ;;  %v1050_v32 = vrot.slane %v1049_v27, 1 }
  0x92   :  { %827 = vst [vmem:[#allocation1 + $0x120] sm:$0xff] %v826_v31  ;;  %v1063_v31 = vld [vmem:[#allocation0 + $0x357] ss:$-1 sm:$0xff]  ;;  %v1055_v34 = vrot.slane %v1054_v29, 1 }
  0x93   :  { %835 = vst.msk [vmem:[#allocation1 + $0x120] sm:$0xff] %vm330_vm0, %v831_v33  ;;  %v1068_v33 = vld [vmem:[#allocation0 + $0x35f] ss:$-1 sm:$0xff]  ;;  %v1064_v36 = vrot.slane %v1063_v31, 1 }
  0x94   :  { %841 = vst [vmem:[#allocation1 + $0x128] sm:$0xff] %v840_v35  ;;  %v1077_v35 = vld [vmem:[#allocation0 + $0x367] ss:$-1 sm:$0xff]  ;;  %v1069_v38 = vrot.slane %v1068_v33, 1 }
  0x95   :  { %849 = vst.msk [vmem:[#allocation1 + $0x128] sm:$0xff] %vm330_vm0, %v845_v37  ;;  %v1082_v37 = vld [vmem:[#allocation0 + $0x36f] ss:$-1 sm:$0xff]  ;;  %v1078_v40 = vrot.slane %v1077_v35, 1 }
  0x96   :  { %855 = vst [vmem:[#allocation1 + $0x130] sm:$0xff] %v854_v39  ;;  %v1091_v39 = vld [vmem:[#allocation0 + $0x377] ss:$-1 sm:$0xff]  ;;  %v1083_v42 = vrot.slane %v1082_v37, 1 }
  0x97   :  { %863 = vst.msk [vmem:[#allocation1 + $0x130] sm:$0xff] %vm330_vm0, %v859_v41  ;;  %v1096_v41 = vld [vmem:[#allocation0 + $0x37f] ss:$-1 sm:$0xff]  ;;  %v1092_v44 = vrot.slane %v1091_v39, 1 }
  0x98   :  { %869 = vst [vmem:[#allocation1 + $0x138] sm:$0xff] %v868_v43  ;;  %v1105_v43 = vld [vmem:[#allocation0 + $0x387] ss:$-1 sm:$0xff]  ;;  %v1097_v46 = vrot.slane %v1096_v41, 1 }
  0x99   :  { %877 = vst.msk [vmem:[#allocation1 + $0x138] sm:$0xff] %vm330_vm0, %v873_v45  ;;  %v1110_v45 = vld [vmem:[#allocation0 + $0x38f] ss:$-1 sm:$0xff]  ;;  %v1106_v48 = vrot.slane %v1105_v43, 1 }
  0x9a   :  { %883 = vst [vmem:[#allocation1 + $0x140] sm:$0xff] %v882_v47  ;;  %v1119_v47 = vld [vmem:[#allocation0 + $0x397] ss:$-1 sm:$0xff]  ;;  %v1111_v50 = vrot.slane %v1110_v45, 1 }
  0x9b   :  { %891 = vst.msk [vmem:[#allocation1 + $0x140] sm:$0xff] %vm330_vm0, %v887_v49  ;;  %v1124_v49 = vld [vmem:[#allocation0 + $0x39f] ss:$-1 sm:$0xff]  ;;  %v1120_v52 = vrot.slane %v1119_v47, 1  ;;  %v1498_v47 = vld [vmem:[#allocation1 + $0x8] sm:$0xff] }
  0x9c   :  { %897 = vst [vmem:[#allocation1 + $0x148] sm:$0xff] %v896_v51  ;;  %v1133_v51 = vld [vmem:[#allocation0 + $0x3a7] ss:$-1 sm:$0xff]  ;;  %v1125_v54 = vrot.slane %v1124_v49, 1 }
  0x9d   :  { %905 = vst.msk [vmem:[#allocation1 + $0x148] sm:$0xff] %vm330_vm0, %v901_v53  ;;  %v1138_v53 = vld [vmem:[#allocation0 + $0x3af] ss:$-1 sm:$0xff]  ;;  %v1134_v56 = vrot.slane %v1133_v51, 1  ;;  %v1504_v49 = vld [vmem:[#allocation1 + $0x20] sm:$0xff]  ;;  %v1508_v51 = vld [vmem:[#allocation1 + $0x30] sm:$0xff] }
  0x9e   :  { %911 = vst [vmem:[#allocation1 + $0x150] sm:$0xff] %v910_v55  ;;  %v1147_v55 = vld [vmem:[#allocation0 + $0x3b7] ss:$-1 sm:$0xff]  ;;  %v1139_v58 = vrot.slane %v1138_v53, 1  ;;  %v1512_v53 = vld [vmem:[#allocation1 + $0x40] sm:$0xff] }
  0x9f   :  { %919 = vst.msk [vmem:[#allocation1 + $0x150] sm:$0xff] %vm330_vm0, %v915_v57  ;;  %v1152_v57 = vld [vmem:[#allocation0 + $0x3bf] ss:$-1 sm:$0xff]  ;;  %v1148_v60 = vrot.slane %v1147_v55, 1  ;;  %v1516_v55 = vld [vmem:[#allocation1 + $0x50] sm:$0xff] }
  0xa0   :  { %925 = vst [vmem:[#allocation1 + $0x158] sm:$0xff] %v924_v59  ;;  %v1161_v59 = vld [vmem:[#allocation0 + $0x3c7] ss:$-1 sm:$0xff]  ;;  %v1153_v62 = vrot.slane %v1152_v57, 1 }
  0xa1   :  { %933 = vst.msk [vmem:[#allocation1 + $0x158] sm:$0xff] %vm330_vm0, %v929_v61  ;;  %v1166_v61 = vld [vmem:[#allocation0 + $0x3cf] ss:$-1 sm:$0xff]  ;;  %v1162_v0 = vrot.slane %v1161_v59, 1  ;;  %v1520_v57 = vld [vmem:[#allocation1 + $0x60] sm:$0xff]  ;;  %v1524_v59 = vld [vmem:[#allocation1 + $0x70] sm:$0xff] }
  0xa2   :  { %939 = vst [vmem:[#allocation1 + $0x160] sm:$0xff] %v938_v63  ;;  %v1175_v63 = vld [vmem:[#allocation0 + $0x3d7] ss:$-1 sm:$0xff]  ;;  %v1167_v2 = vrot.slane %v1166_v61, 1  ;;  %v1528_v61 = vld [vmem:[#allocation1 + $0x80] sm:$0xff] }
  0xa3   :  { %947 = vst.msk [vmem:[#allocation1 + $0x160] sm:$0xff] %vm330_vm0, %v943_v1  ;;  %v1180_v1 = vld [vmem:[#allocation0 + $0x3df] ss:$-1 sm:$0xff]  ;;  %v1176_v4 = vrot.slane %v1175_v63, 1  ;;  %v1532_v63 = vld [vmem:[#allocation1 + $0x90] sm:$0xff] }
  0xa4   :  { %953 = vst [vmem:[#allocation1 + $0x168] sm:$0xff] %v952_v3  ;;  %v1189_v3 = vld [vmem:[#allocation0 + $0x3e7] ss:$-1 sm:$0xff]  ;;  %v1181_v6 = vrot.slane %v1180_v1, 1 }
  0xa5   :  { %961 = vst.msk [vmem:[#allocation1 + $0x168] sm:$0xff] %vm330_vm0, %v957_v5  ;;  %v1194_v5 = vld [vmem:[#allocation0 + $0x3ef] ss:$-1 sm:$0xff]  ;;  %v1190_v8 = vrot.slane %v1189_v3, 1  ;;  %v1536_v1 = vld [vmem:[#allocation1 + $0xa0] sm:$0xff]  ;;  %v1540_v3 = vld [vmem:[#allocation1 + $0xb0] sm:$0xff] }
  0xa6   :  { %967 = vst [vmem:[#allocation1 + $0x170] sm:$0xff] %v966_v7  ;;  %v1203_v7 = vld [vmem:[#allocation0 + $0x3f7] ss:$-1 sm:$0xff]  ;;  %v1195_v11 = vrot.slane %v1194_v5, 1  ;;  %v1544_v5 = vld [vmem:[#allocation1 + $0xc0] sm:$0xff] }
  0xa7   :  { %975 = vst.msk [vmem:[#allocation1 + $0x170] sm:$0xff] %vm330_vm0, %v971_v10  ;;  %v1208_v10 = vld [vmem:[#allocation0 + $0x3ff] ss:$-1 sm:$0xff]  ;;  %v1204_v13 = vrot.slane %v1203_v7, 1  ;;  %v1548_v7 = vld [vmem:[#allocation1 + $0xd0] sm:$0xff] }
  0xa8   :  { %981 = vst [vmem:[#allocation1 + $0x178] sm:$0xff] %v980_v12  ;;  %v1217_v12 = vld [vmem:[#allocation0 + $0x407] ss:$-1 sm:$0xff]  ;;  %v1209_v15 = vrot.slane %v1208_v10, 1 }
  0xa9   :  { %989 = vst.msk [vmem:[#allocation1 + $0x178] sm:$0xff] %vm330_vm0, %v985_v14  ;;  %v1222_v14 = vld [vmem:[#allocation0 + $0x40f] ss:$-1 sm:$0xff]  ;;  %v1218_v17 = vrot.slane %v1217_v12, 1  ;;  %v1552_v10 = vld [vmem:[#allocation1 + $0xe0] sm:$0xff]  ;;  %v1556_v12 = vld [vmem:[#allocation1 + $0xf0] sm:$0xff] }
  0xaa   :  { %995 = vst [vmem:[#allocation1 + $0x180] sm:$0xff] %v994_v16  ;;  %v1231_v16 = vld [vmem:[#allocation0 + $0x417] ss:$-1 sm:$0xff]  ;;  %v1223_v19 = vrot.slane %v1222_v14, 1  ;;  %v1560_v14 = vld [vmem:[#allocation1 + $0x100] sm:$0xff] }
  0xab   :  { %1003 = vst.msk [vmem:[#allocation1 + $0x180] sm:$0xff] %vm330_vm0, %v999_v18  ;;  %v1236_v18 = vld [vmem:[#allocation0 + $0x41f] ss:$-1 sm:$0xff]  ;;  %v1232_v21 = vrot.slane %v1231_v16, 1  ;;  %v1564_v16 = vld [vmem:[#allocation1 + $0x110] sm:$0xff] }
  0xac   :  { %1009 = vst [vmem:[#allocation1 + $0x188] sm:$0xff] %v1008_v20  ;;  %v1245_v20 = vld [vmem:[#allocation0 + $0x427] ss:$-1 sm:$0xff]  ;;  %v1237_v23 = vrot.slane %v1236_v18, 1 }
  0xad   :  { %1017 = vst.msk [vmem:[#allocation1 + $0x188] sm:$0xff] %vm330_vm0, %v1013_v22  ;;  %v1250_v22 = vld [vmem:[#allocation0 + $0x42f] ss:$-1 sm:$0xff]  ;;  %v1246_v25 = vrot.slane %v1245_v20, 1  ;;  %v1568_v18 = vld [vmem:[#allocation1 + $0x120] sm:$0xff]  ;;  %v1572_v20 = vld [vmem:[#allocation1 + $0x130] sm:$0xff] }
  0xae   :  { %1023 = vst [vmem:[#allocation1 + $0x190] sm:$0xff] %v1022_v24  ;;  %v1259_v24 = vld [vmem:[#allocation0 + $0x437] ss:$-1 sm:$0xff]  ;;  %v1251_v27 = vrot.slane %v1250_v22, 1  ;;  %v1576_v22 = vld [vmem:[#allocation1 + $0x140] sm:$0xff] }
  0xaf   :  { %1031 = vst.msk [vmem:[#allocation1 + $0x190] sm:$0xff] %vm330_vm0, %v1027_v26  ;;  %v1264_v26 = vld [vmem:[#allocation0 + $0x43f] ss:$-1 sm:$0xff]  ;;  %v1260_v29 = vrot.slane %v1259_v24, 1  ;;  %v1580_v24 = vld [vmem:[#allocation1 + $0x150] sm:$0xff] }
  0xb0   :  { %1037 = vst [vmem:[#allocation1 + $0x198] sm:$0xff] %v1036_v28  ;;  %v1273_v28 = vld [vmem:[#allocation0 + $0x447] ss:$-1 sm:$0xff]  ;;  %v1265_v31 = vrot.slane %v1264_v26, 1 }
  0xb1   :  { %1045 = vst.msk [vmem:[#allocation1 + $0x198] sm:$0xff] %vm330_vm0, %v1041_v30  ;;  %v1278_v30 = vld [vmem:[#allocation0 + $0x44f] ss:$-1 sm:$0xff]  ;;  %v1274_v33 = vrot.slane %v1273_v28, 1  ;;  %v1584_v26 = vld [vmem:[#allocation1 + $0x160] sm:$0xff]  ;;  %v1588_v28 = vld [vmem:[#allocation1 + $0x170] sm:$0xff] }
  0xb2   :  { %1051 = vst [vmem:[#allocation1 + $0x1a0] sm:$0xff] %v1050_v32  ;;  %v1287_v32 = vld [vmem:[#allocation0 + $0x457] ss:$-1 sm:$0xff]  ;;  %v1279_v35 = vrot.slane %v1278_v30, 1  ;;  %v1592_v30 = vld [vmem:[#allocation1 + $0x180] sm:$0xff] }
  0xb3   :  { %1059 = vst.msk [vmem:[#allocation1 + $0x1a0] sm:$0xff] %vm330_vm0, %v1055_v34  ;;  %v1292_v34 = vld [vmem:[#allocation0 + $0x45f] ss:$-1 sm:$0xff]  ;;  %v1288_v37 = vrot.slane %v1287_v32, 1 }
  0xb4   :  { %1065 = vst [vmem:[#allocation1 + $0x1a8] sm:$0xff] %v1064_v36  ;;  %v1301_v36 = vld [vmem:[#allocation0 + $0x467] ss:$-1 sm:$0xff]  ;;  %v1293_v39 = vrot.slane %v1292_v34, 1 }
  0xb5   :  { %1073 = vst.msk [vmem:[#allocation1 + $0x1a8] sm:$0xff] %vm330_vm0, %v1069_v38  ;;  %v1306_v38 = vld [vmem:[#allocation0 + $0x46f] ss:$-1 sm:$0xff]  ;;  %v1302_v41 = vrot.slane %v1301_v36, 1 }
  0xb6   :  { %1079 = vst [vmem:[#allocation1 + $0x1b0] sm:$0xff] %v1078_v40  ;;  %v1315_v40 = vld [vmem:[#allocation0 + $0x477] ss:$-1 sm:$0xff]  ;;  %v1307_v43 = vrot.slane %v1306_v38, 1 }
  0xb7   :  { %1087 = vst.msk [vmem:[#allocation1 + $0x1b0] sm:$0xff] %vm330_vm0, %v1083_v42  ;;  %v1320_v42 = vld [vmem:[#allocation0 + $0x47f] ss:$-1 sm:$0xff]  ;;  %v1596_v32 = vld [vmem:[#allocation1 + $0x190] sm:$0xff] }
  0xb8   :  { %1093 = vst [vmem:[#allocation1 + $0x1b8] sm:$0xff] %v1092_v44  ;;  %v1316_v44 = vrot.slane %v1315_v40, 1  ;;  %v1321_v45 = vrot.slane %v1320_v42, 1 }
  0xb9   :  { %1101 = vst.msk [vmem:[#allocation1 + $0x1b8] sm:$0xff] %vm330_vm0, %v1097_v46  ;;  %v1496_v46 = vld [vmem:[#allocation1] sm:$0xff] }
  0xba   :  { %1107 = vst [vmem:[#allocation1 + $0x1c0] sm:$0xff] %v1106_v48  ;;  %v1502_v48 = vld [vmem:[#allocation1 + $0x18] sm:$0xff]  ;;  %v1600_v34 = vld [vmem:[#allocation1 + $0x1a0] sm:$0xff] }
  0xbb   :  { %1115 = vst.msk [vmem:[#allocation1 + $0x1c0] sm:$0xff] %vm330_vm0, %v1111_v50  ;;  %v1506_v50 = vld [vmem:[#allocation1 + $0x28] sm:$0xff] }
  0xbc   :  { %1121 = vst [vmem:[#allocation1 + $0x1c8] sm:$0xff] %v1120_v52  ;;  %v1510_v52 = vld [vmem:[#allocation1 + $0x38] sm:$0xff] }
  0xbd   :  { %1129 = vst.msk [vmem:[#allocation1 + $0x1c8] sm:$0xff] %vm330_vm0, %v1125_v54  ;;  %v1514_v54 = vld [vmem:[#allocation1 + $0x48] sm:$0xff] }
  0xbe   :  { %1135 = vst [vmem:[#allocation1 + $0x1d0] sm:$0xff] %v1134_v56  ;;  %v1518_v56 = vld [vmem:[#allocation1 + $0x58] sm:$0xff]  ;;  %v1604_v36 = vld [vmem:[#allocation1 + $0x1b0] sm:$0xff] }
  0xbf   :  { %1143 = vst.msk [vmem:[#allocation1 + $0x1d0] sm:$0xff] %vm330_vm0, %v1139_v58  ;;  %v1522_v58 = vld [vmem:[#allocation1 + $0x68] sm:$0xff] }
  0xc0   :  { %1149 = vst [vmem:[#allocation1 + $0x1d8] sm:$0xff] %v1148_v60  ;;  %v1526_v60 = vld [vmem:[#allocation1 + $0x78] sm:$0xff] }
  0xc1   :  { %1157 = vst.msk [vmem:[#allocation1 + $0x1d8] sm:$0xff] %vm330_vm0, %v1153_v62  ;;  %v1530_v62 = vld [vmem:[#allocation1 + $0x88] sm:$0xff] }
  0xc2   :  { %1163 = vst [vmem:[#allocation1 + $0x1e0] sm:$0xff] %v1162_v0  ;;  %v1534_v0 = vld [vmem:[#allocation1 + $0x98] sm:$0xff]  ;;  %v1608_v38 = vld [vmem:[#allocation1 + $0x1c0] sm:$0xff] }
  0xc3   :  { %1171 = vst.msk [vmem:[#allocation1 + $0x1e0] sm:$0xff] %vm330_vm0, %v1167_v2  ;;  %v1538_v2 = vld [vmem:[#allocation1 + $0xa8] sm:$0xff] }
  0xc4   :  { %1177 = vst [vmem:[#allocation1 + $0x1e8] sm:$0xff] %v1176_v4  ;;  %v1542_v4 = vld [vmem:[#allocation1 + $0xb8] sm:$0xff] }
  0xc5   :  { %1185 = vst.msk [vmem:[#allocation1 + $0x1e8] sm:$0xff] %vm330_vm0, %v1181_v6  ;;  %v1546_v6 = vld [vmem:[#allocation1 + $0xc8] sm:$0xff] }
  0xc6   :  { %1191 = vst [vmem:[#allocation1 + $0x1f0] sm:$0xff] %v1190_v8  ;;  %v1550_v8 = vld [vmem:[#allocation1 + $0xd8] sm:$0xff]  ;;  %v1612_v40 = vld [vmem:[#allocation1 + $0x1d0] sm:$0xff] }
  0xc7   :  { %1199 = vst.msk [vmem:[#allocation1 + $0x1f0] sm:$0xff] %vm330_vm0, %v1195_v11  ;;  %v1554_v11 = vld [vmem:[#allocation1 + $0xe8] sm:$0xff] }
  0xc8   :  { %1205 = vst [vmem:[#allocation1 + $0x1f8] sm:$0xff] %v1204_v13  ;;  %v1558_v13 = vld [vmem:[#allocation1 + $0xf8] sm:$0xff] }
  0xc9   :  { %1213 = vst.msk [vmem:[#allocation1 + $0x1f8] sm:$0xff] %vm330_vm0, %v1209_v15  ;;  %v1562_v15 = vld [vmem:[#allocation1 + $0x108] sm:$0xff] }
  0xca   :  { %1219 = vst [vmem:[#allocation1 + $0x200] sm:$0xff] %v1218_v17  ;;  %v1566_v17 = vld [vmem:[#allocation1 + $0x118] sm:$0xff]  ;;  %v1616_v42 = vld [vmem:[#allocation1 + $0x1e0] sm:$0xff] }
  0xcb   :  { %1227 = vst.msk [vmem:[#allocation1 + $0x200] sm:$0xff] %vm330_vm0, %v1223_v19  ;;  %v1570_v19 = vld [vmem:[#allocation1 + $0x128] sm:$0xff] }
  0xcc   :  { %1233 = vst [vmem:[#allocation1 + $0x208] sm:$0xff] %v1232_v21  ;;  %v1574_v21 = vld [vmem:[#allocation1 + $0x138] sm:$0xff] }
  0xcd   :  { %1241 = vst.msk [vmem:[#allocation1 + $0x208] sm:$0xff] %vm330_vm0, %v1237_v23  ;;  %v1578_v23 = vld [vmem:[#allocation1 + $0x148] sm:$0xff] }
  0xce   :  { %1247 = vst [vmem:[#allocation1 + $0x210] sm:$0xff] %v1246_v25  ;;  %v1582_v25 = vld [vmem:[#allocation1 + $0x158] sm:$0xff] }
  0xcf   :  { %1255 = vst.msk [vmem:[#allocation1 + $0x210] sm:$0xff] %vm330_vm0, %v1251_v27  ;;  %v1586_v27 = vld [vmem:[#allocation1 + $0x168] sm:$0xff] }
  0xd0   :  { %1261 = vst [vmem:[#allocation1 + $0x218] sm:$0xff] %v1260_v29  ;;  %v1590_v29 = vld [vmem:[#allocation1 + $0x178] sm:$0xff] }
  0xd1   :  { %1269 = vst.msk [vmem:[#allocation1 + $0x218] sm:$0xff] %vm330_vm0, %v1265_v31  ;;  %v1594_v31 = vld [vmem:[#allocation1 + $0x188] sm:$0xff] }
  0xd2   :  { %1275 = vst [vmem:[#allocation1 + $0x220] sm:$0xff] %v1274_v33  ;;  %v1598_v33 = vld [vmem:[#allocation1 + $0x198] sm:$0xff] }
  0xd3   :  { %1283 = vst.msk [vmem:[#allocation1 + $0x220] sm:$0xff] %vm330_vm0, %v1279_v35  ;;  %v1602_v35 = vld [vmem:[#allocation1 + $0x1a8] sm:$0xff] }
  0xd4   :  { %1289 = vst [vmem:[#allocation1 + $0x228] sm:$0xff] %v1288_v37  ;;  %v1606_v37 = vld [vmem:[#allocation1 + $0x1b8] sm:$0xff] }
  0xd5   :  { %1297 = vst.msk [vmem:[#allocation1 + $0x228] sm:$0xff] %vm330_vm0, %v1293_v39  ;;  %v1610_v39 = vld [vmem:[#allocation1 + $0x1c8] sm:$0xff] }
  0xd6   :  { %1303 = vst [vmem:[#allocation1 + $0x230] sm:$0xff] %v1302_v41  ;;  %v1614_v41 = vld [vmem:[#allocation1 + $0x1d8] sm:$0xff] }
  0xd7   :  { %1311 = vst.msk [vmem:[#allocation1 + $0x230] sm:$0xff] %vm330_vm0, %v1307_v43  ;;  %v1618_v43 = vld [vmem:[#allocation1 + $0x1e8] sm:$0xff] }
  0xd8   :  { %1317 = vst [vmem:[#allocation1 + $0x238] sm:$0xff] %v1316_v44  ;;  %v1620_v44 = vld [vmem:[#allocation1 + $0x1f0] sm:$0xff] }
  0xd9   :  { %1325 = vst.msk [vmem:[#allocation1 + $0x238] sm:$0xff] %vm330_vm0, %v1321_v45  ;;  %v1622_v45 = vld [vmem:[#allocation1 + $0x1f8] sm:$0xff] }
  0xda   :  { %1497 = vst [vmem:[%s2455_s1] sm:$0xff] %v1496_v46  ;;  %v1624_v46 = vld [vmem:[#allocation1 + $0x200] sm:$0xff] }
  0xdb   :  { %1499 = vst [vmem:[%s2455_s1 + $0x8] sm:$0xff] %v1498_v47  ;;  %v1626_v47 = vld [vmem:[#allocation1 + $0x208] sm:$0xff] }
  0xdc   :  { %1501 = vst [vmem:[%s2455_s1 + $0x10] sm:$0xff] %v1500_v9  ;;  %v1628_v9 = vld [vmem:[#allocation1 + $0x210] sm:$0xff] }
  0xdd   :  { %1503 = vst [vmem:[%s2455_s1 + $0x18] sm:$0xff] %v1502_v48  ;;  %v1630_v48 = vld [vmem:[#allocation1 + $0x218] sm:$0xff] }
  0xde   :  { %1505 = vst [vmem:[%s2455_s1 + $0x20] sm:$0xff] %v1504_v49  ;;  %v1632_v49 = vld [vmem:[#allocation1 + $0x220] sm:$0xff] }
  0xdf   :  { %1507 = vst [vmem:[%s2455_s1 + $0x28] sm:$0xff] %v1506_v50  ;;  %v1634_v50 = vld [vmem:[#allocation1 + $0x228] sm:$0xff] }
  0xe0   :  { %1509 = vst [vmem:[%s2455_s1 + $0x30] sm:$0xff] %v1508_v51  ;;  %v1636_v51 = vld [vmem:[#allocation1 + $0x230] sm:$0xff] }
  0xe1   :  { %1511 = vst [vmem:[%s2455_s1 + $0x38] sm:$0xff] %v1510_v52  ;;  %v1638_v52 = vld [vmem:[#allocation1 + $0x238] sm:$0xff] }
  0xe2   :  { %1513 = vst [vmem:[%s2455_s1 + $0x40] sm:$0xff] %v1512_v53 }
  0xe3   :  { %1515 = vst [vmem:[%s2455_s1 + $0x48] sm:$0xff] %v1514_v54 }
  0xe4   :  { %1517 = vst [vmem:[%s2455_s1 + $0x50] sm:$0xff] %v1516_v55 }
  0xe5   :  { %1519 = vst [vmem:[%s2455_s1 + $0x58] sm:$0xff] %v1518_v56 }
  0xe6   :  { %1521 = vst [vmem:[%s2455_s1 + $0x60] sm:$0xff] %v1520_v57 }
  0xe7   :  { %1523 = vst [vmem:[%s2455_s1 + $0x68] sm:$0xff] %v1522_v58 }
  0xe8   :  { %1525 = vst [vmem:[%s2455_s1 + $0x70] sm:$0xff] %v1524_v59 }
  0xe9   :  { %1527 = vst [vmem:[%s2455_s1 + $0x78] sm:$0xff] %v1526_v60 }
  0xea   :  { %1529 = vst [vmem:[%s2455_s1 + $0x80] sm:$0xff] %v1528_v61 }
  0xeb   :  { %1531 = vst [vmem:[%s2455_s1 + $0x88] sm:$0xff] %v1530_v62 }
  0xec   :  { %1533 = vst [vmem:[%s2455_s1 + $0x90] sm:$0xff] %v1532_v63 }
  0xed   :  { %1535 = vst [vmem:[%s2455_s1 + $0x98] sm:$0xff] %v1534_v0 }
  0xee   :  { %1537 = vst [vmem:[%s2455_s1 + $0xa0] sm:$0xff] %v1536_v1 }
  0xef   :  { %1539 = vst [vmem:[%s2455_s1 + $0xa8] sm:$0xff] %v1538_v2 }
  0xf0   :  { %1541 = vst [vmem:[%s2455_s1 + $0xb0] sm:$0xff] %v1540_v3 }
  0xf1   :  { %1543 = vst [vmem:[%s2455_s1 + $0xb8] sm:$0xff] %v1542_v4 }
  0xf2   :  { %1545 = vst [vmem:[%s2455_s1 + $0xc0] sm:$0xff] %v1544_v5 }
  0xf3   :  { %1547 = vst [vmem:[%s2455_s1 + $0xc8] sm:$0xff] %v1546_v6 }
  0xf4   :  { %1549 = vst [vmem:[%s2455_s1 + $0xd0] sm:$0xff] %v1548_v7 }
  0xf5   :  { %1551 = vst [vmem:[%s2455_s1 + $0xd8] sm:$0xff] %v1550_v8 }
  0xf6   :  { %1553 = vst [vmem:[%s2455_s1 + $0xe0] sm:$0xff] %v1552_v10 }
  0xf7   :  { %1555 = vst [vmem:[%s2455_s1 + $0xe8] sm:$0xff] %v1554_v11 }
  0xf8   :  { %1557 = vst [vmem:[%s2455_s1 + $0xf0] sm:$0xff] %v1556_v12 }
  0xf9   :  { %1559 = vst [vmem:[%s2455_s1 + $0xf8] sm:$0xff] %v1558_v13 }
  0xfa   :  { %1561 = vst [vmem:[%s2455_s1 + $0x100] sm:$0xff] %v1560_v14 }
  0xfb   :  { %1563 = vst [vmem:[%s2455_s1 + $0x108] sm:$0xff] %v1562_v15 }
  0xfc   :  { %1565 = vst [vmem:[%s2455_s1 + $0x110] sm:$0xff] %v1564_v16 }
  0xfd   :  { %1567 = vst [vmem:[%s2455_s1 + $0x118] sm:$0xff] %v1566_v17 }
  0xfe   :  { %1569 = vst [vmem:[%s2455_s1 + $0x120] sm:$0xff] %v1568_v18 }
  0xff   :  { %1571 = vst [vmem:[%s2455_s1 + $0x128] sm:$0xff] %v1570_v19 }
 0x100   :  { %1573 = vst [vmem:[%s2455_s1 + $0x130] sm:$0xff] %v1572_v20 }
 0x101   :  { %1575 = vst [vmem:[%s2455_s1 + $0x138] sm:$0xff] %v1574_v21 }
 0x102   :  { %1577 = vst [vmem:[%s2455_s1 + $0x140] sm:$0xff] %v1576_v22 }
 0x103   :  { %1579 = vst [vmem:[%s2455_s1 + $0x148] sm:$0xff] %v1578_v23 }
 0x104   :  { %1581 = vst [vmem:[%s2455_s1 + $0x150] sm:$0xff] %v1580_v24 }
 0x105   :  { %1583 = vst [vmem:[%s2455_s1 + $0x158] sm:$0xff] %v1582_v25 }
 0x106   :  { %1585 = vst [vmem:[%s2455_s1 + $0x160] sm:$0xff] %v1584_v26 }
 0x107   :  { %1587 = vst [vmem:[%s2455_s1 + $0x168] sm:$0xff] %v1586_v27 }
 0x108   :  { %1589 = vst [vmem:[%s2455_s1 + $0x170] sm:$0xff] %v1588_v28 }
 0x109   :  { %1591 = vst [vmem:[%s2455_s1 + $0x178] sm:$0xff] %v1590_v29 }
 0x10a   :  { %1593 = vst [vmem:[%s2455_s1 + $0x180] sm:$0xff] %v1592_v30 }
 0x10b   :  { %1595 = vst [vmem:[%s2455_s1 + $0x188] sm:$0xff] %v1594_v31 }
 0x10c   :  { %1597 = vst [vmem:[%s2455_s1 + $0x190] sm:$0xff] %v1596_v32 }
 0x10d   :  { %1599 = vst [vmem:[%s2455_s1 + $0x198] sm:$0xff] %v1598_v33 }
 0x10e   :  { %1601 = vst [vmem:[%s2455_s1 + $0x1a0] sm:$0xff] %v1600_v34 }
 0x10f   :  { %1603 = vst [vmem:[%s2455_s1 + $0x1a8] sm:$0xff] %v1602_v35 }
 0x110   :  { %1605 = vst [vmem:[%s2455_s1 + $0x1b0] sm:$0xff] %v1604_v36 }
 0x111   :  { %1607 = vst [vmem:[%s2455_s1 + $0x1b8] sm:$0xff] %v1606_v37 }
 0x112   :  { %1609 = vst [vmem:[%s2455_s1 + $0x1c0] sm:$0xff] %v1608_v38 }
 0x113   :  { %1611 = vst [vmem:[%s2455_s1 + $0x1c8] sm:$0xff] %v1610_v39 }
 0x114   :  { %1613 = vst [vmem:[%s2455_s1 + $0x1d0] sm:$0xff] %v1612_v40 }
 0x115   :  { %1615 = vst [vmem:[%s2455_s1 + $0x1d8] sm:$0xff] %v1614_v41 }
 0x116   :  { %1617 = vst [vmem:[%s2455_s1 + $0x1e0] sm:$0xff] %v1616_v42 }
 0x117   :  { %1619 = vst [vmem:[%s2455_s1 + $0x1e8] sm:$0xff] %v1618_v43 }
 0x118   :  { %1621 = vst [vmem:[%s2455_s1 + $0x1f0] sm:$0xff] %v1620_v44 }
 0x119   :  { %1623 = vst [vmem:[%s2455_s1 + $0x1f8] sm:$0xff] %v1622_v45 }
 0x11a   :  { %1625 = vst [vmem:[%s2455_s1 + $0x200] sm:$0xff] %v1624_v46 }
 0x11b   :  { %1627 = vst [vmem:[%s2455_s1 + $0x208] sm:$0xff] %v1626_v47 }
 0x11c   :  { %1629 = vst [vmem:[%s2455_s1 + $0x210] sm:$0xff] %v1628_v9 }
 0x11d   :  { %1631 = vst [vmem:[%s2455_s1 + $0x218] sm:$0xff] %v1630_v48 }
 0x11e   :  { %1633 = vst [vmem:[%s2455_s1 + $0x220] sm:$0xff] %v1632_v49 }
 0x11f   :  { %1635 = vst [vmem:[%s2455_s1 + $0x228] sm:$0xff] %v1634_v50 }
 0x120   :  { %1637 = vst [vmem:[%s2455_s1 + $0x230] sm:$0xff] %v1636_v51 }
 0x121   :  { %1639 = vst [vmem:[%s2455_s1 + $0x238] sm:$0xff] %v1638_v52 }

// kernel: _lambda_.3
= control target key start
LH: loop header
LB: loop body
LE: loop exit
PB: predicated region body
PF: predicated region fallthrough
CT: control target
= control target key end

     0   :  { %s1068_s24 = smov 0   ;;  %s1070_s25 = smov 0   ;;  %s1347_s0 = inlined_call_operand.vmem [shape: f32[8,8,4], index: 0, kind: input, shape index: {}]   ;;  %s1348_s1 = inlined_call_operand.vmem [shape: f32[8,8,4], index: 1, kind: input, shape index: {}]   ;;  %s1349_s2 = inlined_call_operand.vmem [shape: f32[8,8,4], index: 2, kind: input, shape index: {}]   ;;  %s1350_s3 = inlined_call_operand.vmem [shape: f32[4,2], index: 3, kind: input, shape index: {}]   ;;  %s1351_s4 = inlined_call_operand.vmem [shape: f32[8,8,8,4], index: 4, kind: output, shape index: {0}]   ;;  %s1352_s5 = inlined_call_operand.vmem [shape: f32[8,8,8,4], index: 5, kind: output, shape index: {1}]   ;;  %s1353_s6 = inlined_call_operand.vmem [shape: f32[8,4,2], index: 6, kind: output, shape index: {2}]   ;;  %s1354_s7 = inlined_call_operand.vmem [shape: f32[8,4,2], index: 7, kind: output, shape index: {3}]  }
   0x1   :  { %s1072_s26 = smov 0  }
   0x2 LB: > { %s30_s27 = sadd.s32 1, %s1022_s25  ;;  %p926_p0 = scmp.ge.s32.totalorder %s1026_s26, 1  ;;  %s1026_s26 = sphi %s1072_s26, %s18_s26   ;;  %s1022_s25 = sphi %s1070_s25, %s1356_s25   ;;  %s1018_s24 = sphi %s1068_s24, %s1355_s24  }
   0x3   : > { %p32_p1 = scmp.ge.s32.totalorder %s30_s27, 4  ;;  %p283_p2 = scmp.lt.s32.totalorder %s1026_s26, 5 }
   0x5   : > { %s1358_s27 = smov (%p32_p1, %s30_s27), 0  ;;  %p284_p3 = pnand %p926_p0, %p283_p2 }
   0x6   : > { %s927_s28 = sshll.u32 (!%p284_p3), %s1018_s24, 1 }
   0x7   : > { %287 = sbr.rel (%p284_p3) target bundleno = 62 (0x3e), region = 36  ;;  %p351_p4 = scmp.lt.s32.totalorder (!%p284_p3), %s927_s28, 7 }
   0xc   : > { %s1360_s28 = smov (!%p351_p4, %s927_s28), 7  ;;  %v1092_v0 = vld [vmem:[%s1349_s2] sm:$0xff]  ;;  %v1097_v1 = vld [vmem:[%s1349_s2 + $0x8] sm:$0xff]  ;;  %v1112_v2 = vld [vmem:[%s1349_s2 + $0x10] sm:$0xff]  ;;  %vm426_vm0 = vcmask 31744   ;;  %vm661_vm1 = vcmask 9216  }
   0xd   : > { %s928_s29 = sshll.u32 %s1360_s28, 3  ;;  %v1117_v3 = vld [vmem:[%s1349_s2 + $0x18] sm:$0xff]  ;;  %s978_s21 = sshll.u32 %s1360_s28, 6  ;;  %v1150_v21 = vld [vmem:[%s1349_s2 + $0x20] sm:$0xff]  ;;  %v1155_v22 = vld [vmem:[%s1349_s2 + $0x28] sm:$0xff]  ;;  %vm672_vm2 = vcmask 11266  }
   0xe   : > { %s1102_s13 = scalar_lea.vmem %s1347_s0, %s928_s29  ;;  %s1107_s16 = scalar_lea.vmem %s1348_s1, %s928_s29  ;;  %v1165_v26 = vld [vmem:[%s1349_s2 + $0x30] sm:$0xff]  ;;  %v1170_v30 = vld [vmem:[%s1349_s2 + $0x38] sm:$0xff]  ;;  %v1219_v59 = vld [vmem:[%s1350_s3] sm:$0xf] }
   0xf   : > { %v1120_v4 = vld [vmem:[%s1102_s13] sm:$0xff]  ;;  %s1145_s24 = scalar_lea.vmem %s1351_s4, %s978_s21  ;;  %s1160_s12 = scalar_lea.vmem %s1352_s5, %s978_s21  ;;  %v1199_v48 = vld [vmem:[%s1107_s16 + $0x8] sm:$0xff] }
  0x10   : > { %v1123_v5 = vld [vmem:[%s1107_s16] sm:$0xff]  ;;  %v409_v6 = vmul.f32 %v1092_v0, %v1120_v4  ;;  %v439_v8 = vmul.f32 %v1097_v1, %v1120_v4  ;;  %v470_v10 = vmul.f32 %v1112_v2, %v1120_v4  ;;  %v501_v12 = vmul.f32 %v1117_v3, %v1120_v4  ;;  %v1204_v51 = vld [vmem:[%s1102_s13 + $0x8] sm:$0xff]  ;;  %s938_s19 = sshll.u32 %s1360_s28, 2 }
  0x11   : > { %v411_v7 = vmul.f32 %v1092_v0, %v1123_v5  ;;  %v441_v9 = vmul.f32 %v1097_v1, %v1123_v5  ;;  %v472_v11 = vmul.f32 %v1112_v2, %v1123_v5  ;;  %v503_v13 = vmul.f32 %v1117_v3, %v1123_v5  ;;  %s1245_s21 = scalar_lea.vmem %s1353_s6, %s938_s19  ;;  %s1261_s29 = scalar_lea.vmem %s1354_s7, %s938_s19 }
  0x12   : > { %v431_v15 = vmul.f32 0.0, %v409_v6  ;;  %v461_v17 = vmul.f32 0.0, %v439_v8  ;;  %v492_v19 = vmul.f32 0.0, %v470_v10  ;;  %v523_v29 = vmul.f32 0.0, %v501_v12 }
  0x13   : > { %v422_v14 = vmul.f32 0.0, %v411_v7  ;;  %v452_v16 = vmul.f32 0.0, %v441_v9  ;;  %v483_v18 = vmul.f32 0.0, %v472_v11  ;;  %v514_v20 = vmul.f32 0.0, %v503_v13 }
  0x14   : > { %v433_v24 = vsub.f32 %v411_v7, %v431_v15  ;;  %v463_v27 = vsub.f32 %v441_v9, %v461_v17  ;;  %v532_v31 = vmul.f32 %v1150_v21, %v1120_v4  ;;  %v534_v32 = vmul.f32 %v1150_v21, %v1123_v5 }
  0x15   : > { %v424_v23 = vadd.f32 %v422_v14, %v409_v6  ;;  %v454_v25 = vadd.f32 %v452_v16, %v439_v8  ;;  %v485_v28 = vadd.f32 %v483_v18, %v470_v10  ;;  %v563_v33 = vmul.f32 %v1155_v22, %v1120_v4 }
  0x16   : > { %v565_v34 = vmul.f32 %v1155_v22, %v1123_v5  ;;  %435 = vst.msk [vmem:[%s1160_s12] sm:$0xff] %vm426_vm0, %v433_v24  ;;  %v494_v35 = vsub.f32 %v472_v11, %v492_v19  ;;  %v516_v36 = vadd.f32 %v514_v20, %v501_v12  ;;  %v594_v37 = vmul.f32 %v1165_v26, %v1120_v4 }
  0x17   : > { %427 = vst.msk [vmem:[%s1145_s24] sm:$0xff] %vm426_vm0, %v424_v23  ;;  %v596_v38 = vmul.f32 %v1165_v26, %v1123_v5  ;;  %v542_v39 = vmul.f32 0.0, %v532_v31  ;;  %v552_v40 = vmul.f32 0.0, %v534_v32  ;;  %v573_v41 = vmul.f32 0.0, %v563_v33 }
  0x18   : > { %942 = vst.msk [vmem:[%s1145_s24 + $0x8] sm:$0xff] %vm426_vm0, %v454_v25  ;;  %v625_v42 = vmul.f32 %v1170_v30, %v1120_v4  ;;  %v525_v43 = vsub.f32 %v503_v13, %v523_v29  ;;  %v583_v44 = vmul.f32 0.0, %v565_v34  ;;  %v627_v45 = vmul.f32 %v1170_v30, %v1123_v5 }
  0x19   : > { %944 = vst.msk [vmem:[%s1160_s12 + $0x8] sm:$0xff] %vm426_vm0, %v463_v27  ;;  %v547_v46 = vadd.f32 %v542_v39, %v534_v32  ;;  %v604_v47 = vmul.f32 0.0, %v594_v37  ;;  %v556_v49 = vsub.f32 %v552_v40, %v532_v31  ;;  %v614_v50 = vmul.f32 0.0, %v596_v38 }
  0x1a   : > { %947 = vst.msk [vmem:[%s1145_s24 + $0x10] sm:$0xff] %vm426_vm0, %v485_v28  ;;  %v578_v52 = vadd.f32 %v573_v41, %v565_v34  ;;  %v635_v53 = vmul.f32 0.0, %v625_v42  ;;  %v587_v54 = vsub.f32 %v583_v44, %v563_v33  ;;  %v645_v55 = vmul.f32 0.0, %v627_v45 }
  0x1b   : > { %949 = vst.msk [vmem:[%s1160_s12 + $0x10] sm:$0xff] %vm426_vm0, %v494_v35  ;;  %v609_v56 = vadd.f32 %v604_v47, %v596_v38  ;;  %v412_v57 = vmul.f32 %v1092_v0, %v1199_v48  ;;  %v618_v58 = vsub.f32 %v614_v50, %v594_v37  ;;  %v666_v60 = vrot.slane %v1120_v4, 4 }
  0x1c   : > { %952 = vst.msk [vmem:[%s1145_s24 + $0x18] sm:$0xff] %vm426_vm0, %v516_v36  ;;  %v410_v61 = vmul.f32 %v1092_v0, %v1204_v51  ;;  %v640_v62 = vadd.f32 %v635_v53, %v627_v45  ;;  %v442_v63 = vmul.f32 %v1097_v1, %v1199_v48  ;;  %v649_v6 = vsub.f32 %v645_v55, %v625_v42 }
  0x1d   : > { %954 = vst.msk [vmem:[%s1160_s12 + $0x18] sm:$0xff] %vm426_vm0, %v525_v43  ;;  %v681_v7 = vrot.slane %v1123_v5, 4  ;;  %v440_v8 = vmul.f32 %v1097_v1, %v1204_v51  ;;  %v659_v0 = vmul.f32 %v1219_v59, %v1120_v4  ;;  %v423_v9 = vmul.f32 0.0, %v412_v57 }
  0x1e   : > { %957 = vst.msk [vmem:[%s1145_s24 + $0x20] sm:$0xff] %vm426_vm0, %v547_v46  ;;  %v473_v10 = vmul.f32 %v1112_v2, %v1199_v48  ;;  %v670_v1 = vmul.f32 %v666_v60, %v1219_v59  ;;  %v432_v11 = vmul.f32 0.0, %v410_v61  ;;  %v471_v4 = vmul.f32 %v1112_v2, %v1204_v51 }
  0x1f   : > { %959 = vst.msk [vmem:[%s1160_s12 + $0x20] sm:$0xff] %vm426_vm0, %v556_v49  ;;  %v675_v12 = vmul.f32 %v1219_v59, %v1123_v5  ;;  %v453_v13 = vmul.f32 0.0, %v442_v63  ;;  %v504_v14 = vmul.f32 %v1117_v3, %v1199_v48  ;;  %v685_v2 = vmul.f32 %v681_v7, %v1219_v59 }
  0x20   : > { %962 = vst.msk [vmem:[%s1145_s24 + $0x28] sm:$0xff] %vm426_vm0, %v578_v52  ;;  %v462_v15 = vmul.f32 0.0, %v440_v8  ;;  %v502_v16 = vmul.f32 %v1117_v3, %v1204_v51  ;;  %v425_v5 = vadd.f32 %v423_v9, %v410_v61  ;;  %v484_v17 = vmul.f32 0.0, %v473_v10 }
  0x21   : > { %964 = vst.msk [vmem:[%s1160_s12 + $0x28] sm:$0xff] %vm426_vm0, %v587_v54  ;;  %v533_v18 = vmul.f32 %v1150_v21, %v1204_v51  ;;  %v434_v19 = vsub.f32 %v412_v57, %v432_v11  ;;  %v493_v20 = vmul.f32 0.0, %v471_v4  ;;  %v535_v23 = vmul.f32 %v1150_v21, %v1199_v48 }
  0x22   : > { %967 = vst.msk [vmem:[%s1145_s24 + $0x30] sm:$0xff] %vm426_vm0, %v609_v56  ;;  %v455_v3 = vadd.f32 %v453_v13, %v440_v8  ;;  %v515_v24 = vmul.f32 0.0, %v504_v14  ;;  %v564_v25 = vmul.f32 %v1155_v22, %v1204_v51  ;;  %v464_v27 = vsub.f32 %v442_v63, %v462_v15 }
  0x23   : > { %969 = vst.msk [vmem:[%s1160_s12 + $0x30] sm:$0xff] %vm426_vm0, %v618_v58  ;;  %v524_v28 = vmul.f32 0.0, %v502_v16  ;;  %v566_v29 = vmul.f32 %v1155_v22, %v1199_v48  ;;  %v486_v21 = vadd.f32 %v484_v17, %v471_v4  ;;  %v543_v31 = vmul.f32 0.0, %v533_v18 }
  0x24   : > { %972 = vst.msk [vmem:[%s1145_s24 + $0x38] sm:$0xff] %vm426_vm0, %v640_v62  ;;  %v595_v32 = vmul.f32 %v1165_v26, %v1204_v51  ;;  %v495_v33 = vsub.f32 %v473_v10, %v493_v20  ;;  %v553_v34 = vmul.f32 0.0, %v535_v23  ;;  %v597_v35 = vmul.f32 %v1165_v26, %v1199_v48 }
  0x25   : > { %974 = vst.msk [vmem:[%s1160_s12 + $0x38] sm:$0xff] %vm426_vm0, %v649_v6  ;;  %v517_v22 = vadd.f32 %v515_v24, %v502_v16  ;;  %v574_v36 = vmul.f32 0.0, %v564_v25  ;;  %v626_v37 = vmul.f32 %v1170_v30, %v1204_v51  ;;  %v526_v38 = vsub.f32 %v504_v14, %v524_v28 }
  0x26   : > { %662 = vst.msk [vmem:[%s1245_s21] sm:$0x3] %vm661_vm1, %v659_v0  ;;  %v584_v39 = vmul.f32 0.0, %v566_v29  ;;  %v628_v40 = vmul.f32 %v1170_v30, %v1199_v48  ;;  %v548_v26 = vadd.f32 %v543_v31, %v535_v23  ;;  %v605_v41 = vmul.f32 0.0, %v595_v32 }
  0x27   : > { %673 = vst.msk [vmem:[%s1245_s21] sm:$0xc] %vm672_vm2, %v670_v1  ;;  %v557_v42 = vsub.f32 %v553_v34, %v533_v18  ;;  %v615_v43 = vmul.f32 0.0, %v597_v35  ;;  %v579_v44 = vadd.f32 %v574_v36, %v566_v29  ;;  %v636_v45 = vmul.f32 0.0, %v626_v37 }
  0x28   : > { %677 = vst.msk [vmem:[%s1261_s29] sm:$0x3] %vm661_vm1, %v675_v12  ;;  %v588_v46 = vsub.f32 %v584_v39, %v564_v25  ;;  %v646_v30 = vmul.f32 0.0, %v628_v40  ;;  %v610_v47 = vadd.f32 %v605_v41, %v597_v35  ;;  %v667_v50 = vrot.slane %v1204_v51, 4 }
  0x29   : > { %687 = vst.msk [vmem:[%s1261_s29] sm:$0xc] %vm672_vm2, %v685_v2  ;;  %v619_v49 = vsub.f32 %v615_v43, %v595_v32  ;;  %v641_v52 = vadd.f32 %v636_v45, %v628_v40  ;;  %v682_v54 = vrot.slane %v1199_v48, 4  ;;  %v660_v55 = vmul.f32 %v1219_v59, %v1204_v51 }
  0x2a   : > { %428 = vst.msk [vmem:[%s1145_s24 + $0x40] sm:$0xff] %vm426_vm0, %v425_v5  ;;  %v650_v53 = vsub.f32 %v646_v30, %v626_v37  ;;  %v671_v56 = vmul.f32 %v667_v50, %v1219_v59  ;;  %v676_v57 = vmul.f32 %v1219_v59, %v1199_v48 }
  0x2b   : > { %436 = vst.msk [vmem:[%s1160_s12 + $0x40] sm:$0xff] %vm426_vm0, %v434_v19  ;;  %v686_v58 = vmul.f32 %v682_v54, %v1219_v59 }
  0x2c   : > { %943 = vst.msk [vmem:[%s1145_s24 + $0x48] sm:$0xff] %vm426_vm0, %v455_v3 }
  0x2d   : > { %945 = vst.msk [vmem:[%s1160_s12 + $0x48] sm:$0xff] %vm426_vm0, %v464_v27 }
  0x2e   : > { %948 = vst.msk [vmem:[%s1145_s24 + $0x50] sm:$0xff] %vm426_vm0, %v486_v21 }
  0x2f   : > { %950 = vst.msk [vmem:[%s1160_s12 + $0x50] sm:$0xff] %vm426_vm0, %v495_v33 }
  0x30   : > { %953 = vst.msk [vmem:[%s1145_s24 + $0x58] sm:$0xff] %vm426_vm0, %v517_v22 }
  0x31   : > { %955 = vst.msk [vmem:[%s1160_s12 + $0x58] sm:$0xff] %vm426_vm0, %v526_v38 }
  0x32   : > { %958 = vst.msk [vmem:[%s1145_s24 + $0x60] sm:$0xff] %vm426_vm0, %v548_v26 }
  0x33   : > { %960 = vst.msk [vmem:[%s1160_s12 + $0x60] sm:$0xff] %vm426_vm0, %v557_v42 }
  0x34   : > { %963 = vst.msk [vmem:[%s1145_s24 + $0x68] sm:$0xff] %vm426_vm0, %v579_v44 }
  0x35   : > { %965 = vst.msk [vmem:[%s1160_s12 + $0x68] sm:$0xff] %vm426_vm0, %v588_v46 }
  0x36   : > { %968 = vst.msk [vmem:[%s1145_s24 + $0x70] sm:$0xff] %vm426_vm0, %v610_v47 }
  0x37   : > { %970 = vst.msk [vmem:[%s1160_s12 + $0x70] sm:$0xff] %vm426_vm0, %v619_v49 }
  0x38   : > { %973 = vst.msk [vmem:[%s1145_s24 + $0x78] sm:$0xff] %vm426_vm0, %v641_v52 }
  0x39   : > { %975 = vst.msk [vmem:[%s1160_s12 + $0x78] sm:$0xff] %vm426_vm0, %v650_v53 }
  0x3a   : > { %663 = vst.msk [vmem:[%s1245_s21 + $0x4] sm:$0x3] %vm661_vm1, %v660_v55 }
  0x3b   : > { %674 = vst.msk [vmem:[%s1245_s21 + $0x4] sm:$0xc] %vm672_vm2, %v671_v56 }
  0x3c   : > { %678 = vst.msk [vmem:[%s1261_s29 + $0x4] sm:$0x3] %vm661_vm1, %v676_v57 }
  0x3d   : > { %688 = vst.msk [vmem:[%s1261_s29 + $0x4] sm:$0xc] %vm672_vm2, %v686_v58 }
  0x3e PF: > { %s18_s26 = sadd.s32 1, %s1026_s26   ;;  %s1355_s24 = smov %s1022_s25 }
  0x3f   : > { %p15_p5 = scmp.ge.s32.totalorder %s18_s26, 6   ;;  %s1356_s25 = smov %s1358_s27 }
  0x41   :  { %17 = sbr.rel (!%p15_p5) target bundleno = 2 (0x2), region = 133 }

// kernel: reverse.4
= control target key start
LH: loop header
LB: loop body
LE: loop exit
PB: predicated region body
PF: predicated region fallthrough
CT: control target
= control target key end

     0   :  { %s296_s0 = inlined_call_operand.vmem [shape: f32[8,8,8,3], index: 0, kind: input, shape index: {}]   ;;  %s297_s1 = inlined_call_operand.vmem [shape: f32[8,8,8,3], index: 1, kind: output, shape index: {}]  }
   0x1   :  { %v96_v0 = vld [vmem:[%s296_s0 + $0x10] sm:$0xff]  ;;  %v97_v1 = vld [vmem:[%s296_s0 + $0x28] sm:$0xff]  ;;  %v99_v2 = vld [vmem:[%s296_s0 + $0x40] sm:$0xff] }
   0x2   :  { %4 = vst [vmem:[%s297_s1] sm:$0xff] %v96_v0  ;;  %v101_v3 = vld [vmem:[%s296_s0 + $0x58] sm:$0xff]  ;;  %v103_v4 = vld [vmem:[%s296_s0 + $0x70] sm:$0xff]  ;;  %v105_v5 = vld [vmem:[%s296_s0 + $0x88] sm:$0xff] }
   0x3   :  { %98 = vst [vmem:[%s297_s1 + $0x18] sm:$0xff] %v97_v1  ;;  %v107_v6 = vld [vmem:[%s296_s0 + $0xa0] sm:$0xff]  ;;  %v109_v7 = vld [vmem:[%s296_s0 + $0xb8] sm:$0xff]  ;;  %v111_v8 = vld [vmem:[%s296_s0 + $0x8] sm:$0xff] }
   0x4   :  { %100 = vst [vmem:[%s297_s1 + $0x30] sm:$0xff] %v99_v2  ;;  %v113_v9 = vld [vmem:[%s296_s0 + $0x20] sm:$0xff]  ;;  %v115_v10 = vld [vmem:[%s296_s0 + $0x38] sm:$0xff]  ;;  %v117_v11 = vld [vmem:[%s296_s0 + $0x50] sm:$0xff] }
   0x5   :  { %102 = vst [vmem:[%s297_s1 + $0x48] sm:$0xff] %v101_v3  ;;  %v119_v12 = vld [vmem:[%s296_s0 + $0x68] sm:$0xff]  ;;  %v121_v13 = vld [vmem:[%s296_s0 + $0x80] sm:$0xff]  ;;  %v123_v14 = vld [vmem:[%s296_s0 + $0x98] sm:$0xff] }
   0x6   :  { %104 = vst [vmem:[%s297_s1 + $0x60] sm:$0xff] %v103_v4  ;;  %v125_v15 = vld [vmem:[%s296_s0 + $0xb0] sm:$0xff]  ;;  %v65_v16 = vld [vmem:[%s296_s0] sm:$0xff]  ;;  %v128_v17 = vld [vmem:[%s296_s0 + $0x18] sm:$0xff] }
   0x7   :  { %106 = vst [vmem:[%s297_s1 + $0x78] sm:$0xff] %v105_v5  ;;  %v130_v18 = vld [vmem:[%s296_s0 + $0x30] sm:$0xff]  ;;  %v132_v19 = vld [vmem:[%s296_s0 + $0x48] sm:$0xff]  ;;  %v134_v20 = vld [vmem:[%s296_s0 + $0x60] sm:$0xff] }
   0x8   :  { %108 = vst [vmem:[%s297_s1 + $0x90] sm:$0xff] %v107_v6  ;;  %v136_v21 = vld [vmem:[%s296_s0 + $0x78] sm:$0xff]  ;;  %v138_v22 = vld [vmem:[%s296_s0 + $0x90] sm:$0xff]  ;;  %v140_v23 = vld [vmem:[%s296_s0 + $0xa8] sm:$0xff] }
   0x9   :  { %110 = vst [vmem:[%s297_s1 + $0xa8] sm:$0xff] %v109_v7 }
   0xa   :  { %112 = vst [vmem:[%s297_s1 + $0x8] sm:$0xff] %v111_v8 }
   0xb   :  { %114 = vst [vmem:[%s297_s1 + $0x20] sm:$0xff] %v113_v9 }
   0xc   :  { %116 = vst [vmem:[%s297_s1 + $0x38] sm:$0xff] %v115_v10 }
   0xd   :  { %118 = vst [vmem:[%s297_s1 + $0x50] sm:$0xff] %v117_v11 }
   0xe   :  { %120 = vst [vmem:[%s297_s1 + $0x68] sm:$0xff] %v119_v12 }
   0xf   :  { %122 = vst [vmem:[%s297_s1 + $0x80] sm:$0xff] %v121_v13 }
  0x10   :  { %124 = vst [vmem:[%s297_s1 + $0x98] sm:$0xff] %v123_v14 }
  0x11   :  { %126 = vst [vmem:[%s297_s1 + $0xb0] sm:$0xff] %v125_v15 }
  0x12   :  { %127 = vst [vmem:[%s297_s1 + $0x10] sm:$0xff] %v65_v16 }
  0x13   :  { %129 = vst [vmem:[%s297_s1 + $0x28] sm:$0xff] %v128_v17 }
  0x14   :  { %131 = vst [vmem:[%s297_s1 + $0x40] sm:$0xff] %v130_v18 }
  0x15   :  { %133 = vst [vmem:[%s297_s1 + $0x58] sm:$0xff] %v132_v19 }
  0x16   :  { %135 = vst [vmem:[%s297_s1 + $0x70] sm:$0xff] %v134_v20 }
  0x17   :  { %137 = vst [vmem:[%s297_s1 + $0x88] sm:$0xff] %v136_v21 }
  0x18   :  { %139 = vst [vmem:[%s297_s1 + $0xa0] sm:$0xff] %v138_v22 }
  0x19   :  { %141 = vst [vmem:[%s297_s1 + $0xb8] sm:$0xff] %v140_v23 }

</bundles_post_ra>
